<compile_context>
chip_gen: v6e
topology: v6e:2x2x1
jax: 0.10.0
libtpu: 0.0.40
codegen_flags: <defaults>
</compile_context>

<pallas_src>
import jax
import jax.numpy as jnp
from jax.experimental import pallas as pl
from jax.experimental.pallas import tpu as pltpu


def _round_up(x, m):
    return (x + m - 1) // m * m


def _leaky_relu(x, slope=0.2):
    return jnp.where(x > 0, x, slope * x)


def _pick_batch_tile(B, max_tile):
    """Pick a batch tile (multiple of 8) that minimizes padding, preferring larger tiles."""
    candidates = [t for t in (1024, 512, 256, 128, 64, 32, 16, 8) if t <= max_tile]
    if not candidates:
        candidates = [8]
    best_tile = candidates[0]
    best_pad = _round_up(B, best_tile) - B
    for t in candidates[1:]:
        pad = _round_up(B, t) - B
        if pad < best_pad:            # ties keep the larger tile (fewer grid steps)
            best_pad, best_tile = pad, t
    return best_tile


def fc_generator_kernel(x_ref,
                        w1_ref, b1_ref,
                        w2_ref, b2_ref,
                        w3_ref, b3_ref,
                        w4_ref, b4_ref,
                        o_ref):
    # Weights are bf16 (streamed once, resident across batch tiles); activations
    # are cast to bf16 right before each MXU dot, accumulation / bias / LeakyReLU
    # stay in f32.
    h = jnp.dot(x_ref[...].astype(jnp.bfloat16), w1_ref[...],
                preferred_element_type=jnp.float32)
    h = _leaky_relu(h + b1_ref[...])

    h = jnp.dot(h.astype(jnp.bfloat16), w2_ref[...],
                preferred_element_type=jnp.float32)
    h = _leaky_relu(h + b2_ref[...])

    h = jnp.dot(h.astype(jnp.bfloat16), w3_ref[...],
                preferred_element_type=jnp.float32)
    h = _leaky_relu(h + b3_ref[...])

    out = jnp.dot(h.astype(jnp.bfloat16), w4_ref[...],
                  preferred_element_type=jnp.float32) + b4_ref[...]
    o_ref[...] = out.astype(o_ref.dtype)


def prepare_params(params, *, weight_dtype=jnp.bfloat16):
    """One-time (hoisted) weight prep: bf16 cast, K-pad of w1, lane-pad of w4/b4.

    params: w1..w4 stored (in, out) f32, b1..b4 stored (1, out) f32.
    """
    C = params["w1"].shape[0]
    N = params["w4"].shape[1]
    C_pad = _round_up(C, 128)
    N_pad = _round_up(N, 128)

    w1 = jnp.pad(params["w1"], ((0, C_pad - C), (0, 0))).astype(weight_dtype)
    w2 = params["w2"].astype(weight_dtype)
    w3 = params["w3"].astype(weight_dtype)
    w4 = jnp.pad(params["w4"], ((0, 0), (0, N_pad - N))).astype(weight_dtype)
    b4 = jnp.pad(params["b4"], ((0, 0), (0, N_pad - N)))

    prep = {
        "w1": w1, "b1": params["b1"],
        "w2": w2, "b2": params["b2"],
        "w3": w3, "b3": params["b3"],
        "w4": w4, "b4": b4,
        "code_size": C, "code_pad": C_pad,
        "output_size": N, "output_pad": N_pad,
    }
    # Materialize now so the cast/pad cost never lands on the forward path.
    return jax.tree_util.tree_map(
        lambda a: jax.block_until_ready(a) if isinstance(a, jax.Array) else a, prep)


def fc_generator_forward(x, prep, *, batch_tile=256, vmem_limit_bytes=32 * 1024 * 1024):
    """x: (B, code_size) f32; prep: output of prepare_params()."""
    B, C = x.shape
    assert C == prep["code_size"], (C, prep["code_size"])
    C_pad = prep["code_pad"]
    N = prep["output_size"]
    N_pad = prep["output_pad"]

    w1, b1 = prep["w1"], prep["b1"]
    w2, b2 = prep["w2"], prep["b2"]
    w3, b3 = prep["w3"], prep["b3"]
    w4, b4 = prep["w4"], prep["b4"]

    K1, H1 = w1.shape            # (code_pad, 256)
    H2 = w2.shape[1]             # 512
    H3 = w3.shape[1]             # 1024

    # Batch tile chosen to minimize padding (B=2 -> TB=8, not 256).
    TB = _pick_batch_tile(B, batch_tile)
    B_pad = _round_up(B, TB)
    if B_pad != B or C_pad != C:
        x = jnp.pad(x, ((0, B_pad - B), (0, C_pad - C)))

    # Single grid axis over batch tiles.  All weights/biases use constant block
    # indices so they are DMA'd once and stay resident in VMEM across tiles.
    grid = (B_pad // TB,)

    in_specs = [
        pl.BlockSpec((TB, C_pad), lambda i: (i, 0)),    # x   (batch tile)
        pl.BlockSpec((K1, H1), lambda i: (0, 0)),       # w1  (resident)
        pl.BlockSpec((1, H1), lambda i: (0, 0)),        # b1
        pl.BlockSpec((H1, H2), lambda i: (0, 0)),       # w2  (resident)
        pl.BlockSpec((1, H2), lambda i: (0, 0)),        # b2
        pl.BlockSpec((H2, H3), lambda i: (0, 0)),       # w3  (resident)
        pl.BlockSpec((1, H3), lambda i: (0, 0)),        # b3
        pl.BlockSpec((H3, N_pad), lambda i: (0, 0)),    # w4  (resident)
        pl.BlockSpec((1, N_pad), lambda i: (0, 0)),     # b4
    ]
    out_spec = pl.BlockSpec((TB, N_pad), lambda i: (i, 0))

    out = pl.pallas_call(
        fc_generator_kernel,
        out_shape=jax.ShapeDtypeStruct((B_pad, N_pad), jnp.float32),
        grid_spec=pltpu.PrefetchScalarGridSpec(
            num_scalar_prefetch=0,
            grid=grid,
            in_specs=in_specs,
            out_specs=out_spec,
        ),
        compiler_params=pltpu.CompilerParams(
            dimension_semantics=("parallel",),
            vmem_limit_bytes=vmem_limit_bytes,
        ),
    )(x, w1, b1, w2, b2, w3, b3, w4, b4)

    return out[:B, :N]


def init_params(key, code_size, output_size):
    """Deterministic init matching nn.Linear shapes (stored transposed: (in, out))."""
    dims = [(code_size, 256), (256, 512), (512, 1024), (1024, output_size)]
    params = {}
    for i, (fan_in, fan_out) in enumerate(dims, start=1):
        key, kw, kb = jax.random.split(key, 3)
        bound = 1.0 / jnp.sqrt(fan_in)
        params[f"w{i}"] = jax.random.uniform(
            kw, (fan_in, fan_out), jnp.float32, -bound, bound)
        params[f"b{i}"] = jax.random.uniform(
            kb, (1, fan_out), jnp.float32, -bound, bound)
    return params


if __name__ == "__main__":
    code_size = 100
    output_size = 784   # e.g. 28*28 MNIST-style generator output
    batch = 2

    key = jax.random.PRNGKey(0)
    key, kx = jax.random.split(key)
    x = jax.random.normal(kx, (batch, code_size), jnp.float32)
    params = init_params(key, code_size, output_size)

    # One-time weight prep (hoisted out of the per-call forward path).
    prep = prepare_params(params)

    out = fc_generator_forward(x, prep)
    out = jax.block_until_ready(out)

    # Pure-JAX reference mirroring the kernel's bf16-weight / f32-accumulate path.
    def ref(x, p):
        h = x
        for i in range(1, 4):
            h = jnp.dot(h.astype(jnp.bfloat16),
                        p[f"w{i}"].astype(jnp.bfloat16),
                        preferred_element_type=jnp.float32) + p[f"b{i}"]
            h = jnp.where(h > 0, h, 0.2 * h)
        return jnp.dot(h.astype(jnp.bfloat16),
                       p["w4"].astype(jnp.bfloat16),
                       preferred_element_type=jnp.float32) + p["b4"]

    expected = ref(x, params)
    assert out.shape == (batch, output_size), out.shape
    assert jnp.allclose(out, expected, atol=2e-2, rtol=2e-2), (
        float(jnp.max(jnp.abs(out - expected))))

    print("KERNEL_OK")
</pallas_src>

<mosaic_0001>
module attributes {stable_mosaic.version = 11 : i64} {
  func.func @fc_generator_kernel(%arg0: i32, %arg1: memref<8x128xf32, #tpu.memory_space<vmem>>, %arg2: memref<128x256xbf16, #tpu.memory_space<vmem>>, %arg3: memref<1x256xf32, #tpu.memory_space<vmem>>, %arg4: memref<256x512xbf16, #tpu.memory_space<vmem>>, %arg5: memref<1x512xf32, #tpu.memory_space<vmem>>, %arg6: memref<512x1024xbf16, #tpu.memory_space<vmem>>, %arg7: memref<1x1024xf32, #tpu.memory_space<vmem>>, %arg8: memref<1024x896xbf16, #tpu.memory_space<vmem>>, %arg9: memref<1x896xf32, #tpu.memory_space<vmem>>, %arg10: memref<8x896xf32, #tpu.memory_space<vmem>>) attributes {dimension_semantics = [#tpu.dimension_semantics<parallel>], iteration_bounds = array<i64: 1>, scalar_prefetch = 0 : i64, scratch_operands = 0 : i64, tpu.core_type = #tpu.core_type<tc>, window_params = [{transform_indices = @transform_0, window_bounds = array<i64: 8, 128>}, {pipeline_mode = #tpu.pipeline_mode<synchronous>, transform_indices = @transform_1, window_bounds = array<i64: 128, 256>}, {pipeline_mode = #tpu.pipeline_mode<synchronous>, transform_indices = @transform_2, window_bounds = array<i64: 1, 256>}, {pipeline_mode = #tpu.pipeline_mode<synchronous>, transform_indices = @transform_3, window_bounds = array<i64: 256, 512>}, {pipeline_mode = #tpu.pipeline_mode<synchronous>, transform_indices = @transform_4, window_bounds = array<i64: 1, 512>}, {pipeline_mode = #tpu.pipeline_mode<synchronous>, transform_indices = @transform_5, window_bounds = array<i64: 512, 1024>}, {pipeline_mode = #tpu.pipeline_mode<synchronous>, transform_indices = @transform_6, window_bounds = array<i64: 1, 1024>}, {pipeline_mode = #tpu.pipeline_mode<synchronous>, transform_indices = @transform_7, window_bounds = array<i64: 1024, 896>}, {pipeline_mode = #tpu.pipeline_mode<synchronous>, transform_indices = @transform_8, window_bounds = array<i64: 1, 896>}, {transform_indices = @transform_9, window_bounds = array<i64: 8, 896>}]} {
    %c0 = arith.constant 0 : index
    %c0_0 = arith.constant 0 : index
    %0 = vector.load %arg1[%c0, %c0_0] : memref<8x128xf32, #tpu.memory_space<vmem>>, vector<8x128xf32>
    %1 = arith.truncf %0 : vector<8x128xf32> to vector<8x128xbf16>
    %c0_1 = arith.constant 0 : index
    %c0_2 = arith.constant 0 : index
    %2 = vector.load %arg2[%c0_1, %c0_2] : memref<128x256xbf16, #tpu.memory_space<vmem>>, vector<128x256xbf16>
    %cst = arith.constant dense<0.000000e+00> : vector<8x256xf32>
    %3 = tpu.matmul %1, %2, %cst {dimension_numbers = #tpu.dot_dimension_numbers<[1], [0], [0], [1], [0, 0, 1, 1], [], []>} : vector<8x128xbf16>, vector<128x256xbf16>, vector<8x256xf32> -> vector<8x256xf32>
    %c0_3 = arith.constant 0 : index
    %c0_4 = arith.constant 0 : index
    %4 = vector.load %arg3[%c0_3, %c0_4] : memref<1x256xf32, #tpu.memory_space<vmem>>, vector<1x256xf32>
    %5 = vector.broadcast %4 : vector<1x256xf32> to vector<8x256xf32>
    %6 = arith.addf %3, %5 : vector<8x256xf32>
    %cst_5 = arith.constant 0.000000e+00 : f32
    %7 = vector.broadcast %cst_5 : f32 to vector<8x256xf32>
    %8 = arith.cmpf ogt, %6, %7 : vector<8x256xf32>
    %cst_6 = arith.constant 2.000000e-01 : f32
    %9 = vector.broadcast %cst_6 : f32 to vector<8x256xf32>
    %10 = arith.mulf %9, %6 : vector<8x256xf32>
    %11 = arith.select %8, %6, %10 : vector<8x256xi1>, vector<8x256xf32>
    %12 = arith.truncf %11 : vector<8x256xf32> to vector<8x256xbf16>
    %c0_7 = arith.constant 0 : index
    %c0_8 = arith.constant 0 : index
    %13 = vector.load %arg4[%c0_7, %c0_8] : memref<256x512xbf16, #tpu.memory_space<vmem>>, vector<256x512xbf16>
    %cst_9 = arith.constant dense<0.000000e+00> : vector<8x512xf32>
    %14 = tpu.matmul %12, %13, %cst_9 {dimension_numbers = #tpu.dot_dimension_numbers<[1], [0], [0], [1], [0, 0, 1, 1], [], []>} : vector<8x256xbf16>, vector<256x512xbf16>, vector<8x512xf32> -> vector<8x512xf32>
    %c0_10 = arith.constant 0 : index
    %c0_11 = arith.constant 0 : index
    %15 = vector.load %arg5[%c0_10, %c0_11] : memref<1x512xf32, #tpu.memory_space<vmem>>, vector<1x512xf32>
    %16 = vector.broadcast %15 : vector<1x512xf32> to vector<8x512xf32>
    %17 = arith.addf %14, %16 : vector<8x512xf32>
    %cst_12 = arith.constant 0.000000e+00 : f32
    %18 = vector.broadcast %cst_12 : f32 to vector<8x512xf32>
    %19 = arith.cmpf ogt, %17, %18 : vector<8x512xf32>
    %cst_13 = arith.constant 2.000000e-01 : f32
    %20 = vector.broadcast %cst_13 : f32 to vector<8x512xf32>
    %21 = arith.mulf %20, %17 : vector<8x512xf32>
    %22 = arith.select %19, %17, %21 : vector<8x512xi1>, vector<8x512xf32>
    %23 = arith.truncf %22 : vector<8x512xf32> to vector<8x512xbf16>
    %c0_14 = arith.constant 0 : index
    %c0_15 = arith.constant 0 : index
    %24 = vector.load %arg6[%c0_14, %c0_15] : memref<512x1024xbf16, #tpu.memory_space<vmem>>, vector<512x1024xbf16>
    %cst_16 = arith.constant dense<0.000000e+00> : vector<8x1024xf32>
    %25 = tpu.matmul %23, %24, %cst_16 {dimension_numbers = #tpu.dot_dimension_numbers<[1], [0], [0], [1], [0, 0, 1, 1], [], []>} : vector<8x512xbf16>, vector<512x1024xbf16>, vector<8x1024xf32> -> vector<8x1024xf32>
    %c0_17 = arith.constant 0 : index
    %c0_18 = arith.constant 0 : index
    %26 = vector.load %arg7[%c0_17, %c0_18] : memref<1x1024xf32, #tpu.memory_space<vmem>>, vector<1x1024xf32>
    %27 = vector.broadcast %26 : vector<1x1024xf32> to vector<8x1024xf32>
    %28 = arith.addf %25, %27 : vector<8x1024xf32>
    %cst_19 = arith.constant 0.000000e+00 : f32
    %29 = vector.broadcast %cst_19 : f32 to vector<8x1024xf32>
    %30 = arith.cmpf ogt, %28, %29 : vector<8x1024xf32>
    %cst_20 = arith.constant 2.000000e-01 : f32
    %31 = vector.broadcast %cst_20 : f32 to vector<8x1024xf32>
    %32 = arith.mulf %31, %28 : vector<8x1024xf32>
    %33 = arith.select %30, %28, %32 : vector<8x1024xi1>, vector<8x1024xf32>
    %34 = arith.truncf %33 : vector<8x1024xf32> to vector<8x1024xbf16>
    %c0_21 = arith.constant 0 : index
    %c0_22 = arith.constant 0 : index
    %35 = vector.load %arg8[%c0_21, %c0_22] : memref<1024x896xbf16, #tpu.memory_space<vmem>>, vector<1024x896xbf16>
    %cst_23 = arith.constant dense<0.000000e+00> : vector<8x896xf32>
    %36 = tpu.matmul %34, %35, %cst_23 {dimension_numbers = #tpu.dot_dimension_numbers<[1], [0], [0], [1], [0, 0, 1, 1], [], []>} : vector<8x1024xbf16>, vector<1024x896xbf16>, vector<8x896xf32> -> vector<8x896xf32>
    %c0_24 = arith.constant 0 : index
    %c0_25 = arith.constant 0 : index
    %37 = vector.load %arg9[%c0_24, %c0_25] : memref<1x896xf32, #tpu.memory_space<vmem>>, vector<1x896xf32>
    %38 = vector.broadcast %37 : vector<1x896xf32> to vector<8x896xf32>
    %39 = arith.addf %36, %38 : vector<8x896xf32>
    %c0_26 = arith.constant 0 : index
    %c0_27 = arith.constant 0 : index
    %40 = vector.load %arg10[%c0_26, %c0_27] : memref<8x896xf32, #tpu.memory_space<vmem>>, vector<8x896xf32>
    tpu.vector_store %arg10[%c0_26, %c0_27], %39 {strides = array<i32>} : memref<8x896xf32, #tpu.memory_space<vmem>>, vector<8x896xf32>,
    return
  }
  func.func @transform_0(%arg0: i32) -> (i32, i32) {
    %c0_i32 = arith.constant 0 : i32
    %c0_i32_0 = arith.constant 0 : i32
    return %arg0, %c0_i32 : i32, i32
  }
  func.func @transform_1(%arg0: i32) -> (i32, i32) {
    %c0_i32 = arith.constant 0 : i32
    %c0_i32_0 = arith.constant 0 : i32
    %c0_i32_1 = arith.constant 0 : i32
    return %c0_i32, %c0_i32_0 : i32, i32
  }
  func.func @transform_2(%arg0: i32) -> (i32, i32) {
    %c0_i32 = arith.constant 0 : i32
    %c0_i32_0 = arith.constant 0 : i32
    %c0_i32_1 = arith.constant 0 : i32
    return %c0_i32, %c0_i32_0 : i32, i32
  }
  func.func @transform_3(%arg0: i32) -> (i32, i32) {
    %c0_i32 = arith.constant 0 : i32
    %c0_i32_0 = arith.constant 0 : i32
    %c0_i32_1 = arith.constant 0 : i32
    return %c0_i32, %c0_i32_0 : i32, i32
  }
  func.func @transform_4(%arg0: i32) -> (i32, i32) {
    %c0_i32 = arith.constant 0 : i32
    %c0_i32_0 = arith.constant 0 : i32
    %c0_i32_1 = arith.constant 0 : i32
    return %c0_i32, %c0_i32_0 : i32, i32
  }
  func.func @transform_5(%arg0: i32) -> (i32, i32) {
    %c0_i32 = arith.constant 0 : i32
    %c0_i32_0 = arith.constant 0 : i32
    %c0_i32_1 = arith.constant 0 : i32
    return %c0_i32, %c0_i32_0 : i32, i32
  }
  func.func @transform_6(%arg0: i32) -> (i32, i32) {
    %c0_i32 = arith.constant 0 : i32
    %c0_i32_0 = arith.constant 0 : i32
    %c0_i32_1 = arith.constant 0 : i32
    return %c0_i32, %c0_i32_0 : i32, i32
  }
  func.func @transform_7(%arg0: i32) -> (i32, i32) {
    %c0_i32 = arith.constant 0 : i32
    %c0_i32_0 = arith.constant 0 : i32
    %c0_i32_1 = arith.constant 0 : i32
    return %c0_i32, %c0_i32_0 : i32, i32
  }
  func.func @transform_8(%arg0: i32) -> (i32, i32) {
    %c0_i32 = arith.constant 0 : i32
    %c0_i32_0 = arith.constant 0 : i32
    %c0_i32_1 = arith.constant 0 : i32
    return %c0_i32, %c0_i32_0 : i32, i32
  }
  func.func @transform_9(%arg0: i32) -> (i32, i32) {
    %c0_i32 = arith.constant 0 : i32
    %c0_i32_0 = arith.constant 0 : i32
    return %arg0, %c0_i32 : i32, i32
  }
}

</mosaic_0001>

<bundles_post_ra>
// kernel: tpu_custom_call.1
= control target key start
LH: loop header
LB: loop body
LE: loop exit
PB: predicated region body
PF: predicated region fallthrough
CT: control target
= control target key end

     0   :  { %14 = vsyncpa [#allocation3], 0  ;;  %s8409_s0 = inlined_call_operand.hbm [shape: f32[8,128], index: 0, kind: input, shape index: {}]   ;;  %s8410_s1 = inlined_call_operand.hbm [shape: bf16[128,256], index: 1, kind: input, shape index: {}]   ;;  %s8411_s2 = inlined_call_operand.hbm [shape: f32[1,256], index: 2, kind: input, shape index: {}]   ;;  %s8412_s3 = inlined_call_operand.hbm [shape: bf16[256,512], index: 3, kind: input, shape index: {}]   ;;  %s8413_s4 = inlined_call_operand.hbm [shape: f32[1,512], index: 4, kind: input, shape index: {}]   ;;  %s8414_s5 = inlined_call_operand.hbm [shape: bf16[512,1024], index: 5, kind: input, shape index: {}]   ;;  %s8415_s6 = inlined_call_operand.hbm [shape: f32[1,1024], index: 6, kind: input, shape index: {}]   ;;  %s8416_s7 = inlined_call_operand.hbm [shape: bf16[1024,896], index: 7, kind: input, shape index: {}]   ;;  %s8417_s8 = inlined_call_operand.hbm [shape: f32[1,896], index: 8, kind: input, shape index: {}]   ;;  %s8418_s9 = inlined_call_operand.hbm [shape: f32[8,896], index: 9, kind: output, shape index: {}]  }
   0x1   :  { %15 = vsyncpa [#allocation6], 0 }
   0x2   :  { %16 = vsyncpa [#allocation9], 0 }
   0x3   :  { %17 = vsyncpa [#allocation12], 0 }
   0x4   :  { %18 = vsyncpa [#allocation15], 0 }
   0x5   :  { %19 = vsyncpa [#allocation4], 0  ;;  %s8142_s30 = smov [#allocation5]  }
   0x6   :  { %s35_s10 = sshll.u32 %s8142_s30, 4  ;;  %s36_s10 = int_to_ptr.vmem [resolvable:$true] %s35_s10 }
   0x7   :  { %s7938_s11 = scalar_lea.vmem %s36_s10, 2048  ;;  %p7943_p1 = scmp.lt.s32.totalorder %s36_s10, %s36_s10 }
   0x8   :  { %p7939_p0 = scmp.ne.s32.totalorder %s36_s10, %s7938_s11  ;;  %p7944_p2 = scmp.lt.s32.totalorder %s7938_s11, %s7938_s11 }
   0xa   :  { %p7945_p3 = por %p7944_p2, %p7943_p1 }
   0xc   :  { %p7946_p4 = pnand %p7945_p3, %p7939_p0 }
   0xe   :  { %7949 = shalt.err (!%p7946_p4)
}
   0xf   :  { %s8143_s12 = smov 128   ;;  %s8144_s13 = smov 8  }
  0x10   :  { %41 = dma.hbm_to_vmem [thread:$0]  %s8410_s1, 2048, %s36_s10, [#allocation6], %s8143_s12, %s8143_s12, %s8144_s13  }
  0x11   :  { %s8145_s16 = smov [#allocation8]  }
  0x12   :  { %s57_s17 = sshll.u32 %s8145_s16, 4  ;;  %s58_s17 = int_to_ptr.vmem [resolvable:$true] %s57_s17 }
  0x13   :  { %s7958_s18 = scalar_lea.vmem %s58_s17, 8192  ;;  %p7963_p6 = scmp.lt.s32.totalorder %s58_s17, %s58_s17 }
  0x14   :  { %p7959_p5 = scmp.ne.s32.totalorder %s58_s17, %s7958_s18  ;;  %p7964_p7 = scmp.lt.s32.totalorder %s7958_s18, %s7958_s18 }
  0x16   :  { %p7965_p8 = por %p7964_p7, %p7963_p6 }
  0x18   :  { %p7966_p9 = pnand %p7965_p8, %p7959_p5 }
  0x1a   :  { %7969 = shalt.err (!%p7966_p9)
}
  0x1b   :  { %s8146_s19 = smov 256   ;;  %s8147_s20 = smov 16  }
  0x1c   :  { %63 = dma.hbm_to_vmem [thread:$0]  %s8412_s3, 8192, %s58_s17, [#allocation9], %s8146_s19, %s8146_s19, %s8147_s20  }
  0x1d   :  { %s8148_s23 = smov [#allocation11]  }
  0x1e   :  { %s79_s24 = sshll.u32 %s8148_s23, 4  ;;  %s80_s24 = int_to_ptr.vmem [resolvable:$true] %s79_s24 }
  0x1f   :  { %s7978_s1 = scalar_lea.vmem %s80_s24, 32768  ;;  %p7983_p11 = scmp.lt.s32.totalorder %s80_s24, %s80_s24 }
  0x20   :  { %p7979_p10 = scmp.ne.s32.totalorder %s80_s24, %s7978_s1  ;;  %p7984_p12 = scmp.lt.s32.totalorder %s7978_s1, %s7978_s1 }
  0x22   :  { %p7985_p13 = por %p7984_p12, %p7983_p11 }
  0x24   :  { %p7986_p0 = pnand %p7985_p13, %p7979_p10 }
  0x26   :  { %7989 = shalt.err (!%p7986_p0)
}
  0x27   :  { %s8149_s25 = smov 512   ;;  %s8150_s26 = smov 32  }
  0x28   :  { %85 = dma.hbm_to_vmem [thread:$0]  %s8414_s5, 32768, %s80_s24, [#allocation12], %s8149_s25, %s8149_s25, %s8150_s26  }
  0x29   :  { %s8151_s29 = smov [#allocation14]  }
  0x2a   :  { %s101_s30 = sshll.u32 %s8151_s29, 4  ;;  %s102_s30 = int_to_ptr.vmem [resolvable:$true] %s101_s30 }
  0x2b   :  { %s7998_s3 = scalar_lea.vmem %s102_s30, 57344  ;;  %p8003_p2 = scmp.lt.s32.totalorder %s102_s30, %s102_s30 }
  0x2c   :  { %p7999_p1 = scmp.ne.s32.totalorder %s102_s30, %s7998_s3  ;;  %p8004_p3 = scmp.lt.s32.totalorder %s7998_s3, %s7998_s3 }
  0x2e   :  { %p8005_p4 = por %p8004_p3, %p8003_p2 }
  0x30   :  { %p8006_p5 = pnand %p8005_p4, %p7999_p1 }
  0x32   :  { %8009 = shalt.err (!%p8006_p5)
}
  0x33   :  { %s8152_s10 = smov 448   ;;  %s8153_s11 = smov 28  }
  0x34   :  { %107 = dma.hbm_to_vmem [thread:$0]  %s8416_s7, 57344, %s102_s30, [#allocation15], %s8152_s10, %s8152_s10, %s8153_s11  }
  0x35   :  { %s8154_s14 = smov [#allocation2]   ;;  %s8155_s16 = smov [#allocation7]  }
  0x36   :  { %s26_s15 = sshll.u32 %s8154_s14, 4  ;;  %s48_s5 = sshll.u32 %s8155_s16, 4  ;;  %s27_s15 = int_to_ptr.vmem [resolvable:$true] %s26_s15  ;;  %s49_s5 = int_to_ptr.vmem [resolvable:$true] %s48_s5 }
  0x37   :  { %s8018_s17 = scalar_lea.vmem %s27_s15, 128  ;;  %p8023_p7 = scmp.lt.s32.totalorder %s27_s15, %s27_s15 }
  0x38   :  { %p8019_p6 = scmp.ne.s32.totalorder %s27_s15, %s8018_s17  ;;  %p8024_p8 = scmp.lt.s32.totalorder %s8018_s17, %s8018_s17 }
  0x3a   :  { %p8025_p9 = por %p8024_p8, %p8023_p7 }
  0x3c   :  { %p8026_p10 = pnand %p8025_p9, %p8019_p6 }
  0x3e   :  { %8029 = shalt.err (!%p8026_p10)
}
  0x3f   :  { %29 = dma.hbm_to_vmem [thread:$0]  %s8409_s0, 128, %s27_s15, [#allocation3]  }
  0x40   :  { %s8038_s20 = scalar_lea.vmem %s49_s5, 32  ;;  %p8043_p12 = scmp.lt.s32.totalorder %s49_s5, %s49_s5 }
  0x41   :  { %p8039_p11 = scmp.ne.s32.totalorder %s49_s5, %s8038_s20  ;;  %p8044_p13 = scmp.lt.s32.totalorder %s8038_s20, %s8038_s20 }
  0x43   :  { %p8045_p0 = por %p8044_p13, %p8043_p12 }
  0x45   :  { %p8046_p1 = pnand %p8045_p0, %p8039_p11 }
  0x47   :  { %8049 = shalt.err (!%p8046_p1)
}
  0x48   :  { %51 = dma.hbm_to_vmem [thread:$0]  %s8411_s2, 32, %s49_s5, [#allocation6]  }
  0x49   :  { %s8156_s22 = smov [#allocation10]   ;;  %s8157_s24 = smov [#allocation13]  }
  0x4a   :  { %s70_s23 = sshll.u32 %s8156_s22, 4  ;;  %s92_s1 = sshll.u32 %s8157_s24, 4  ;;  %s71_s23 = int_to_ptr.vmem [resolvable:$true] %s70_s23  ;;  %s93_s1 = int_to_ptr.vmem [resolvable:$true] %s92_s1 }
  0x4b   :  { %s8058_s25 = scalar_lea.vmem %s71_s23, 64  ;;  %p8063_p3 = scmp.lt.s32.totalorder %s71_s23, %s71_s23 }
  0x4c   :  { %p8059_p2 = scmp.ne.s32.totalorder %s71_s23, %s8058_s25  ;;  %p8064_p4 = scmp.lt.s32.totalorder %s8058_s25, %s8058_s25 }
  0x4e   :  { %p8065_p5 = por %p8064_p4, %p8063_p3 }
  0x50   :  { %p8066_p6 = pnand %p8065_p5, %p8059_p2 }
  0x52   :  { %8069 = shalt.err (!%p8066_p6)
}
  0x53   :  { %73 = dma.hbm_to_vmem [thread:$0]  %s8413_s4, 64, %s71_s23, [#allocation9]  }
  0x54   :  { %s8078_s27 = scalar_lea.vmem %s93_s1, 128  ;;  %p8083_p8 = scmp.lt.s32.totalorder %s93_s1, %s93_s1 }
  0x55   :  { %p8079_p7 = scmp.ne.s32.totalorder %s93_s1, %s8078_s27  ;;  %p8084_p9 = scmp.lt.s32.totalorder %s8078_s27, %s8078_s27 }
  0x57   :  { %p8085_p10 = por %p8084_p9, %p8083_p8 }
  0x59   :  { %p8086_p11 = pnand %p8085_p10, %p8079_p7 }
  0x5b   :  { %8089 = shalt.err (!%p8086_p11)
}
  0x5c   :  { %95 = dma.hbm_to_vmem [thread:$0]  %s8415_s6, 128, %s93_s1, [#allocation12]  }
  0x5d   :  { %s8158_s29 = smov [#allocation16]  }
  0x5e   :  { %s114_s30 = sshll.u32 %s8158_s29, 4  ;;  %s115_s30 = int_to_ptr.vmem [resolvable:$true] %s114_s30 }
  0x5f   :  { %s8098_s3 = scalar_lea.vmem %s115_s30, 112  ;;  %s8102_s10 = scalar_lea.vmem %s115_s30, 128 }
  0x60   :  { %p8099_p12 = scmp.ne.s32.totalorder %s115_s30, %s8098_s3  ;;  %p8103_p13 = scmp.lt.s32.totalorder %s115_s30, %s115_s30 }
  0x61   :  { %p8104_p0 = scmp.lt.s32.totalorder %s8102_s10, %s8098_s3 }
  0x63   :  { %p8105_p1 = por %p8104_p0, %p8103_p13 }
  0x65   :  { %p8106_p2 = pnand %p8105_p1, %p8099_p12 }
  0x67   :  { %8109 = shalt.err (!%p8106_p2)
}
  0x68   :  { %117 = dma.hbm_to_vmem [thread:$0]  %s8417_s8, 112, %s115_s30, [#allocation15]  }
  0x69   :  { %8130 = dma.done.wait [#allocation3], 128  }
  0x6a   :  { %8131 = vsyncadd [#allocation3], 4294967168 }
  0x6b   :  { %8132 = dma.done.wait [#allocation6], 2080  }
  0x6c   :  { %8133 = vsyncadd [#allocation6], 4294965216 }
  0x6d   :  { %8134 = dma.done.wait [#allocation9], 8256  }
  0x6e   :  { %8135 = vsyncadd [#allocation9], 4294959040 }
  0x6f   :  { %8136 = dma.done.wait [#allocation12], 32896  }
  0x70   :  { %8137 = vsyncadd [#allocation12], 4294934400 }
  0x71   :  { %8138 = dma.done.wait [#allocation15], 57456  }
  0x72   :  { %8139 = vsyncadd [#allocation15], 4294909840  ;;  %v8159_v0 = vmov 0   ;;  %v7169_v1 = vld [vmem:[#allocation5 + $0x74] ss:$8 sps:$4 sm:$0xff]   ;;  %s8160_s6 = smov [#allocation17]  }
  0x73   :  { %288 = vmatprep.mubr.bf16.mxu0 %v8159_v0  ;;  %v7171_v2 = vld [vmem:[#allocation5 + $0x70] ss:$8 sps:$4 sm:$0xff]   ;;  %256 = vmatprep.subr.bf16.mxu0 %v7169_v1  ;;  %v7172_v3 = vld [vmem:[#allocation5 + $0x64] ss:$8 sps:$4 sm:$0xff]   ;;  %v7174_v4 = vld [vmem:[#allocation5 + $0x60] ss:$8 sps:$4 sm:$0xff]  }
  0x74   :  { %257 = vmatpush1.bf16.msra.mxu0 %v7171_v2  ;;  %v7175_v5 = vld [vmem:[#allocation5 + $0x54] ss:$8 sps:$4 sm:$0xff]   ;;  %v7177_v6 = vld [vmem:[#allocation5 + $0x50] ss:$8 sps:$4 sm:$0xff]   ;;  %v7178_v7 = vld [vmem:[#allocation5 + $0x44] ss:$8 sps:$4 sm:$0xff]  }
  0x75   :  { %258 = vmatprep.subr.bf16.mxu0 %v7172_v3  ;;  %v7180_v8 = vld [vmem:[#allocation5 + $0x40] ss:$8 sps:$4 sm:$0xff]   ;;  %v7181_v10 = vld [vmem:[#allocation5 + $0x34] ss:$8 sps:$4 sm:$0xff]   ;;  %v7183_v13 = vld [vmem:[#allocation5 + $0x30] ss:$8 sps:$4 sm:$0xff]  }
  0x76   :  { %v7193_v9 = vld [vmem:[#allocation8 + $0xe4] ss:$16 sps:$4 sm:$0xff]   ;;  %v7198_v11 = vld [vmem:[#allocation8 + $0xe0] ss:$16 sps:$4 sm:$0xff]   ;;  %v7197_v27 = vld [vmem:[#allocation8 + $0xec] ss:$16 sps:$4 sm:$0xff]  }
  0x77   :  { %711 = vmatprep.subr.bf16.mxu1 %v7193_v9  ;;  %v7199_v12 = vld [vmem:[#allocation8 + $0xc4] ss:$16 sps:$4 sm:$0xff]   ;;  %v7204_v15 = vld [vmem:[#allocation8 + $0xc0] ss:$16 sps:$4 sm:$0xff]   ;;  %v7195_v31 = vld [vmem:[#allocation8 + $0xe8] ss:$16 sps:$4 sm:$0xff]  }
  0x78   :  { %259 = vmatpush1.bf16.msra.mxu0 %v7174_v4  ;;  %v7184_v14 = vld [vmem:[#allocation5 + $0x24] ss:$8 sps:$4 sm:$0xff]   ;;  %712 = vmatpush1.bf16.msra.mxu1 %v7198_v11  ;;  %v7186_v17 = vld [vmem:[#allocation5 + $0x20] ss:$8 sps:$4 sm:$0xff]   ;;  %v7187_v18 = vld [vmem:[#allocation5 + $0x14] ss:$8 sps:$4 sm:$0xff]  }
  0x79   :  { %260 = vmatprep.subr.bf16.mxu0 %v7175_v5  ;;  %713 = vmatprep.subr.bf16.mxu1 %v7199_v12  ;;  %v7205_v16 = vld [vmem:[#allocation8 + $0xa4] ss:$16 sps:$4 sm:$0xff]   ;;  %v7210_v19 = vld [vmem:[#allocation8 + $0xa0] ss:$16 sps:$4 sm:$0xff]   ;;  %v7203_v32 = vld [vmem:[#allocation8 + $0xcc] ss:$16 sps:$4 sm:$0xff]  }
  0x7a   :  { %v7211_v20 = vld [vmem:[#allocation8 + $0x84] ss:$16 sps:$4 sm:$0xff]   ;;  %v7216_v23 = vld [vmem:[#allocation8 + $0x80] ss:$16 sps:$4 sm:$0xff]   ;;  %v7201_v35 = vld [vmem:[#allocation8 + $0xc8] ss:$16 sps:$4 sm:$0xff]  }
  0x7b   :  { %v7189_v21 = vld [vmem:[#allocation5 + $0x10] ss:$8 sps:$4 sm:$0xff]   ;;  %v7190_v22 = vld [vmem:[#allocation5 + $0x4] ss:$8 sps:$4 sm:$0xff]   ;;  %v7192_v25 = vld [vmem:[#allocation5] ss:$8 sps:$4 sm:$0xff]  }
  0x7c   :  { %261 = vmatpush1.bf16.msra.mxu0 %v7177_v6  ;;  %714 = vmatpush1.bf16.msra.mxu1 %v7204_v15  ;;  %v7217_v24 = vld [vmem:[#allocation8 + $0x64] ss:$16 sps:$4 sm:$0xff]   ;;  %v7222_v28 = vld [vmem:[#allocation8 + $0x60] ss:$16 sps:$4 sm:$0xff]   ;;  %v7209_v36 = vld [vmem:[#allocation8 + $0xac] ss:$16 sps:$4 sm:$0xff]  }
  0x7d   :  { %262 = vmatprep.subr.bf16.mxu0 %v7178_v7  ;;  %715 = vmatprep.subr.bf16.mxu1 %v7205_v16  ;;  %v146_v26 = vld [vmem:[#allocation2] sm:$0xff]  ;;  %v7228_v33 = vld [vmem:[#allocation8 + $0x40] ss:$16 sps:$4 sm:$0xff]   ;;  %s6265_s8 = sshll.u32 %s8160_s6, 4  ;;  %s6266_s8 = int_to_ptr.vmem [resolvable:$true] %s6265_s8 }
  0x7e   :  { %v7223_v29 = vld [vmem:[#allocation8 + $0x44] ss:$16 sps:$4 sm:$0xff]   ;;  %v147_v30 = vpack.c.bf16 %v146_v26, %v146_v26  ;;  %v7234_v37 = vld [vmem:[#allocation8 + $0x20] ss:$16 sps:$4 sm:$0xff]   ;;  %v7207_v39 = vld [vmem:[#allocation8 + $0xa8] ss:$16 sps:$4 sm:$0xff]   ;;  %p8115_p4 = scmp.lt.s32.totalorder %s6266_s8, %s6266_s8 }
  0x7f   :  { %v7229_v34 = vld [vmem:[#allocation8 + $0x24] ss:$16 sps:$4 sm:$0xff]   ;;  %v7215_v40 = vld [vmem:[#allocation8 + $0x8c] ss:$16 sps:$4 sm:$0xff]   ;;  %v7240_v41 = vld [vmem:[#allocation8] ss:$16 sps:$4 sm:$0xff]  }
  0x80   :  { %263 = vmatpush1.bf16.msra.mxu0 %v7180_v8  ;;  %716 = vmatpush1.bf16.msra.mxu1 %v7210_v19  ;;  %v7235_v38 = vld [vmem:[#allocation8 + $0x4] ss:$16 sps:$4 sm:$0xff]   ;;  %v7213_v43 = vld [vmem:[#allocation8 + $0x88] ss:$16 sps:$4 sm:$0xff]   ;;  %v7221_v44 = vld [vmem:[#allocation8 + $0x6c] ss:$16 sps:$4 sm:$0xff]  }
  0x81   :  { %264 = vmatprep.subr.bf16.mxu0 %v7181_v10  ;;  %717 = vmatprep.subr.bf16.mxu1 %v7211_v20  ;;  %v7241_v42 = vld [vmem:[#allocation8 + $0x1e4] ss:$16 sps:$4 sm:$0xff]   ;;  %v7246_v45 = vld [vmem:[#allocation8 + $0x1e0] ss:$16 sps:$4 sm:$0xff]   ;;  %v7219_v47 = vld [vmem:[#allocation8 + $0x68] ss:$16 sps:$4 sm:$0xff]  }
  0x82   :  { %v7247_v46 = vld [vmem:[#allocation8 + $0x1c4] ss:$16 sps:$4 sm:$0xff]   ;;  %v7227_v48 = vld [vmem:[#allocation8 + $0x4c] ss:$16 sps:$4 sm:$0xff]   ;;  %v7252_v49 = vld [vmem:[#allocation8 + $0x1c0] ss:$16 sps:$4 sm:$0xff]  }
  0x83   :  { %v7253_v50 = vld [vmem:[#allocation8 + $0x1a4] ss:$16 sps:$4 sm:$0xff]   ;;  %v7225_v51 = vld [vmem:[#allocation8 + $0x48] ss:$16 sps:$4 sm:$0xff]   ;;  %v7258_v52 = vld [vmem:[#allocation8 + $0x1a0] ss:$16 sps:$4 sm:$0xff]  }
  0x84   :  { %265 = vmatpush1.bf16.msra.mxu0 %v7183_v13  ;;  %718 = vmatpush1.bf16.msra.mxu1 %v7216_v23  ;;  %v7233_v53 = vld [vmem:[#allocation8 + $0x2c] ss:$16 sps:$4 sm:$0xff]   ;;  %v7259_v54 = vld [vmem:[#allocation8 + $0x184] ss:$16 sps:$4 sm:$0xff]   ;;  %v7231_v55 = vld [vmem:[#allocation8 + $0x28] ss:$16 sps:$4 sm:$0xff]  }
  0x85   :  { %266 = vmatprep.subr.bf16.mxu0 %v7184_v14  ;;  %719 = vmatprep.subr.bf16.mxu1 %v7217_v24  ;;  %v7264_v56 = vld [vmem:[#allocation8 + $0x180] ss:$16 sps:$4 sm:$0xff]   ;;  %v7239_v57 = vld [vmem:[#allocation8 + $0xc] ss:$16 sps:$4 sm:$0xff]   ;;  %v7265_v58 = vld [vmem:[#allocation8 + $0x164] ss:$16 sps:$4 sm:$0xff]  }
  0x86   :  { %v7237_v59 = vld [vmem:[#allocation8 + $0x8] ss:$16 sps:$4 sm:$0xff]   ;;  %v7270_v60 = vld [vmem:[#allocation8 + $0x160] ss:$16 sps:$4 sm:$0xff]   ;;  %v7245_v61 = vld [vmem:[#allocation8 + $0x1ec] ss:$16 sps:$4 sm:$0xff]  }
  0x87   :  { %v7271_v62 = vld [vmem:[#allocation8 + $0x144] ss:$16 sps:$4 sm:$0xff]   ;;  %v7243_v63 = vld [vmem:[#allocation8 + $0x1e8] ss:$16 sps:$4 sm:$0xff]   ;;  %v7251_v0 = vld [vmem:[#allocation8 + $0x1cc] ss:$16 sps:$4 sm:$0xff]  }
  0x88   :  { %267 = vmatpush1.bf16.msra.mxu0 %v7186_v17  ;;  %720 = vmatpush1.bf16.msra.mxu1 %v7222_v28  ;;  %v7249_v1 = vld [vmem:[#allocation8 + $0x1c8] ss:$16 sps:$4 sm:$0xff]   ;;  %v7257_v2 = vld [vmem:[#allocation8 + $0x1ac] ss:$16 sps:$4 sm:$0xff]   ;;  %v7276_v10 = vld [vmem:[#allocation8 + $0x140] ss:$16 sps:$4 sm:$0xff]  }
  0x89   :  { %268 = vmatprep.subr.bf16.mxu0 %v7187_v18  ;;  %721 = vmatprep.subr.bf16.mxu1 %v7223_v29  ;;  %v7255_v3 = vld [vmem:[#allocation8 + $0x1a8] ss:$16 sps:$4 sm:$0xff]   ;;  %v7263_v4 = vld [vmem:[#allocation8 + $0x18c] ss:$16 sps:$4 sm:$0xff]   ;;  %v7277_v11 = vld [vmem:[#allocation8 + $0x124] ss:$16 sps:$4 sm:$0xff]  }
  0x8a   :  { %v7261_v5 = vld [vmem:[#allocation8 + $0x188] ss:$16 sps:$4 sm:$0xff]   ;;  %v7269_v6 = vld [vmem:[#allocation8 + $0x16c] ss:$16 sps:$4 sm:$0xff]   ;;  %v7282_v14 = vld [vmem:[#allocation8 + $0x120] ss:$16 sps:$4 sm:$0xff]  }
  0x8b   :  { %v7267_v7 = vld [vmem:[#allocation8 + $0x168] ss:$16 sps:$4 sm:$0xff]   ;;  %v7275_v8 = vld [vmem:[#allocation8 + $0x14c] ss:$16 sps:$4 sm:$0xff]   ;;  %v7283_v15 = vld [vmem:[#allocation8 + $0x104] ss:$16 sps:$4 sm:$0xff]  }
  0x8c   :  { %269 = vmatpush1.bf16.msra.mxu0 %v7189_v21  ;;  %722 = vmatpush1.bf16.msra.mxu1 %v7228_v33  ;;  %v7273_v9 = vld [vmem:[#allocation8 + $0x148] ss:$16 sps:$4 sm:$0xff]   ;;  %v7281_v12 = vld [vmem:[#allocation8 + $0x12c] ss:$16 sps:$4 sm:$0xff]   ;;  %v7288_v18 = vld [vmem:[#allocation8 + $0x100] ss:$16 sps:$4 sm:$0xff]  }
  0x8d   :  { %270 = vmatprep.subr.bf16.mxu0 %v7190_v22  ;;  %723 = vmatprep.subr.bf16.mxu1 %v7229_v34  ;;  %v7279_v13 = vld [vmem:[#allocation8 + $0x128] ss:$16 sps:$4 sm:$0xff]   ;;  %v7287_v16 = vld [vmem:[#allocation8 + $0x10c] ss:$16 sps:$4 sm:$0xff]   ;;  %s8110_s12 = scalar_lea.vmem %s6266_s8, 896 }
  0x8e   :  { %v7285_v17 = vld [vmem:[#allocation8 + $0x108] ss:$16 sps:$4 sm:$0xff]   ;;  %v164_v29 = vld [vmem:[#allocation7] sm:$0x3]  ;;  %p8111_p3 = scmp.ne.s32.totalorder %s6266_s8, %s8110_s12  ;;  %p8116_p5 = scmp.lt.s32.totalorder %s8110_s12, %s8110_s12 }
  0x8f   :  { %v865_v19 = vld [vmem:[#allocation11 + $0x1c0] sm:$0xff] }
  0x90   :  { %271 = vmatpush1.bf16.msra.mxu0 %v7192_v25  ;;  %724 = vmatpush1.bf16.msra.mxu1 %v7234_v37  ;;  %v869_v20 = vld [vmem:[#allocation11 + $0x1e0] sm:$0xff]  ;;  %p8117_p6 = por %p8116_p5, %p8115_p4 }
  0x91   :  { %752 = vmatprep.subr.bf16.mxu0 %v7197_v27  ;;  %725 = vmatprep.subr.bf16.mxu1 %v7235_v38  ;;  %v993_v21 = vld [vmem:[#allocation11 + $0x5c0] sm:$0xff]  ;;  %v6414_v22 = vcombine.low %v865_v19, %v869_v20  ;;  %v6415_v23 = vcombine.high %v865_v19, %v869_v20  ;;  %v166_v27 = vlaneseq }
  0x92   :  { %v997_v24 = vld [vmem:[#allocation11 + $0x5e0] sm:$0xff]  ;;  %p8118_p7 = pnand %p8117_p6, %p8111_p3 }
  0x93   :  { %289 = vmatmul.mubr.bf16.vlgmr.msra.gmra.mxu0 %v147_v30  ;;  %v6542_v25 = vcombine.low %v993_v21, %v997_v24  ;;  %v6543_v26 = vcombine.high %v993_v21, %v997_v24  ;;  %v8238_v28 = vshrl.u32 %v166_v27, 7  ;;  %v817_v20 = vld [vmem:[#allocation11 + $0x40] sm:$0xff] }
  0x94   :  { %753 = vmatpush1.bf16.msra.mxu0 %v7195_v31  ;;  %726 = vmatpush1.bf16.msra.mxu1 %v7240_v41  ;;  %v861_v41 = vld [vmem:[#allocation11 + $0x1a0] sm:$0xff] }
  0x95   :  { %754 = vmatprep.subr.bf16.mxu0 %v7203_v32  ;;  %727 = vmatprep.subr.bf16.mxu1 %v7241_v42  ;;  %v8241_v30 = vsub.s32 0, %v8238_v28  ;;  %v8244_v31 = vsub.s32 1, %v8238_v28  ;;  %v985_v42 = vld [vmem:[#allocation11 + $0x580] sm:$0xff] }
  0x96   :  { %v821_v21 = vld [vmem:[#allocation11 + $0x60] sm:$0xff] }
  0x97   :  { %v169_v32 = vrot.slane %v164_v29, %v8241_v30  ;;  %v173_v33 = vrot.slane %v164_v29, %v8244_v31  ;;  %v809_v29 = vld [vmem:[#allocation11] sm:$0xff] }
  0x98   :  { %755 = vmatpush1.bf16.msra.mxu0 %v7201_v35  ;;  %728 = vmatpush2.bf16.msra.mxu1 %v7246_v45 }
  0x99   :  { %756 = vmatprep.subr.bf16.mxu0 %v7209_v36  ;;  %729 = vmatprep.subr.bf16.mxu1 %v7247_v46 }
  0x9c   :  { %757 = vmatpush1.bf16.msra.mxu0 %v7207_v39  ;;  %730 = vmatpush2.bf16.msra.mxu1 %v7252_v49  ;;  %v849_v49 = vld [vmem:[#allocation11 + $0x140] sm:$0xff] }
  0x9d   :  { %758 = vmatprep.subr.bf16.mxu0 %v7215_v40  ;;  %731 = vmatprep.subr.bf16.mxu1 %v7253_v50  ;;  %v857_v40 = vld [vmem:[#allocation11 + $0x180] sm:$0xff] }
  0x9e   :  { %v853_v50 = vld [vmem:[#allocation11 + $0x160] sm:$0xff] }
  0xa0   :  { %759 = vmatpush1.bf16.msra.mxu0 %v7213_v43  ;;  %732 = vmatpush2.bf16.msra.mxu1 %v7258_v52  ;;  %v981_v52 = vld [vmem:[#allocation11 + $0x560] sm:$0xff] }
  0xa1   :  { %760 = vmatprep.subr.bf16.mxu0 %v7221_v44  ;;  %733 = vmatprep.subr.bf16.mxu1 %v7259_v54  ;;  %v989_v44 = vld [vmem:[#allocation11 + $0x5a0] sm:$0xff]  ;;  %v6407_v54 = vcombine.high %v857_v40, %v861_v41 }
  0xa4   :  { %761 = vmatpush1.bf16.msra.mxu0 %v7219_v47  ;;  %734 = vmatpush2.bf16.msra.mxu1 %v7264_v56  ;;  %v6406_v56 = vcombine.low %v857_v40, %v861_v41  ;;  %v933_v40 = vld [vmem:[#allocation11 + $0x3e0] sm:$0xff] }
  0xa5   :  { %762 = vmatprep.subr.bf16.mxu0 %v7227_v48  ;;  %735 = vmatprep.subr.bf16.mxu1 %v7265_v58  ;;  %v841_v58 = vld [vmem:[#allocation11 + $0x100] sm:$0xff] }
  0xa6   :  { %v1057_v41 = vld [vmem:[#allocation11 + $0x7c0] sm:$0xff] }
  0xa8   :  { %763 = vmatpush1.bf16.msra.mxu0 %v7225_v51  ;;  %736 = vmatpush2.bf16.msra.mxu1 %v7270_v60  ;;  %v977_v51 = vld [vmem:[#allocation11 + $0x540] sm:$0xff] }
  0xa9   :  { %764 = vmatprep.subr.bf16.mxu0 %v7233_v53  ;;  %737 = vmatprep.subr.bf16.mxu1 %v7271_v62  ;;  %v969_v60 = vld [vmem:[#allocation11 + $0x500] sm:$0xff]  ;;  %v6399_v62 = vcombine.high %v849_v49, %v853_v50 }
  0xac   :  { %765 = vmatpush1.bf16.msra.mxu0 %v7231_v55  ;;  %738 = vmatpush2.bf16.msra.mxu1 %v7276_v10  ;;  %v6535_v55 = vcombine.high %v985_v42, %v989_v44 }
  0xad   :  { %766 = vmatprep.subr.bf16.mxu0 %v7239_v57  ;;  %739 = vmatprep.subr.bf16.mxu1 %v7277_v11  ;;  %v6534_v57 = vcombine.low %v985_v42, %v989_v44  ;;  %v1061_v42 = vld [vmem:[#allocation11 + $0x7e0] sm:$0xff] }
  0xb0   :  { %767 = vmatpush1.bf16.msra.mxu0 %v7237_v59  ;;  %740 = vmatpush2.bf16.msra.mxu1 %v7282_v14  ;;  %v845_v59 = vld [vmem:[#allocation11 + $0x120] sm:$0xff] }
  0xb1   :  { %768 = vmatprep.subr.bf16.mxu0 %v7245_v61  ;;  %741 = vmatprep.subr.bf16.mxu1 %v7283_v15  ;;  %v973_v61 = vld [vmem:[#allocation11 + $0x520] sm:$0xff] }
  0xb2   :  { %v953_v14 = vld [vmem:[#allocation11 + $0x480] sm:$0xff] }
  0xb3   :  { %v957_v15 = vld [vmem:[#allocation11 + $0x4a0] sm:$0xff] }
  0xb4   :  { %769 = vmatpush2.bf16.msra.mxu0 %v7243_v63  ;;  %742 = vmatpush2.bf16.msra.mxu1 %v7288_v18  ;;  %v6527_v63 = vcombine.high %v977_v51, %v981_v52  ;;  %v6503_v19 = vcombine.high %v953_v14, %v957_v15 }
  0xb5   :  { %770 = vmatprep.subr.bf16.mxu0 %v7251_v0  ;;  %2387 = vmatprep.subr.bf16.mxu1 %v6415_v23  ;;  %v6398_v0 = vcombine.low %v849_v49, %v853_v50  ;;  %v949_v23 = vld [vmem:[#allocation11 + $0x460] sm:$0xff] }
  0xb6   :  { %v1049_v49 = vld [vmem:[#allocation11 + $0x780] sm:$0xff] }
  0xb7   :  { %v1053_v50 = vld [vmem:[#allocation11 + $0x7a0] sm:$0xff] }
  0xb8   :  { %771 = vmatpush2.bf16.msra.mxu0 %v7249_v1  ;;  %v6526_v1 = vcombine.low %v977_v51, %v981_v52  ;;  %v6606_v52 = vcombine.low %v1057_v41, %v1061_v42 }
  0xb9   :  { %772 = vmatprep.subr.bf16.mxu0 %v7257_v2  ;;  %v833_v2 = vld [vmem:[#allocation11 + $0xc0] sm:$0xff] }
  0xbc   :  { %773 = vmatpush2.bf16.msra.mxu0 %v7255_v3  ;;  %v837_v3 = vld [vmem:[#allocation11 + $0xe0] sm:$0xff] }
  0xbd   :  { %774 = vmatprep.subr.bf16.mxu0 %v7263_v4  ;;  %v961_v4 = vld [vmem:[#allocation11 + $0x4c0] sm:$0xff]  ;;  %v6383_v10 = vcombine.high %v833_v2, %v837_v3 }
  0xc0   :  { %775 = vmatpush2.bf16.msra.mxu0 %v7261_v5  ;;  %v965_v5 = vld [vmem:[#allocation11 + $0x4e0] sm:$0xff] }
  0xc1   :  { %776 = vmatprep.subr.bf16.mxu0 %v7269_v6  ;;  %v6391_v6 = vcombine.high %v841_v58, %v845_v59  ;;  %v6511_v11 = vcombine.high %v961_v4, %v965_v5 }
  0xc4   :  { %777 = vmatpush2.bf16.msra.mxu0 %v7267_v7  ;;  %v6519_v7 = vcombine.high %v969_v60, %v973_v61 }
  0xc5   :  { %778 = vmatprep.subr.bf16.mxu0 %v7275_v8  ;;  %v6390_v8 = vcombine.low %v841_v58, %v845_v59  ;;  %v1045_v58 = vld [vmem:[#allocation11 + $0x760] sm:$0xff] }
  0xc8   :  { %779 = vmatpush2.bf16.msra.mxu0 %v7273_v9  ;;  %v6518_v9 = vcombine.low %v969_v60, %v973_v61  ;;  %v6598_v60 = vcombine.low %v1049_v49, %v1053_v50 }
  0xc9   :  { %780 = vmatprep.subr.bf16.mxu0 %v7281_v12  ;;  %v825_v12 = vld [vmem:[#allocation11 + $0x80] sm:$0xff] }
  0xcc   :  { %781 = vmatpush2.bf16.msra.mxu0 %v7279_v13  ;;  %v829_v13 = vld [vmem:[#allocation11 + $0xa0] sm:$0xff] }
  0xcd   :  { %782 = vmatprep.subr.bf16.mxu0 %v7287_v16  ;;  %v6382_v16 = vcombine.low %v833_v2, %v837_v3  ;;  %v6375_v18 = vcombine.high %v825_v12, %v829_v13  ;;  %v6374_v24 = vcombine.low %v825_v12, %v829_v13  ;;  %v1037_v2 = vld [vmem:[#allocation11 + $0x720] sm:$0xff] }
  0xd0   :  { %783 = vmatpush2.bf16.msra.mxu0 %v7285_v17  ;;  %v6510_v17 = vcombine.low %v961_v4, %v965_v5 }
  0xd1   :  { %2428 = vmatprep.subr.bf16.mxu0 %v6543_v26  ;;  %v6367_v26 = vcombine.high %v817_v20, %v821_v21 }
 0x153   :  { %v290_v34 = vpop.f32.mrf.mxu0 }
 0x154   :  { %v291_v35 = vadd.f32 %v290_v34, %v169_v32  ;;  %v813_v32 = vld [vmem:[#allocation11 + $0x20] sm:$0xff] }
 0x155   :  { %v292_v36 = vpop.f32.mrf.mxu0  ;;  %v941_v34 = vld [vmem:[#allocation11 + $0x420] sm:$0xff] }
 0x156   :  { %vm297_vm0 = vcmp.gt.f32.partialorder %v291_v35, 0.0  ;;  %v299_v37 = vmul.f32 0.2, %v291_v35  ;;  %v293_v38 = vadd.f32 %v292_v36, %v173_v33  ;;  %v937_v33 = vld [vmem:[#allocation11 + $0x400] sm:$0xff] }
 0x157   :  { %v294_v39 = vpop.f32.mrf.mxu0  ;;  %v6486_v44 = vcombine.low %v937_v33, %v941_v34 }
 0x158   :  { %v300_v43 = vmul.f32 0.2, %v293_v38  ;;  %vm298_vm1 = vcmp.gt.f32.partialorder %v293_v38, 0.0  ;;  %v301_v46 = vsel %vm297_vm0, %v291_v35, %v299_v37  ;;  %v6366_v35 = vcombine.low %v817_v20, %v821_v21  ;;  %v929_v39 = vld [vmem:[#allocation11 + $0x3c0] sm:$0xff] }
 0x159   :  { %v295_v45 = vpop.f32.mrf.mxu0  ;;  %v303_v53 = vpack.c.bf16 %v301_v46, %v301_v46  ;;  %v6359_v37 = vcombine.high %v809_v29, %v813_v32  ;;  %v6607_v46 = vcombine.high %v1057_v41, %v1061_v42  ;;  %v6478_v51 = vcombine.low %v929_v39, %v933_v40 }
 0x15a   :  { %v302_v47 = vsel %vm298_vm1, %v293_v38, %v300_v43  ;;  %v6487_v38 = vcombine.high %v937_v33, %v941_v34  ;;  %v6358_v43 = vcombine.low %v809_v29, %v813_v32  ;;  %v6479_v45 = vcombine.high %v929_v39, %v933_v40  ;;  %v1013_v32 = vld [vmem:[#allocation11 + $0x660] sm:$0xff] }
 0x15b   :  { %v304_v48 = vpack.c.bf16 %v302_v47, %v302_v47  ;;  %v921_v47 = vld [vmem:[#allocation11 + $0x380] sm:$0xff] }
 0x15c   :  { %v1005_v40 = vld [vmem:[#allocation11 + $0x620] sm:$0xff] }
 0x15d   :  { %743 = vmatprep.mubr.bf16.mxu1 %v304_v48  ;;  %784 = vmatprep.mubr.bf16.mxu0 %v304_v48  ;;  %v925_v48 = vld [vmem:[#allocation11 + $0x3a0] sm:$0xff] }
 0x15e   :  { %744 = vmatmul.mubr.bf16.vlgmr.msra.gmra.mxu1 %v303_v53  ;;  %785 = vmatmul.mubr.bf16.vlgmr.msra.gmra.mxu0 %v303_v53  ;;  %v6471_v53 = vcombine.high %v921_v47, %v925_v48  ;;  %v6470_v59 = vcombine.low %v921_v47, %v925_v48  ;;  %v998_v48 = vld [vmem:[#allocation11 + $0x5e8] sm:$0xff] }
 0x15f   :  { %2388 = vmatpush1.bf16.msra.mxu1 %v6414_v22  ;;  %2429 = vmatpush1.bf16.msra.mxu0 %v6542_v25  ;;  %v945_v22 = vld [vmem:[#allocation11 + $0x440] sm:$0xff]  ;;  %v6502_v25 = vcombine.low %v953_v14, %v957_v15 }
 0x160   :  { %2389 = vmatprep.subr.bf16.mxu1 %v6407_v54  ;;  %2430 = vmatprep.subr.bf16.mxu0 %v6535_v55  ;;  %v6495_v27 = vcombine.high %v945_v22, %v949_v23  ;;  %v6494_v36 = vcombine.low %v945_v22, %v949_v23  ;;  %v6599_v54 = vcombine.high %v1049_v49, %v1053_v50  ;;  %v913_v55 = vld [vmem:[#allocation11 + $0x340] sm:$0xff] }
 0x161   :  { %v889_v15 = vld [vmem:[#allocation11 + $0x280] sm:$0xff] }
 0x163   :  { %2390 = vmatpush1.bf16.msra.mxu1 %v6406_v56  ;;  %2431 = vmatpush1.bf16.msra.mxu0 %v6534_v57  ;;  %v917_v56 = vld [vmem:[#allocation11 + $0x360] sm:$0xff] }
 0x164   :  { %2391 = vmatprep.subr.bf16.mxu1 %v6399_v62  ;;  %2432 = vmatprep.subr.bf16.mxu0 %v6527_v63  ;;  %v1041_v57 = vld [vmem:[#allocation11 + $0x740] sm:$0xff]  ;;  %v6463_v61 = vcombine.high %v913_v55, %v917_v56  ;;  %v6462_v3 = vcombine.low %v913_v55, %v917_v56 }
 0x165   :  { %v6591_v62 = vcombine.high %v1041_v57, %v1045_v58  ;;  %v905_v63 = vld [vmem:[#allocation11 + $0x300] sm:$0xff]  ;;  %v6590_v4 = vcombine.low %v1041_v57, %v1045_v58 }
 0x167   :  { %2392 = vmatpush1.bf16.msra.mxu1 %v6398_v0  ;;  %2433 = vmatpush1.bf16.msra.mxu0 %v6526_v1  ;;  %v909_v0 = vld [vmem:[#allocation11 + $0x320] sm:$0xff] }
 0x168   :  { %2393 = vmatprep.subr.bf16.mxu1 %v6391_v6  ;;  %2434 = vmatprep.subr.bf16.mxu0 %v6519_v7  ;;  %v1033_v1 = vld [vmem:[#allocation11 + $0x700] sm:$0xff]  ;;  %v6455_v5 = vcombine.high %v905_v63, %v909_v0 }
 0x169   :  { %v6583_v6 = vcombine.high %v1033_v1, %v1037_v2  ;;  %v897_v7 = vld [vmem:[#allocation11 + $0x2c0] sm:$0xff]  ;;  %v6582_v12 = vcombine.low %v1033_v1, %v1037_v2 }
 0x16b   :  { %2394 = vmatpush1.bf16.msra.mxu1 %v6390_v8  ;;  %2435 = vmatpush1.bf16.msra.mxu0 %v6518_v9  ;;  %v901_v8 = vld [vmem:[#allocation11 + $0x2e0] sm:$0xff] }
 0x16c   :  { %2395 = vmatprep.subr.bf16.mxu1 %v6383_v10  ;;  %2436 = vmatprep.subr.bf16.mxu0 %v6511_v11  ;;  %v1025_v9 = vld [vmem:[#allocation11 + $0x6c0] sm:$0xff]  ;;  %v6454_v11 = vcombine.low %v905_v63, %v909_v0  ;;  %v6447_v13 = vcombine.high %v897_v7, %v901_v8 }
 0x16d   :  { %v1029_v10 = vld [vmem:[#allocation11 + $0x6e0] sm:$0xff] }
 0x16e   :  { %v6575_v14 = vcombine.high %v1025_v9, %v1029_v10  ;;  %v6574_v20 = vcombine.low %v1025_v9, %v1029_v10 }
 0x16f   :  { %2396 = vmatpush1.bf16.msra.mxu1 %v6382_v16  ;;  %2437 = vmatpush1.bf16.msra.mxu0 %v6510_v17  ;;  %v893_v16 = vld [vmem:[#allocation11 + $0x2a0] sm:$0xff] }
 0x170   :  { %2397 = vmatprep.subr.bf16.mxu1 %v6375_v18  ;;  %2438 = vmatprep.subr.bf16.mxu0 %v6503_v19  ;;  %v1017_v17 = vld [vmem:[#allocation11 + $0x680] sm:$0xff]  ;;  %v6446_v19 = vcombine.low %v897_v7, %v901_v8  ;;  %v6439_v21 = vcombine.high %v889_v15, %v893_v16  ;;  %v6438_v23 = vcombine.low %v889_v15, %v893_v16  ;;  %v862_v15 = vld [vmem:[#allocation11 + $0x1a8] sm:$0xff] }
 0x171   :  { %v1021_v18 = vld [vmem:[#allocation11 + $0x6a0] sm:$0xff] }
 0x172   :  { %v6567_v22 = vcombine.high %v1017_v17, %v1021_v18 }
 0x173   :  { %2398 = vmatpush1.bf16.msra.mxu1 %v6374_v24  ;;  %2439 = vmatpush1.bf16.msra.mxu0 %v6502_v25  ;;  %v6566_v24 = vcombine.low %v1017_v17, %v1021_v18  ;;  %v881_v25 = vld [vmem:[#allocation11 + $0x240] sm:$0xff]  ;;  %v986_v18 = vld [vmem:[#allocation11 + $0x588] sm:$0xff] }
 0x174   :  { %2399 = vmatprep.subr.bf16.mxu1 %v6367_v26  ;;  %2440 = vmatprep.subr.bf16.mxu0 %v6495_v27  ;;  %v885_v26 = vld [vmem:[#allocation11 + $0x260] sm:$0xff] }
 0x175   :  { %v1009_v27 = vld [vmem:[#allocation11 + $0x640] sm:$0xff]  ;;  %v6431_v29 = vcombine.high %v881_v25, %v885_v26  ;;  %v6430_v33 = vcombine.low %v881_v25, %v885_v26  ;;  %v854_v25 = vld [vmem:[#allocation11 + $0x168] sm:$0xff] }
 0x176   :  { %v6558_v34 = vcombine.low %v1009_v27, %v1013_v32 }
 0x177   :  { %2400 = vmatpush1.bf16.msra.mxu1 %v6366_v35  ;;  %2441 = vmatpush1.bf16.msra.mxu0 %v6494_v36  ;;  %v6559_v35 = vcombine.high %v1009_v27, %v1013_v32  ;;  %v873_v36 = vld [vmem:[#allocation11 + $0x200] sm:$0xff]  ;;  %v978_v27 = vld [vmem:[#allocation11 + $0x548] sm:$0xff] }
 0x178   :  { %2401 = vmatprep.subr.bf16.mxu1 %v6359_v37  ;;  %2442 = vmatprep.subr.bf16.mxu0 %v6487_v38  ;;  %v877_v37 = vld [vmem:[#allocation11 + $0x220] sm:$0xff] }
 0x179   :  { %v1001_v38 = vld [vmem:[#allocation11 + $0x600] sm:$0xff]  ;;  %v6423_v39 = vcombine.high %v873_v36, %v877_v37  ;;  %v6422_v41 = vcombine.low %v873_v36, %v877_v37  ;;  %v842_v36 = vld [vmem:[#allocation11 + $0x108] sm:$0xff] }
 0x17a   :  { %v6550_v42 = vcombine.low %v1001_v38, %v1005_v40  ;;  %v846_v37 = vld [vmem:[#allocation11 + $0x128] sm:$0xff] }
 0x17b   :  { %2402 = vmatpush1.bf16.msra.mxu1 %v6358_v43  ;;  %2443 = vmatpush1.bf16.msra.mxu0 %v6486_v44  ;;  %v6551_v43 = vcombine.high %v1001_v38, %v1005_v40  ;;  %v866_v44 = vld [vmem:[#allocation11 + $0x1c8] sm:$0xff] }
 0x17c   :  { %2403 = vmatprep.subr.bf16.mxu1 %v6479_v45  ;;  %2444 = vmatprep.subr.bf16.mxu0 %v6607_v46  ;;  %v870_v45 = vld [vmem:[#allocation11 + $0x1e8] sm:$0xff] }
 0x17d   :  { %v994_v46 = vld [vmem:[#allocation11 + $0x5c8] sm:$0xff]  ;;  %v6417_v47 = vcombine.high %v866_v44, %v870_v45  ;;  %v6416_v49 = vcombine.low %v866_v44, %v870_v45 }
 0x17e   :  { %v6544_v50 = vcombine.low %v994_v46, %v998_v48  ;;  %v970_v38 = vld [vmem:[#allocation11 + $0x508] sm:$0xff] }
 0x17f   :  { %2404 = vmatpush2.bf16.msra.mxu1 %v6478_v51  ;;  %2445 = vmatpush2.bf16.msra.mxu0 %v6606_v52  ;;  %v6545_v51 = vcombine.high %v994_v46, %v998_v48  ;;  %v8249_v52 = vsub.s32 2, %v8238_v28  ;;  %v834_v44 = vld [vmem:[#allocation11 + $0xc8] sm:$0xff]  ;;  %v6392_v48 = vcombine.low %v842_v36, %v846_v37 }
 0x180   :  { %2405 = vmatprep.subr.bf16.mxu1 %v6471_v53  ;;  %2446 = vmatprep.subr.bf16.mxu0 %v6599_v54  ;;  %v369_v53 = vld [vmem:[#allocation10] sm:$0xf]  ;;  %v8252_v54 = vsub.s32 3, %v8238_v28  ;;  %v838_v45 = vld [vmem:[#allocation11 + $0xe8] sm:$0xff] }
 0x181   :  { %v374_v55 = vrot.slane %v369_v53, %v8241_v30  ;;  %v382_v56 = vrot.slane %v369_v53, %v8249_v52  ;;  %v962_v46 = vld [vmem:[#allocation11 + $0x4c8] sm:$0xff] }
 0x183   :  { %2406 = vmatpush2.bf16.msra.mxu1 %v6470_v59  ;;  %2447 = vmatpush2.bf16.msra.mxu0 %v6598_v60  ;;  %v378_v59 = vrot.slane %v369_v53, %v8244_v31  ;;  %v386_v60 = vrot.slane %v369_v53, %v8252_v54  ;;  %v826_v53 = vld [vmem:[#allocation11 + $0x88] sm:$0xff] }
 0x184   :  { %2407 = vmatprep.subr.bf16.mxu1 %v6463_v61  ;;  %2448 = vmatprep.subr.bf16.mxu0 %v6591_v62 }
 0x187   :  { %2408 = vmatpush2.bf16.msra.mxu1 %v6462_v3  ;;  %2449 = vmatpush2.bf16.msra.mxu0 %v6590_v4 }
 0x188   :  { %2409 = vmatprep.subr.bf16.mxu1 %v6455_v5  ;;  %2450 = vmatprep.subr.bf16.mxu0 %v6583_v6 }
 0x18b   :  { %2410 = vmatpush2.bf16.msra.mxu1 %v6454_v11  ;;  %2451 = vmatpush2.bf16.msra.mxu0 %v6582_v12 }
 0x18c   :  { %2411 = vmatprep.subr.bf16.mxu1 %v6447_v13  ;;  %2452 = vmatprep.subr.bf16.mxu0 %v6575_v14  ;;  %v858_v14 = vld [vmem:[#allocation11 + $0x188] sm:$0xff] }
 0x18d   :  { %v6408_v32 = vcombine.low %v858_v14, %v862_v15 }
 0x18f   :  { %2412 = vmatpush2.bf16.msra.mxu1 %v6446_v19  ;;  %2453 = vmatpush2.bf16.msra.mxu0 %v6574_v20  ;;  %v990_v19 = vld [vmem:[#allocation11 + $0x5a8] sm:$0xff] }
 0x190   :  { %2413 = vmatprep.subr.bf16.mxu1 %v6439_v21  ;;  %2454 = vmatprep.subr.bf16.mxu0 %v6567_v22  ;;  %v6537_v26 = vcombine.high %v986_v18, %v990_v19 }
 0x193   :  { %2414 = vmatpush2.bf16.msra.mxu1 %v6438_v23  ;;  %2455 = vmatpush2.bf16.msra.mxu0 %v6566_v24  ;;  %v6409_v23 = vcombine.high %v858_v14, %v862_v15  ;;  %v850_v24 = vld [vmem:[#allocation11 + $0x148] sm:$0xff] }
 0x194   :  { %2415 = vmatprep.subr.bf16.mxu1 %v6431_v29  ;;  %2456 = vmatprep.subr.bf16.mxu0 %v6559_v35  ;;  %v982_v29 = vld [vmem:[#allocation11 + $0x568] sm:$0xff]  ;;  %v6400_v40 = vcombine.low %v850_v24, %v854_v25 }
 0x195   :  { %v6529_v35 = vcombine.high %v978_v27, %v982_v29  ;;  %v930_v14 = vld [vmem:[#allocation11 + $0x3c8] sm:$0xff] }
 0x196   :  { %v934_v15 = vld [vmem:[#allocation11 + $0x3e8] sm:$0xff] }
 0x197   :  { %2416 = vmatpush2.bf16.msra.mxu1 %v6430_v33  ;;  %2457 = vmatpush2.bf16.msra.mxu0 %v6558_v34  ;;  %v6536_v33 = vcombine.low %v986_v18, %v990_v19  ;;  %v6401_v34 = vcombine.high %v850_v24, %v854_v25  ;;  %v1062_v18 = vld [vmem:[#allocation11 + $0x7e8] sm:$0xff]  ;;  %v6481_v24 = vcombine.high %v930_v14, %v934_v15 }
 0x198   :  { %2417 = vmatprep.subr.bf16.mxu1 %v6423_v39  ;;  %2458 = vmatprep.subr.bf16.mxu0 %v6551_v43  ;;  %v974_v39 = vld [vmem:[#allocation11 + $0x528] sm:$0xff] }
 0x199   :  { %v6521_v43 = vcombine.high %v970_v38, %v974_v39 }
 0x19b   :  { %2418 = vmatpush2.bf16.msra.mxu1 %v6422_v41  ;;  %2459 = vmatpush2.bf16.msra.mxu0 %v6550_v42  ;;  %v6528_v41 = vcombine.low %v978_v27, %v982_v29  ;;  %v6393_v42 = vcombine.high %v842_v36, %v846_v37  ;;  %v926_v27 = vld [vmem:[#allocation11 + $0x3a8] sm:$0xff] }
 0x19c   :  { %2469 = vmatprep.subr.bf16.mxu1 %v6417_v47  ;;  %2510 = vmatprep.subr.bf16.mxu0 %v6545_v51  ;;  %v966_v47 = vld [vmem:[#allocation11 + $0x4e8] sm:$0xff] }
 0x19d   :  { %v6513_v51 = vcombine.high %v962_v46, %v966_v47  ;;  %v1050_v29 = vld [vmem:[#allocation11 + $0x788] sm:$0xff] }
 0x19e   :  { %v914_v37 = vld [vmem:[#allocation11 + $0x348] sm:$0xff] }
 0x21e   :  { %v745_v57 = vpop.f32.mrf.mxu1  ;;  %v786_v58 = vpop.f32.mrf.mxu0 }
 0x21f   :  { %v746_v61 = vadd.f32 %v745_v57, %v374_v55  ;;  %v787_v62 = vadd.f32 %v786_v58, %v382_v56  ;;  %v830_v55 = vld [vmem:[#allocation11 + $0xa8] sm:$0xff]  ;;  %v6384_v58 = vcombine.low %v834_v44, %v838_v45 }
 0x220   :  { %v747_v63 = vpop.f32.mrf.mxu1  ;;  %v788_v0 = vpop.f32.mrf.mxu0  ;;  %v954_v56 = vld [vmem:[#allocation11 + $0x488] sm:$0xff] }
 0x221   :  { %v797_v1 = vmul.f32 0.2, %v746_v61  ;;  %vm793_vm2 = vcmp.gt.f32.partialorder %v746_v61, 0.0  ;;  %v799_v2 = vmul.f32 0.2, %v787_v62  ;;  %v748_v3 = vadd.f32 %v747_v63, %v378_v59  ;;  %v958_v57 = vld [vmem:[#allocation11 + $0x4a8] sm:$0xff] }
 0x222   :  { %v789_v4 = vadd.f32 %v788_v0, %v386_v60  ;;  %v749_v5 = vpop.f32.mrf.mxu1  ;;  %v790_v6 = vpop.f32.mrf.mxu0  ;;  %vm795_vm3 = vcmp.gt.f32.partialorder %v787_v62, 0.0  ;;  %v6512_v59 = vcombine.low %v962_v46, %v966_v47  ;;  %v6377_v60 = vcombine.high %v826_v53, %v830_v55  ;;  %v822_v63 = vld [vmem:[#allocation11 + $0x68] sm:$0xff] }
 0x223   :  { %vm794_vm4 = vcmp.gt.f32.partialorder %v748_v3, 0.0  ;;  %v798_v7 = vmul.f32 0.2, %v748_v3  ;;  %v801_v10 = vsel %vm793_vm2, %v746_v61, %v797_v1  ;;  %v803_v12 = vsel %vm795_vm3, %v787_v62, %v799_v2  ;;  %v818_v62 = vld [vmem:[#allocation11 + $0x48] sm:$0xff] }
 0x224   :  { %v750_v8 = vpop.f32.mrf.mxu1  ;;  %v791_v9 = vpop.f32.mrf.mxu0  ;;  %vm796_vm5 = vcmp.gt.f32.partialorder %v789_v4, 0.0  ;;  %v800_v11 = vmul.f32 0.2, %v789_v4  ;;  %v8260_v20 = vpack.c.bf16 %v801_v10, %v801_v10  ;;  %v8264_v22 = vpack.c.bf16 %v803_v12, %v803_v12  ;;  %v946_v0 = vld [vmem:[#allocation11 + $0x448] sm:$0xff] }
 0x225   :  { %v802_v13 = vsel %vm794_vm4, %v748_v3, %v798_v7  ;;  %v6505_v61 = vcombine.high %v954_v56, %v958_v57  ;;  %v950_v1 = vld [vmem:[#allocation11 + $0x468] sm:$0xff]  ;;  %v6376_v2 = vcombine.low %v826_v53, %v830_v55  ;;  %v6504_v3 = vcombine.low %v954_v56, %v958_v57 }
 0x226   :  { %v8258_v16 = vpack.c.bf16 %v802_v13, %v802_v13  ;;  %v804_v17 = vsel %vm796_vm5, %v789_v4, %v800_v11  ;;  %v6369_v4 = vcombine.high %v818_v62, %v822_v63  ;;  %v6497_v5 = vcombine.high %v946_v0, %v950_v1  ;;  %v810_v6 = vld [vmem:[#allocation11 + $0x8] sm:$0xff] }
 0x227   :  { %v8262_v21 = vpack.c.bf16 %v804_v17, %v804_v17  ;;  %v814_v7 = vld [vmem:[#allocation11 + $0x28] sm:$0xff]  ;;  %v6368_v10 = vcombine.low %v818_v62, %v822_v63  ;;  %v6496_v11 = vcombine.low %v946_v0, %v950_v1 }
 0x228   :  { %2419 = vmatprep.mubr.bf16.mxu1 %v8258_v16  ;;  %v938_v8 = vld [vmem:[#allocation11 + $0x408] sm:$0xff]  ;;  %v6361_v12 = vcombine.high %v810_v6, %v814_v7  ;;  %v6360_v19 = vcombine.low %v810_v6, %v814_v7 }
 0x229   :  { %2460 = vmatprep.mubr.bf16.mxu0 %v8262_v21  ;;  %2420 = vmatmul.mubr.bf16.vlgmr.msra.gmra.mxu1 %v8260_v20  ;;  %v942_v9 = vld [vmem:[#allocation11 + $0x428] sm:$0xff] }
 0x22a   :  { %2461 = vmatmul.mubr.bf16.vlgmr.msra.gmra.mxu0 %v8264_v22  ;;  %2470 = vmatpush1.bf16.msra.mxu1 %v6416_v49  ;;  %v6520_v49 = vcombine.low %v970_v38, %v974_v39  ;;  %v6489_v13 = vcombine.high %v938_v8, %v942_v9  ;;  %v1058_v17 = vld [vmem:[#allocation11 + $0x7c8] sm:$0xff] }
 0x22b   :  { %2511 = vmatpush1.bf16.msra.mxu0 %v6544_v50  ;;  %2501 = vmatprep.mubr.bf16.mxu1 %v8258_v16  ;;  %v6385_v50 = vcombine.high %v834_v44, %v838_v45  ;;  %v6609_v25 = vcombine.high %v1058_v17, %v1062_v18  ;;  %v918_v38 = vld [vmem:[#allocation11 + $0x368] sm:$0xff] }
 0x22c   :  { %2542 = vmatprep.mubr.bf16.mxu0 %v8262_v21  ;;  %2471 = vmatprep.subr.bf16.mxu1 %v6409_v23  ;;  %v6488_v23 = vcombine.low %v938_v8, %v942_v9  ;;  %v1042_v39 = vld [vmem:[#allocation11 + $0x748] sm:$0xff] }
 0x22d   :  { %2512 = vmatprep.subr.bf16.mxu0 %v6537_v26  ;;  %v922_v26 = vld [vmem:[#allocation11 + $0x388] sm:$0xff] }
 0x22e   :  { %2472 = vmatpush1.bf16.msra.mxu1 %v6408_v32  ;;  %v1054_v32 = vld [vmem:[#allocation11 + $0x7a8] sm:$0xff] }
 0x22f   :  { %2513 = vmatpush1.bf16.msra.mxu0 %v6536_v33  ;;  %2473 = vmatprep.subr.bf16.mxu1 %v6401_v34  ;;  %v6480_v33 = vcombine.low %v930_v14, %v934_v15  ;;  %v6608_v34 = vcombine.low %v1058_v17, %v1062_v18  ;;  %v6601_v36 = vcombine.high %v1050_v29, %v1054_v32  ;;  %v906_v45 = vld [vmem:[#allocation11 + $0x308] sm:$0xff] }
 0x230   :  { %2514 = vmatprep.subr.bf16.mxu0 %v6529_v35  ;;  %v6473_v35 = vcombine.high %v922_v26, %v926_v27  ;;  %v910_v46 = vld [vmem:[#allocation11 + $0x328] sm:$0xff] }
 0x231   :  { %v1034_v47 = vld [vmem:[#allocation11 + $0x708] sm:$0xff] }
 0x232   :  { %2474 = vmatpush1.bf16.msra.mxu1 %v6400_v40  ;;  %v1046_v40 = vld [vmem:[#allocation11 + $0x768] sm:$0xff] }
 0x233   :  { %2515 = vmatpush1.bf16.msra.mxu0 %v6528_v41  ;;  %2475 = vmatprep.subr.bf16.mxu1 %v6393_v42  ;;  %v6472_v41 = vcombine.low %v922_v26, %v926_v27  ;;  %v6600_v42 = vcombine.low %v1050_v29, %v1054_v32  ;;  %v6593_v44 = vcombine.high %v1042_v39, %v1046_v40  ;;  %v898_v55 = vld [vmem:[#allocation11 + $0x2c8] sm:$0xff]  ;;  %v867_v27 = vld [vmem:[#allocation11 + $0x1d0] sm:$0xff] }
 0x234   :  { %2516 = vmatprep.subr.bf16.mxu0 %v6521_v43  ;;  %v6465_v43 = vcombine.high %v914_v37, %v918_v38  ;;  %v902_v56 = vld [vmem:[#allocation11 + $0x2e8] sm:$0xff]  ;;  %v871_v29 = vld [vmem:[#allocation11 + $0x1f0] sm:$0xff] }
 0x235   :  { %v1026_v57 = vld [vmem:[#allocation11 + $0x6c8] sm:$0xff]  ;;  %v995_v32 = vld [vmem:[#allocation11 + $0x5d0] sm:$0xff] }
 0x236   :  { %2476 = vmatpush1.bf16.msra.mxu1 %v6392_v48  ;;  %v1038_v48 = vld [vmem:[#allocation11 + $0x728] sm:$0xff] }
 0x237   :  { %2517 = vmatpush1.bf16.msra.mxu0 %v6520_v49  ;;  %2477 = vmatprep.subr.bf16.mxu1 %v6385_v50  ;;  %v6464_v49 = vcombine.low %v914_v37, %v918_v38  ;;  %v6592_v50 = vcombine.low %v1042_v39, %v1046_v40  ;;  %v6585_v53 = vcombine.high %v1034_v47, %v1038_v48  ;;  %v890_v63 = vld [vmem:[#allocation11 + $0x288] sm:$0xff]  ;;  %v859_v38 = vld [vmem:[#allocation11 + $0x190] sm:$0xff] }
 0x238   :  { %2518 = vmatprep.subr.bf16.mxu0 %v6513_v51  ;;  %v6457_v51 = vcombine.high %v906_v45, %v910_v46  ;;  %v894_v0 = vld [vmem:[#allocation11 + $0x2a8] sm:$0xff]  ;;  %v863_v39 = vld [vmem:[#allocation11 + $0x1b0] sm:$0xff]  ;;  %v6418_v40 = vcombine.low %v867_v27, %v871_v29 }
 0x239   :  { %v1018_v1 = vld [vmem:[#allocation11 + $0x688] sm:$0xff] }
 0x23a   :  { %2478 = vmatpush1.bf16.msra.mxu1 %v6384_v58  ;;  %v1030_v58 = vld [vmem:[#allocation11 + $0x6e8] sm:$0xff] }
 0x23b   :  { %2519 = vmatpush1.bf16.msra.mxu0 %v6512_v59  ;;  %2479 = vmatprep.subr.bf16.mxu1 %v6377_v60  ;;  %v6456_v59 = vcombine.low %v906_v45, %v910_v46  ;;  %v6584_v60 = vcombine.low %v1034_v47, %v1038_v48  ;;  %v6577_v62 = vcombine.high %v1026_v57, %v1030_v58  ;;  %v882_v7 = vld [vmem:[#allocation11 + $0x248] sm:$0xff]  ;;  %v851_v45 = vld [vmem:[#allocation11 + $0x150] sm:$0xff] }
 0x23c   :  { %2520 = vmatprep.subr.bf16.mxu0 %v6505_v61  ;;  %v6449_v61 = vcombine.high %v898_v55, %v902_v56  ;;  %v886_v8 = vld [vmem:[#allocation11 + $0x268] sm:$0xff]  ;;  %v855_v46 = vld [vmem:[#allocation11 + $0x170] sm:$0xff] }
 0x23d   :  { %v1010_v9 = vld [vmem:[#allocation11 + $0x648] sm:$0xff]  ;;  %v979_v48 = vld [vmem:[#allocation11 + $0x550] sm:$0xff] }
 0x23e   :  { %2480 = vmatpush1.bf16.msra.mxu1 %v6376_v2  ;;  %v1022_v2 = vld [vmem:[#allocation11 + $0x6a8] sm:$0xff] }
 0x23f   :  { %2521 = vmatpush1.bf16.msra.mxu0 %v6504_v3  ;;  %2481 = vmatprep.subr.bf16.mxu1 %v6369_v4  ;;  %v6448_v3 = vcombine.low %v898_v55, %v902_v56  ;;  %v6576_v4 = vcombine.low %v1026_v57, %v1030_v58  ;;  %v6569_v6 = vcombine.high %v1018_v1, %v1022_v2  ;;  %v874_v15 = vld [vmem:[#allocation11 + $0x208] sm:$0xff]  ;;  %v843_v56 = vld [vmem:[#allocation11 + $0x110] sm:$0xff] }
 0x240   :  { %2522 = vmatprep.subr.bf16.mxu0 %v6497_v5  ;;  %v6441_v5 = vcombine.high %v890_v63, %v894_v0  ;;  %v878_v17 = vld [vmem:[#allocation11 + $0x228] sm:$0xff]  ;;  %v847_v57 = vld [vmem:[#allocation11 + $0x130] sm:$0xff] }
 0x241   :  { %v1002_v18 = vld [vmem:[#allocation11 + $0x608] sm:$0xff]  ;;  %v971_v58 = vld [vmem:[#allocation11 + $0x510] sm:$0xff] }
 0x242   :  { %2482 = vmatpush1.bf16.msra.mxu1 %v6368_v10  ;;  %v1014_v10 = vld [vmem:[#allocation11 + $0x668] sm:$0xff] }
 0x243   :  { %2523 = vmatpush1.bf16.msra.mxu0 %v6496_v11  ;;  %2483 = vmatprep.subr.bf16.mxu1 %v6361_v12  ;;  %v6440_v11 = vcombine.low %v890_v63, %v894_v0  ;;  %v6568_v12 = vcombine.low %v1018_v1, %v1022_v2  ;;  %v6561_v14 = vcombine.high %v1010_v9, %v1014_v10  ;;  %v835_v0 = vld [vmem:[#allocation11 + $0xd0] sm:$0xff] }
 0x244   :  { %2524 = vmatprep.subr.bf16.mxu0 %v6489_v13  ;;  %v6433_v13 = vcombine.high %v882_v7, %v886_v8  ;;  %v839_v1 = vld [vmem:[#allocation11 + $0xf0] sm:$0xff] }
 0x245   :  { %v963_v2 = vld [vmem:[#allocation11 + $0x4d0] sm:$0xff] }
 0x246   :  { %2484 = vmatpush1.bf16.msra.mxu1 %v6360_v19  ;;  %v1006_v19 = vld [vmem:[#allocation11 + $0x628] sm:$0xff] }
 0x247   :  { %2525 = vmatpush1.bf16.msra.mxu0 %v6488_v23  ;;  %2485 = vmatprep.subr.bf16.mxu1 %v6481_v24  ;;  %v6432_v23 = vcombine.low %v882_v7, %v886_v8  ;;  %v6560_v24 = vcombine.low %v1010_v9, %v1014_v10  ;;  %v6553_v26 = vcombine.high %v1002_v18, %v1006_v19  ;;  %v827_v8 = vld [vmem:[#allocation11 + $0x90] sm:$0xff] }
 0x248   :  { %2526 = vmatprep.subr.bf16.mxu0 %v6609_v25  ;;  %v6425_v25 = vcombine.high %v874_v15, %v878_v17  ;;  %v831_v9 = vld [vmem:[#allocation11 + $0xb0] sm:$0xff] }
 0x249   :  { %v955_v10 = vld [vmem:[#allocation11 + $0x490] sm:$0xff] }
 0x24a   :  { %2486 = vmatpush2.bf16.msra.mxu1 %v6480_v33  ;;  %v999_v33 = vld [vmem:[#allocation11 + $0x5f0] sm:$0xff] }
 0x24b   :  { %2527 = vmatpush2.bf16.msra.mxu0 %v6608_v34  ;;  %2487 = vmatprep.subr.bf16.mxu1 %v6473_v35  ;;  %v6424_v34 = vcombine.low %v874_v15, %v878_v17  ;;  %v6552_v35 = vcombine.low %v1002_v18, %v1006_v19  ;;  %v6547_v37 = vcombine.high %v995_v32, %v999_v33  ;;  %v819_v17 = vld [vmem:[#allocation11 + $0x50] sm:$0xff] }
 0x24c   :  { %2528 = vmatprep.subr.bf16.mxu0 %v6601_v36  ;;  %v6419_v36 = vcombine.high %v867_v27, %v871_v29  ;;  %v823_v18 = vld [vmem:[#allocation11 + $0x70] sm:$0xff] }
 0x24d   :  { %v947_v19 = vld [vmem:[#allocation11 + $0x450] sm:$0xff] }
 0x24e   :  { %2488 = vmatpush2.bf16.msra.mxu1 %v6472_v41  ;;  %v987_v41 = vld [vmem:[#allocation11 + $0x590] sm:$0xff] }
 0x24f   :  { %2529 = vmatpush2.bf16.msra.mxu0 %v6600_v42  ;;  %2489 = vmatprep.subr.bf16.mxu1 %v6465_v43  ;;  %v991_v42 = vld [vmem:[#allocation11 + $0x5b0] sm:$0xff]  ;;  %v6546_v43 = vcombine.low %v995_v32, %v999_v33 }
 0x250   :  { %2530 = vmatprep.subr.bf16.mxu0 %v6593_v44  ;;  %v6411_v44 = vcombine.high %v859_v38, %v863_v39  ;;  %v6539_v47 = vcombine.high %v987_v41, %v991_v42  ;;  %v811_v29 = vld [vmem:[#allocation11 + $0x10] sm:$0xff] }
 0x251   :  { %v815_v32 = vld [vmem:[#allocation11 + $0x30] sm:$0xff] }
 0x252   :  { %2490 = vmatpush2.bf16.msra.mxu1 %v6464_v49  ;;  %v983_v49 = vld [vmem:[#allocation11 + $0x570] sm:$0xff] }
 0x253   :  { %2531 = vmatpush2.bf16.msra.mxu0 %v6592_v50  ;;  %2491 = vmatprep.subr.bf16.mxu1 %v6457_v51  ;;  %v6410_v50 = vcombine.low %v859_v38, %v863_v39  ;;  %v6538_v51 = vcombine.low %v987_v41, %v991_v42  ;;  %v6531_v55 = vcombine.high %v979_v48, %v983_v49  ;;  %v939_v33 = vld [vmem:[#allocation11 + $0x410] sm:$0xff] }
 0x254   :  { %2532 = vmatprep.subr.bf16.mxu0 %v6585_v53  ;;  %v6403_v53 = vcombine.high %v851_v45, %v855_v46  ;;  %v931_v39 = vld [vmem:[#allocation11 + $0x3d0] sm:$0xff] }
 0x255   :  { %v1059_v41 = vld [vmem:[#allocation11 + $0x7d0] sm:$0xff] }
 0x256   :  { %2492 = vmatpush2.bf16.msra.mxu1 %v6456_v59  ;;  %v975_v59 = vld [vmem:[#allocation11 + $0x530] sm:$0xff] }
 0x257   :  { %2533 = vmatpush2.bf16.msra.mxu0 %v6584_v60  ;;  %2493 = vmatprep.subr.bf16.mxu1 %v6449_v61  ;;  %v6402_v60 = vcombine.low %v851_v45, %v855_v46  ;;  %v6530_v61 = vcombine.low %v979_v48, %v983_v49  ;;  %v6523_v63 = vcombine.high %v971_v58, %v975_v59  ;;  %v1063_v42 = vld [vmem:[#allocation11 + $0x7f0] sm:$0xff] }
 0x258   :  { %2534 = vmatprep.subr.bf16.mxu0 %v6577_v62  ;;  %v6395_v62 = vcombine.high %v843_v56, %v847_v57  ;;  %v6611_v46 = vcombine.high %v1059_v41, %v1063_v42  ;;  %v927_v48 = vld [vmem:[#allocation11 + $0x3b0] sm:$0xff] }
 0x259   :  { %v1051_v49 = vld [vmem:[#allocation11 + $0x790] sm:$0xff] }
 0x25a   :  { %2494 = vmatpush2.bf16.msra.mxu1 %v6448_v3  ;;  %v967_v3 = vld [vmem:[#allocation11 + $0x4f0] sm:$0xff] }
 0x25b   :  { %2535 = vmatpush2.bf16.msra.mxu0 %v6576_v4  ;;  %2495 = vmatprep.subr.bf16.mxu1 %v6441_v5  ;;  %v6394_v4 = vcombine.low %v843_v56, %v847_v57  ;;  %v6522_v5 = vcombine.low %v971_v58, %v975_v59  ;;  %v6515_v7 = vcombine.high %v963_v2, %v967_v3  ;;  %v915_v57 = vld [vmem:[#allocation11 + $0x350] sm:$0xff] }
 0x25c   :  { %2536 = vmatprep.subr.bf16.mxu0 %v6569_v6  ;;  %v6387_v6 = vcombine.high %v835_v0, %v839_v1  ;;  %v919_v58 = vld [vmem:[#allocation11 + $0x370] sm:$0xff] }
 0x25d   :  { %v1043_v59 = vld [vmem:[#allocation11 + $0x750] sm:$0xff] }
 0x25e   :  { %2496 = vmatpush2.bf16.msra.mxu1 %v6440_v11  ;;  %v959_v11 = vld [vmem:[#allocation11 + $0x4b0] sm:$0xff] }
 0x25f   :  { %2537 = vmatpush2.bf16.msra.mxu0 %v6568_v12  ;;  %2497 = vmatprep.subr.bf16.mxu1 %v6433_v13  ;;  %v6386_v12 = vcombine.low %v835_v0, %v839_v1  ;;  %v6514_v13 = vcombine.low %v963_v2, %v967_v3  ;;  %v6507_v15 = vcombine.high %v955_v10, %v959_v11  ;;  %v907_v1 = vld [vmem:[#allocation11 + $0x310] sm:$0xff] }
 0x260   :  { %2538 = vmatprep.subr.bf16.mxu0 %v6561_v14  ;;  %v6379_v14 = vcombine.high %v827_v8, %v831_v9  ;;  %v911_v2 = vld [vmem:[#allocation11 + $0x330] sm:$0xff] }
 0x261   :  { %v1035_v3 = vld [vmem:[#allocation11 + $0x710] sm:$0xff] }
 0x262   :  { %2498 = vmatpush2.bf16.msra.mxu1 %v6432_v23  ;;  %v951_v23 = vld [vmem:[#allocation11 + $0x470] sm:$0xff] }
 0x263   :  { %2539 = vmatpush2.bf16.msra.mxu0 %v6560_v24  ;;  %2499 = vmatprep.subr.bf16.mxu1 %v6425_v25  ;;  %v6378_v24 = vcombine.low %v827_v8, %v831_v9  ;;  %v6506_v25 = vcombine.low %v955_v10, %v959_v11  ;;  %v6499_v27 = vcombine.high %v947_v19, %v951_v23  ;;  %v899_v9 = vld [vmem:[#allocation11 + $0x2d0] sm:$0xff] }
 0x264   :  { %2540 = vmatprep.subr.bf16.mxu0 %v6553_v26  ;;  %v6371_v26 = vcombine.high %v819_v17, %v823_v18  ;;  %v903_v10 = vld [vmem:[#allocation11 + $0x2f0] sm:$0xff] }
 0x265   :  { %v1027_v11 = vld [vmem:[#allocation11 + $0x6d0] sm:$0xff] }
 0x266   :  { %2500 = vmatpush2.bf16.msra.mxu1 %v6424_v34  ;;  %v943_v34 = vld [vmem:[#allocation11 + $0x430] sm:$0xff] }
 0x267   :  { %2541 = vmatpush2.bf16.msra.mxu0 %v6552_v35  ;;  %2551 = vmatprep.subr.bf16.mxu1 %v6419_v36  ;;  %v6370_v35 = vcombine.low %v819_v17, %v823_v18  ;;  %v6498_v36 = vcombine.low %v947_v19, %v951_v23  ;;  %v6491_v38 = vcombine.high %v939_v33, %v943_v34  ;;  %v891_v18 = vld [vmem:[#allocation11 + $0x290] sm:$0xff] }
 0x268   :  { %2592 = vmatprep.subr.bf16.mxu0 %v6547_v37  ;;  %v6363_v37 = vcombine.high %v811_v29, %v815_v32  ;;  %v895_v19 = vld [vmem:[#allocation11 + $0x2b0] sm:$0xff] }
 0x269   :  { %2502 = vmatmul.mubr.bf16.vlgmr.msra.gmra.mxu1 %v8260_v20  ;;  %v1019_v23 = vld [vmem:[#allocation11 + $0x690] sm:$0xff] }
 0x26a   :  { %2543 = vmatmul.mubr.bf16.vlgmr.msra.gmra.mxu0 %v8264_v22  ;;  %2552 = vmatpush1.bf16.msra.mxu1 %v6418_v40  ;;  %v935_v40 = vld [vmem:[#allocation11 + $0x3f0] sm:$0xff] }
 0x26b   :  { %2583 = vmatprep.mubr.bf16.mxu1 %v8258_v16  ;;  %2593 = vmatpush1.bf16.msra.mxu0 %v6546_v43  ;;  %v6362_v43 = vcombine.low %v811_v29, %v815_v32  ;;  %v6483_v45 = vcombine.high %v931_v39, %v935_v40  ;;  %v883_v32 = vld [vmem:[#allocation11 + $0x250] sm:$0xff] }
 0x26c   :  { %2624 = vmatprep.mubr.bf16.mxu0 %v8262_v21  ;;  %2553 = vmatprep.subr.bf16.mxu1 %v6411_v44  ;;  %v6490_v44 = vcombine.low %v939_v33, %v943_v34  ;;  %v887_v33 = vld [vmem:[#allocation11 + $0x270] sm:$0xff] }
 0x26d   :  { %2594 = vmatprep.subr.bf16.mxu0 %v6539_v47  ;;  %v923_v47 = vld [vmem:[#allocation11 + $0x390] sm:$0xff] }
 0x26e   :  { %2554 = vmatpush1.bf16.msra.mxu1 %v6410_v50  ;;  %v1055_v50 = vld [vmem:[#allocation11 + $0x7b0] sm:$0xff] }
 0x26f   :  { %2595 = vmatpush1.bf16.msra.mxu0 %v6538_v51  ;;  %2555 = vmatprep.subr.bf16.mxu1 %v6403_v53  ;;  %v6482_v51 = vcombine.low %v931_v39, %v935_v40  ;;  %v6610_v53 = vcombine.low %v1059_v41, %v1063_v42  ;;  %v6603_v56 = vcombine.high %v1051_v49, %v1055_v50  ;;  %v1011_v34 = vld [vmem:[#allocation11 + $0x650] sm:$0xff] }
 0x270   :  { %2596 = vmatprep.subr.bf16.mxu0 %v6531_v55  ;;  %v6475_v55 = vcombine.high %v923_v47, %v927_v48  ;;  %v875_v40 = vld [vmem:[#allocation11 + $0x210] sm:$0xff] }
 0x271   :  { %v879_v41 = vld [vmem:[#allocation11 + $0x230] sm:$0xff] }
 0x272   :  { %2556 = vmatpush1.bf16.msra.mxu1 %v6402_v60  ;;  %v1047_v60 = vld [vmem:[#allocation11 + $0x770] sm:$0xff] }
 0x273   :  { %2597 = vmatpush1.bf16.msra.mxu0 %v6530_v61  ;;  %2557 = vmatprep.subr.bf16.mxu1 %v6395_v62  ;;  %v6474_v61 = vcombine.low %v923_v47, %v927_v48  ;;  %v6602_v62 = vcombine.low %v1051_v49, %v1055_v50  ;;  %v6595_v0 = vcombine.high %v1043_v59, %v1047_v60  ;;  %v1003_v42 = vld [vmem:[#allocation11 + $0x610] sm:$0xff]  ;;  %v868_v48 = vld [vmem:[#allocation11 + $0x1d8] sm:$0xff] }
 0x274   :  { %2598 = vmatprep.subr.bf16.mxu0 %v6523_v63  ;;  %v6467_v63 = vcombine.high %v915_v57, %v919_v58  ;;  %v872_v49 = vld [vmem:[#allocation11 + $0x1f8] sm:$0xff] }
 0x275   :  { %v996_v50 = vld [vmem:[#allocation11 + $0x5d8] sm:$0xff] }
 0x276   :  { %2558 = vmatpush1.bf16.msra.mxu1 %v6394_v4  ;;  %v1039_v4 = vld [vmem:[#allocation11 + $0x730] sm:$0xff] }
 0x277   :  { %2599 = vmatpush1.bf16.msra.mxu0 %v6522_v5  ;;  %2559 = vmatprep.subr.bf16.mxu1 %v6387_v6  ;;  %v6466_v5 = vcombine.low %v915_v57, %v919_v58  ;;  %v6594_v6 = vcombine.low %v1043_v59, %v1047_v60  ;;  %v6587_v8 = vcombine.high %v1035_v3, %v1039_v4  ;;  %v860_v58 = vld [vmem:[#allocation11 + $0x198] sm:$0xff] }
 0x278   :  { %2600 = vmatprep.subr.bf16.mxu0 %v6515_v7  ;;  %v6459_v7 = vcombine.high %v907_v1, %v911_v2  ;;  %v864_v59 = vld [vmem:[#allocation11 + $0x1b8] sm:$0xff]  ;;  %v6420_v60 = vcombine.low %v868_v48, %v872_v49 }
 0x27a   :  { %2560 = vmatpush1.bf16.msra.mxu1 %v6386_v12  ;;  %v1031_v12 = vld [vmem:[#allocation11 + $0x6f0] sm:$0xff] }
 0x27b   :  { %2601 = vmatpush1.bf16.msra.mxu0 %v6514_v13  ;;  %2561 = vmatprep.subr.bf16.mxu1 %v6379_v14  ;;  %v6458_v13 = vcombine.low %v907_v1, %v911_v2  ;;  %v6586_v14 = vcombine.low %v1035_v3, %v1039_v4  ;;  %v6579_v17 = vcombine.high %v1027_v11, %v1031_v12  ;;  %v852_v1 = vld [vmem:[#allocation11 + $0x158] sm:$0xff] }
 0x27c   :  { %2602 = vmatprep.subr.bf16.mxu0 %v6507_v15  ;;  %v6451_v15 = vcombine.high %v899_v9, %v903_v10  ;;  %v856_v2 = vld [vmem:[#allocation11 + $0x178] sm:$0xff] }
 0x27d   :  { %v980_v4 = vld [vmem:[#allocation11 + $0x558] sm:$0xff] }
 0x27e   :  { %2562 = vmatpush1.bf16.msra.mxu1 %v6378_v24  ;;  %v1023_v24 = vld [vmem:[#allocation11 + $0x6b0] sm:$0xff] }
 0x27f   :  { %2603 = vmatpush1.bf16.msra.mxu0 %v6506_v25  ;;  %2563 = vmatprep.subr.bf16.mxu1 %v6371_v26  ;;  %v6450_v25 = vcombine.low %v899_v9, %v903_v10  ;;  %v6578_v26 = vcombine.low %v1027_v11, %v1031_v12  ;;  %v6571_v29 = vcombine.high %v1019_v23, %v1023_v24  ;;  %v844_v10 = vld [vmem:[#allocation11 + $0x118] sm:$0xff] }
 0x280   :  { %2604 = vmatprep.subr.bf16.mxu0 %v6499_v27  ;;  %v6443_v27 = vcombine.high %v891_v18, %v895_v19  ;;  %v848_v11 = vld [vmem:[#allocation11 + $0x138] sm:$0xff] }
 0x281   :  { %v972_v12 = vld [vmem:[#allocation11 + $0x518] sm:$0xff] }
 0x282   :  { %2564 = vmatpush1.bf16.msra.mxu1 %v6370_v35  ;;  %v1015_v35 = vld [vmem:[#allocation11 + $0x670] sm:$0xff] }
 0x283   :  { %2605 = vmatpush1.bf16.msra.mxu0 %v6498_v36  ;;  %2565 = vmatprep.subr.bf16.mxu1 %v6363_v37  ;;  %v6442_v36 = vcombine.low %v891_v18, %v895_v19  ;;  %v6570_v37 = vcombine.low %v1019_v23, %v1023_v24  ;;  %v6563_v39 = vcombine.high %v1011_v34, %v1015_v35  ;;  %v836_v18 = vld [vmem:[#allocation11 + $0xd8] sm:$0xff] }
 0x284   :  { %2606 = vmatprep.subr.bf16.mxu0 %v6491_v38  ;;  %v6435_v38 = vcombine.high %v883_v32, %v887_v33  ;;  %v840_v19 = vld [vmem:[#allocation11 + $0xf8] sm:$0xff] }
 0x285   :  { %v964_v23 = vld [vmem:[#allocation11 + $0x4d8] sm:$0xff] }
 0x286   :  { %2566 = vmatpush1.bf16.msra.mxu1 %v6362_v43  ;;  %v1007_v43 = vld [vmem:[#allocation11 + $0x630] sm:$0xff]  ;;  %v968_v24 = vld [vmem:[#allocation11 + $0x4f8] sm:$0xff] }
 0x287   :  { %2607 = vmatpush1.bf16.msra.mxu0 %v6490_v44  ;;  %2567 = vmatprep.subr.bf16.mxu1 %v6483_v45  ;;  %v6434_v44 = vcombine.low %v883_v32, %v887_v33  ;;  %v6562_v45 = vcombine.low %v1011_v34, %v1015_v35  ;;  %v6555_v47 = vcombine.high %v1003_v42, %v1007_v43  ;;  %v832_v32 = vld [vmem:[#allocation11 + $0xb8] sm:$0xff] }
 0x288   :  { %2608 = vmatprep.subr.bf16.mxu0 %v6611_v46  ;;  %v6427_v46 = vcombine.high %v875_v40, %v879_v41  ;;  %v956_v33 = vld [vmem:[#allocation11 + $0x498] sm:$0xff]  ;;  %v6388_v35 = vcombine.low %v836_v18, %v840_v19 }
 0x289   :  { %v960_v34 = vld [vmem:[#allocation11 + $0x4b8] sm:$0xff] }
 0x28a   :  { %2568 = vmatpush2.bf16.msra.mxu1 %v6482_v51  ;;  %v1000_v51 = vld [vmem:[#allocation11 + $0x5f8] sm:$0xff] }
 0x28b   :  { %2609 = vmatpush2.bf16.msra.mxu0 %v6610_v53  ;;  %2569 = vmatprep.subr.bf16.mxu1 %v6475_v55  ;;  %v6426_v53 = vcombine.low %v875_v40, %v879_v41  ;;  %v6554_v55 = vcombine.low %v1003_v42, %v1007_v43  ;;  %v6549_v57 = vcombine.high %v996_v50, %v1000_v51  ;;  %v824_v40 = vld [vmem:[#allocation11 + $0x78] sm:$0xff] }
 0x28c   :  { %2610 = vmatprep.subr.bf16.mxu0 %v6603_v56  ;;  %v6421_v56 = vcombine.high %v868_v48, %v872_v49  ;;  %v948_v41 = vld [vmem:[#allocation11 + $0x458] sm:$0xff] }
 0x28d   :  { %v952_v42 = vld [vmem:[#allocation11 + $0x478] sm:$0xff] }
 0x28e   :  { %2570 = vmatpush2.bf16.msra.mxu1 %v6474_v61  ;;  %v988_v61 = vld [vmem:[#allocation11 + $0x598] sm:$0xff] }
 0x28f   :  { %2611 = vmatpush2.bf16.msra.mxu0 %v6602_v62  ;;  %2571 = vmatprep.subr.bf16.mxu1 %v6467_v63  ;;  %v992_v62 = vld [vmem:[#allocation11 + $0x5b8] sm:$0xff]  ;;  %v6548_v63 = vcombine.low %v996_v50, %v1000_v51 }
 0x290   :  { %2612 = vmatprep.subr.bf16.mxu0 %v6595_v0  ;;  %v6413_v0 = vcombine.high %v860_v58, %v864_v59  ;;  %v6541_v3 = vcombine.high %v988_v61, %v992_v62  ;;  %v816_v48 = vld [vmem:[#allocation11 + $0x38] sm:$0xff] }
 0x291   :  { %v940_v49 = vld [vmem:[#allocation11 + $0x418] sm:$0xff] }
 0x292   :  { %2572 = vmatpush2.bf16.msra.mxu1 %v6466_v5  ;;  %v984_v5 = vld [vmem:[#allocation11 + $0x578] sm:$0xff] }
 0x293   :  { %2613 = vmatpush2.bf16.msra.mxu0 %v6594_v6  ;;  %2573 = vmatprep.subr.bf16.mxu1 %v6459_v7  ;;  %v6412_v6 = vcombine.low %v860_v58, %v864_v59  ;;  %v6540_v7 = vcombine.low %v988_v61, %v992_v62  ;;  %v6533_v9 = vcombine.high %v980_v4, %v984_v5  ;;  %v944_v50 = vld [vmem:[#allocation11 + $0x438] sm:$0xff] }
 0x294   :  { %2614 = vmatprep.subr.bf16.mxu0 %v6587_v8  ;;  %v6405_v8 = vcombine.high %v852_v1, %v856_v2  ;;  %v936_v58 = vld [vmem:[#allocation11 + $0x3f8] sm:$0xff]  ;;  %v6492_v62 = vcombine.low %v940_v49, %v944_v50 }
 0x295   :  { %v1060_v59 = vld [vmem:[#allocation11 + $0x7d8] sm:$0xff] }
 0x296   :  { %2574 = vmatpush2.bf16.msra.mxu1 %v6458_v13  ;;  %v976_v13 = vld [vmem:[#allocation11 + $0x538] sm:$0xff] }
 0x297   :  { %2615 = vmatpush2.bf16.msra.mxu0 %v6586_v14  ;;  %2575 = vmatprep.subr.bf16.mxu1 %v6451_v15  ;;  %v6404_v14 = vcombine.low %v852_v1, %v856_v2  ;;  %v6532_v15 = vcombine.low %v980_v4, %v984_v5  ;;  %v924_v1 = vld [vmem:[#allocation11 + $0x398] sm:$0xff] }
 0x298   :  { %2616 = vmatprep.subr.bf16.mxu0 %v6579_v17  ;;  %v6397_v17 = vcombine.high %v844_v10, %v848_v11  ;;  %v928_v2 = vld [vmem:[#allocation11 + $0x3b8] sm:$0xff] }
 0x299   :  { %v1056_v4 = vld [vmem:[#allocation11 + $0x7b8] sm:$0xff] }
 0x29a   :  { %2576 = vmatpush2.bf16.msra.mxu1 %v6450_v25  ;;  %v6524_v25 = vcombine.low %v972_v12, %v976_v13 }
 0x29b   :  { %2617 = vmatpush2.bf16.msra.mxu0 %v6578_v26  ;;  %2577 = vmatprep.subr.bf16.mxu1 %v6443_v27  ;;  %v6389_v26 = vcombine.high %v836_v18, %v840_v19  ;;  %v6517_v27 = vcombine.high %v964_v23, %v968_v24  ;;  %v912_v18 = vld [vmem:[#allocation11 + $0x338] sm:$0xff] }
 0x29c   :  { %2618 = vmatprep.subr.bf16.mxu0 %v6571_v29  ;;  %v828_v29 = vld [vmem:[#allocation11 + $0x98] sm:$0xff] }
 0x29d   :  { %v6380_v43 = vcombine.low %v828_v29, %v832_v32  ;;  %v1036_v19 = vld [vmem:[#allocation11 + $0x718] sm:$0xff] }
 0x29e   :  { %2578 = vmatpush2.bf16.msra.mxu1 %v6442_v36  ;;  %v6516_v36 = vcombine.low %v964_v23, %v968_v24  ;;  %v1040_v23 = vld [vmem:[#allocation11 + $0x738] sm:$0xff] }
 0x29f   :  { %2619 = vmatpush2.bf16.msra.mxu0 %v6570_v37  ;;  %2579 = vmatprep.subr.bf16.mxu1 %v6435_v38  ;;  %v6381_v37 = vcombine.high %v828_v29, %v832_v32  ;;  %v6509_v38 = vcombine.high %v956_v33, %v960_v34  ;;  %v904_v29 = vld [vmem:[#allocation11 + $0x2f8] sm:$0xff] }
 0x2a0   :  { %2620 = vmatprep.subr.bf16.mxu0 %v6563_v39  ;;  %v820_v39 = vld [vmem:[#allocation11 + $0x58] sm:$0xff] }
 0x2a1   :  { %v6372_v51 = vcombine.low %v820_v39, %v824_v40  ;;  %v1028_v32 = vld [vmem:[#allocation11 + $0x6d8] sm:$0xff] }
 0x2a2   :  { %2580 = vmatpush2.bf16.msra.mxu1 %v6434_v44  ;;  %v6508_v44 = vcombine.low %v956_v33, %v960_v34  ;;  %v1032_v33 = vld [vmem:[#allocation11 + $0x6f8] sm:$0xff] }
 0x2a3   :  { %2621 = vmatpush2.bf16.msra.mxu0 %v6562_v45  ;;  %2581 = vmatprep.subr.bf16.mxu1 %v6427_v46  ;;  %v6373_v45 = vcombine.high %v820_v39, %v824_v40  ;;  %v6501_v46 = vcombine.high %v948_v41, %v952_v42  ;;  %v896_v39 = vld [vmem:[#allocation11 + $0x2b8] sm:$0xff] }
 0x2a4   :  { %2622 = vmatprep.subr.bf16.mxu0 %v6555_v47  ;;  %v812_v47 = vld [vmem:[#allocation11 + $0x18] sm:$0xff] }
 0x2a5   :  { %v6364_v61 = vcombine.low %v812_v47, %v816_v48  ;;  %v1020_v40 = vld [vmem:[#allocation11 + $0x698] sm:$0xff] }
 0x2a6   :  { %2582 = vmatpush2.bf16.msra.mxu1 %v6426_v53  ;;  %v6500_v53 = vcombine.low %v948_v41, %v952_v42  ;;  %v1024_v41 = vld [vmem:[#allocation11 + $0x6b8] sm:$0xff] }
 0x2a7   :  { %2623 = vmatpush2.bf16.msra.mxu0 %v6554_v55  ;;  %2633 = vmatprep.subr.bf16.mxu1 %v6421_v56  ;;  %v6365_v55 = vcombine.high %v812_v47, %v816_v48  ;;  %v6493_v56 = vcombine.high %v940_v49, %v944_v50  ;;  %v888_v47 = vld [vmem:[#allocation11 + $0x278] sm:$0xff] }
 0x2a8   :  { %2674 = vmatprep.subr.bf16.mxu0 %v6549_v57  ;;  %v932_v57 = vld [vmem:[#allocation11 + $0x3d8] sm:$0xff] }
 0x2a9   :  { %2584 = vmatmul.mubr.bf16.vlgmr.msra.gmra.mxu1 %v8260_v20  ;;  %v6484_v5 = vcombine.low %v932_v57, %v936_v58  ;;  %v1012_v48 = vld [vmem:[#allocation11 + $0x658] sm:$0xff] }
 0x2aa   :  { %2625 = vmatmul.mubr.bf16.vlgmr.msra.gmra.mxu0 %v8264_v22  ;;  %2634 = vmatpush1.bf16.msra.mxu1 %v6420_v60  ;;  %v1064_v60 = vld [vmem:[#allocation11 + $0x7f8] sm:$0xff] }
 0x2ab   :  { %2665 = vmatprep.mubr.bf16.mxu1 %v8258_v16  ;;  %2675 = vmatpush1.bf16.msra.mxu0 %v6548_v63  ;;  %v6525_v16 = vcombine.high %v972_v12, %v976_v13  ;;  %v6485_v63 = vcombine.high %v932_v57, %v936_v58  ;;  %v1048_v12 = vld [vmem:[#allocation11 + $0x778] sm:$0xff]  ;;  %v6476_v13 = vcombine.low %v924_v1, %v928_v2 }
 0x2ac   :  { %2706 = vmatprep.mubr.bf16.mxu0 %v8262_v21  ;;  %2635 = vmatprep.subr.bf16.mxu1 %v6413_v0  ;;  %v6396_v21 = vcombine.low %v844_v10, %v848_v11  ;;  %v6613_v0 = vcombine.high %v1060_v59, %v1064_v60  ;;  %v920_v10 = vld [vmem:[#allocation11 + $0x378] sm:$0xff] }
 0x2ad   :  { %2676 = vmatprep.subr.bf16.mxu0 %v6541_v3  ;;  %v1052_v3 = vld [vmem:[#allocation11 + $0x798] sm:$0xff] }
 0x2ae   :  { %2636 = vmatpush1.bf16.msra.mxu1 %v6412_v6  ;;  %v6612_v6 = vcombine.low %v1060_v59, %v1064_v60  ;;  %v1044_v11 = vld [vmem:[#allocation11 + $0x758] sm:$0xff] }
 0x2af   :  { %2677 = vmatpush1.bf16.msra.mxu0 %v6540_v7  ;;  %2637 = vmatprep.subr.bf16.mxu1 %v6405_v8  ;;  %v6477_v7 = vcombine.high %v924_v1, %v928_v2  ;;  %v6605_v8 = vcombine.high %v1052_v3, %v1056_v4  ;;  %v1016_v49 = vld [vmem:[#allocation11 + $0x678] sm:$0xff]  ;;  %v7291_v2 = vld [vmem:[#allocation14 + $0x18c] ss:$28 sps:$4 sm:$0xff]  }
 0x2b0   :  { %2678 = vmatprep.subr.bf16.mxu0 %v6533_v9  ;;  %v916_v9 = vld [vmem:[#allocation11 + $0x358] sm:$0xff] }
 0x2b1   :  { %v6468_v24 = vcombine.low %v916_v9, %v920_v10  ;;  %v880_v57 = vld [vmem:[#allocation11 + $0x238] sm:$0xff] }
 0x2b2   :  { %2638 = vmatpush1.bf16.msra.mxu1 %v6404_v14  ;;  %v6604_v14 = vcombine.low %v1052_v3, %v1056_v4  ;;  %v1004_v58 = vld [vmem:[#allocation11 + $0x618] sm:$0xff]  ;;  %v7303_v3 = vld [vmem:[#allocation14 + $0x50c] ss:$28 sps:$4 sm:$0xff]  }
 0x2b3   :  { %2679 = vmatpush1.bf16.msra.mxu0 %v6532_v15  ;;  %2639 = vmatprep.subr.bf16.mxu1 %v6397_v17  ;;  %v6469_v15 = vcombine.high %v916_v9, %v920_v10  ;;  %v6597_v17 = vcombine.high %v1044_v11, %v1048_v12  ;;  %v1008_v59 = vld [vmem:[#allocation11 + $0x638] sm:$0xff]  ;;  %v7289_v4 = vld [vmem:[#allocation14 + $0x188] ss:$28 sps:$4 sm:$0xff]  }
 0x2b4   :  { %2680 = vmatprep.subr.bf16.mxu0 %v6525_v16  ;;  %v908_v16 = vld [vmem:[#allocation11 + $0x318] sm:$0xff]  ;;  %v6556_v1 = vcombine.low %v1004_v58, %v1008_v59 }
 0x2b5   :  { %v6460_v34 = vcombine.low %v908_v16, %v912_v18  ;;  %v7309_v9 = vld [vmem:[#allocation14 + $0x4d4] ss:$28 sps:$4 sm:$0xff]  }
 0x2b6   :  { %2640 = vmatpush1.bf16.msra.mxu1 %v6396_v21  ;;  %v6596_v21 = vcombine.low %v1044_v11, %v1048_v12  ;;  %v7292_v12 = vld [vmem:[#allocation14 + $0x150] ss:$28 sps:$4 sm:$0xff]  }
 0x2b7   :  { %2681 = vmatpush1.bf16.msra.mxu0 %v6524_v25  ;;  %2641 = vmatprep.subr.bf16.mxu1 %v6389_v26  ;;  %v6461_v25 = vcombine.high %v908_v16, %v912_v18  ;;  %v6589_v26 = vcombine.high %v1036_v19, %v1040_v23  ;;  %v7315_v18 = vld [vmem:[#allocation14 + $0x49c] ss:$28 sps:$4 sm:$0xff]  }
 0x2b8   :  { %2682 = vmatprep.subr.bf16.mxu0 %v6517_v27  ;;  %v900_v27 = vld [vmem:[#allocation11 + $0x2d8] sm:$0xff] }
 0x2b9   :  { %v6452_v42 = vcombine.low %v900_v27, %v904_v29 }
 0x2ba   :  { %2642 = vmatpush1.bf16.msra.mxu1 %v6388_v35  ;;  %v6588_v35 = vcombine.low %v1036_v19, %v1040_v23 }
 0x2bb   :  { %2683 = vmatpush1.bf16.msra.mxu0 %v6516_v36  ;;  %2643 = vmatprep.subr.bf16.mxu1 %v6381_v37  ;;  %v6453_v36 = vcombine.high %v900_v27, %v904_v29  ;;  %v6581_v37 = vcombine.high %v1028_v32, %v1032_v33  ;;  %v7321_v29 = vld [vmem:[#allocation14 + $0x464] ss:$28 sps:$4 sm:$0xff]  }
 0x2bc   :  { %2684 = vmatprep.subr.bf16.mxu0 %v6509_v38  ;;  %v892_v38 = vld [vmem:[#allocation11 + $0x298] sm:$0xff] }
 0x2bd   :  { %v6444_v50 = vcombine.low %v892_v38, %v896_v39 }
 0x2be   :  { %2644 = vmatpush1.bf16.msra.mxu1 %v6380_v43  ;;  %v6580_v43 = vcombine.low %v1028_v32, %v1032_v33  ;;  %v7298_v33 = vld [vmem:[#allocation14 + $0xe0] ss:$28 sps:$4 sm:$0xff]  }
 0x2bf   :  { %2685 = vmatpush1.bf16.msra.mxu0 %v6508_v44  ;;  %2645 = vmatprep.subr.bf16.mxu1 %v6373_v45  ;;  %v6445_v44 = vcombine.high %v892_v38, %v896_v39  ;;  %v6573_v45 = vcombine.high %v1020_v40, %v1024_v41  ;;  %v7304_v38 = vld [vmem:[#allocation14 + $0xa8] ss:$28 sps:$4 sm:$0xff]   ;;  %v7312_v39 = vld [vmem:[#allocation14 + $0x74] ss:$28 sps:$4 sm:$0xff]  }
 0x2c0   :  { %2686 = vmatprep.subr.bf16.mxu0 %v6501_v46  ;;  %v884_v46 = vld [vmem:[#allocation11 + $0x258] sm:$0xff] }
 0x2c1   :  { %v6436_v60 = vcombine.low %v884_v46, %v888_v47 }
 0x2c2   :  { %2646 = vmatpush1.bf16.msra.mxu1 %v6372_v51  ;;  %v6572_v51 = vcombine.low %v1020_v40, %v1024_v41  ;;  %v7325_v40 = vld [vmem:[#allocation14 + $0x428] ss:$28 sps:$4 sm:$0xff]   ;;  %v7333_v41 = vld [vmem:[#allocation14 + $0x3f4] ss:$28 sps:$4 sm:$0xff]  }
 0x2c3   :  { %2687 = vmatpush1.bf16.msra.mxu0 %v6500_v53  ;;  %2647 = vmatprep.subr.bf16.mxu1 %v6365_v55  ;;  %v6437_v53 = vcombine.high %v884_v46, %v888_v47  ;;  %v6565_v55 = vcombine.high %v1012_v48, %v1016_v49  ;;  %v7316_v46 = vld [vmem:[#allocation14 + $0x38] ss:$28 sps:$4 sm:$0xff]   ;;  %v7324_v47 = vld [vmem:[#allocation14 + $0x4] ss:$28 sps:$4 sm:$0xff]  }
 0x2c4   :  { %2688 = vmatprep.subr.bf16.mxu0 %v6493_v56  ;;  %v876_v56 = vld [vmem:[#allocation11 + $0x218] sm:$0xff] }
 0x2c6   :  { %2648 = vmatpush1.bf16.msra.mxu1 %v6364_v61  ;;  %v6564_v61 = vcombine.low %v1012_v48, %v1016_v49  ;;  %v7337_v48 = vld [vmem:[#allocation14 + $0x3b8] ss:$28 sps:$4 sm:$0xff]   ;;  %v7345_v49 = vld [vmem:[#allocation14 + $0x384] ss:$28 sps:$4 sm:$0xff]  }
 0x2c7   :  { %2689 = vmatpush1.bf16.msra.mxu0 %v6492_v62  ;;  %2649 = vmatprep.subr.bf16.mxu1 %v6485_v63  ;;  %v6429_v62 = vcombine.high %v876_v56, %v880_v57  ;;  %v6557_v63 = vcombine.high %v1004_v58, %v1008_v59  ;;  %v7349_v58 = vld [vmem:[#allocation14 + $0x6c8] ss:$28 sps:$4 sm:$0xff]   ;;  %v7357_v59 = vld [vmem:[#allocation14 + $0x694] ss:$28 sps:$4 sm:$0xff]  }
 0x2c8   :  { %2690 = vmatprep.subr.bf16.mxu0 %v6613_v0  ;;  %v6428_v0 = vcombine.low %v876_v56, %v880_v57  ;;  %v7328_v56 = vld [vmem:[#allocation14 + $0x348] ss:$28 sps:$4 sm:$0xff]   ;;  %v7336_v57 = vld [vmem:[#allocation14 + $0x314] ss:$28 sps:$4 sm:$0xff]  }
 0x2ca   :  { %2650 = vmatpush2.bf16.msra.mxu1 %v6484_v5  ;;  %v8280_v5 = vld [vmem:[#allocation13] sm:$0xff] }
 0x2cb   :  { %2691 = vmatpush2.bf16.msra.mxu0 %v6612_v6  ;;  %2651 = vmatprep.subr.bf16.mxu1 %v6477_v7  ;;  %v7294_v6 = vld [vmem:[#allocation14 + $0x154] ss:$28 sps:$4 sm:$0xff]   ;;  %v7301_v7 = vld [vmem:[#allocation14 + $0x508] ss:$28 sps:$4 sm:$0xff]  }
 0x2cc   :  { %2692 = vmatprep.subr.bf16.mxu0 %v6605_v8  ;;  %v1074_v8 = vrot.slane %v8280_v5, %v8244_v31 }
 0x2ce   :  { %2652 = vmatpush2.bf16.msra.mxu1 %v6476_v13 }
 0x2cf   :  { %2693 = vmatpush2.bf16.msra.mxu0 %v6604_v14  ;;  %2653 = vmatprep.subr.bf16.mxu1 %v6469_v15  ;;  %v7297_v14 = vld [vmem:[#allocation14 + $0x11c] ss:$28 sps:$4 sm:$0xff]   ;;  %v7307_v15 = vld [vmem:[#allocation14 + $0x4d0] ss:$28 sps:$4 sm:$0xff]  }
 0x2d0   :  { %2694 = vmatprep.subr.bf16.mxu0 %v6597_v17 }
 0x2d2   :  { %2654 = vmatpush2.bf16.msra.mxu1 %v6468_v24  ;;  %v7295_v24 = vld [vmem:[#allocation14 + $0x118] ss:$28 sps:$4 sm:$0xff]  }
 0x2d3   :  { %2695 = vmatpush2.bf16.msra.mxu0 %v6596_v21  ;;  %2655 = vmatprep.subr.bf16.mxu1 %v6461_v25  ;;  %v7313_v25 = vld [vmem:[#allocation14 + $0x498] ss:$28 sps:$4 sm:$0xff]  }
 0x2d4   :  { %2696 = vmatprep.subr.bf16.mxu0 %v6589_v26 }
 0x2d6   :  { %2656 = vmatpush2.bf16.msra.mxu1 %v6460_v34 }
 0x2d7   :  { %2697 = vmatpush2.bf16.msra.mxu0 %v6588_v35  ;;  %2657 = vmatprep.subr.bf16.mxu1 %v6453_v36  ;;  %v7306_v35 = vld [vmem:[#allocation14 + $0xac] ss:$28 sps:$4 sm:$0xff]   ;;  %v7319_v36 = vld [vmem:[#allocation14 + $0x460] ss:$28 sps:$4 sm:$0xff]  }
 0x2d8   :  { %2698 = vmatprep.subr.bf16.mxu0 %v6581_v37  ;;  %v7327_v37 = vld [vmem:[#allocation14 + $0x42c] ss:$28 sps:$4 sm:$0xff]  }
 0x2da   :  { %2658 = vmatpush2.bf16.msra.mxu1 %v6452_v42  ;;  %v7310_v42 = vld [vmem:[#allocation14 + $0x70] ss:$28 sps:$4 sm:$0xff]  }
 0x2db   :  { %2699 = vmatpush2.bf16.msra.mxu0 %v6580_v43  ;;  %2659 = vmatprep.subr.bf16.mxu1 %v6445_v44  ;;  %v7318_v43 = vld [vmem:[#allocation14 + $0x3c] ss:$28 sps:$4 sm:$0xff]   ;;  %v7331_v44 = vld [vmem:[#allocation14 + $0x3f0] ss:$28 sps:$4 sm:$0xff]  }
 0x2dc   :  { %2700 = vmatprep.subr.bf16.mxu0 %v6573_v45  ;;  %v7339_v45 = vld [vmem:[#allocation14 + $0x3bc] ss:$28 sps:$4 sm:$0xff]  }
 0x2de   :  { %2660 = vmatpush2.bf16.msra.mxu1 %v6444_v50  ;;  %v7322_v50 = vld [vmem:[#allocation14] ss:$28 sps:$4 sm:$0xff]  }
 0x2df   :  { %2701 = vmatpush2.bf16.msra.mxu0 %v6572_v51  ;;  %2661 = vmatprep.subr.bf16.mxu1 %v6437_v53  ;;  %v7330_v51 = vld [vmem:[#allocation14 + $0x34c] ss:$28 sps:$4 sm:$0xff]   ;;  %v7343_v53 = vld [vmem:[#allocation14 + $0x380] ss:$28 sps:$4 sm:$0xff]  }
 0x2e0   :  { %2702 = vmatprep.subr.bf16.mxu0 %v6565_v55  ;;  %v7351_v55 = vld [vmem:[#allocation14 + $0x6cc] ss:$28 sps:$4 sm:$0xff]  }
 0x2e2   :  { %2662 = vmatpush2.bf16.msra.mxu1 %v6436_v60  ;;  %v7334_v60 = vld [vmem:[#allocation14 + $0x310] ss:$28 sps:$4 sm:$0xff]  }
 0x2e3   :  { %2703 = vmatpush2.bf16.msra.mxu0 %v6564_v61  ;;  %2663 = vmatprep.subr.bf16.mxu1 %v6429_v62  ;;  %v7342_v61 = vld [vmem:[#allocation14 + $0x2dc] ss:$28 sps:$4 sm:$0xff]   ;;  %v7355_v62 = vld [vmem:[#allocation14 + $0x690] ss:$28 sps:$4 sm:$0xff]  }
 0x2e4   :  { %2704 = vmatprep.subr.bf16.mxu0 %v6557_v63  ;;  %v7363_v63 = vld [vmem:[#allocation14 + $0x65c] ss:$28 sps:$4 sm:$0xff]  }
 0x2e6   :  { %2664 = vmatpush2.bf16.msra.mxu1 %v6428_v0  ;;  %v7340_v0 = vld [vmem:[#allocation14 + $0x2d8] ss:$28 sps:$4 sm:$0xff]  }
 0x2e7   :  { %2705 = vmatpush2.bf16.msra.mxu0 %v6556_v1  ;;  %5600 = vmatprep.subr.bf16.mxu1 %v7291_v2  ;;  %v7348_v1 = vld [vmem:[#allocation14 + $0x2a4] ss:$28 sps:$4 sm:$0xff]   ;;  %v7361_v2 = vld [vmem:[#allocation14 + $0x658] ss:$28 sps:$4 sm:$0xff]  }
 0x2e8   :  { %5641 = vmatprep.subr.bf16.mxu0 %v7303_v3  ;;  %v7369_v3 = vld [vmem:[#allocation14 + $0x624] ss:$28 sps:$4 sm:$0xff]  }
 0x2e9   :  { %2666 = vmatmul.mubr.bf16.vlgmr.msra.gmra.mxu1 %v8260_v20  ;;  %v8285_v10 = vpop.f32.mrf.mxu1 }
 0x2ea   :  { %2707 = vmatmul.mubr.bf16.vlgmr.msra.gmra.mxu0 %v8264_v22  ;;  %v8288_v11 = vpop.f32.mrf.mxu0  ;;  %5601 = vmatpush1.bf16.msra.mxu1 %v7289_v4  ;;  %v7300_v22 = vld [vmem:[#allocation14 + $0xe4] ss:$28 sps:$4 sm:$0xff]  }
 0x2eb   :  { %v2423_v13 = vpop.f32.mrf.mxu1  ;;  %5602 = vmatprep.subr.bf16.mxu1 %v7294_v6  ;;  %5642 = vmatpush1.bf16.msra.mxu0 %v7301_v7  ;;  %v7346_v4 = vld [vmem:[#allocation14 + $0x2a0] ss:$28 sps:$4 sm:$0xff]   ;;  %v7354_v6 = vld [vmem:[#allocation14 + $0x26c] ss:$28 sps:$4 sm:$0xff]  }
 0x2ec   :  { %v2424_v17 = vadd.f32 %v2423_v13, %v1074_v8  ;;  %v2464_v16 = vpop.f32.mrf.mxu0  ;;  %5643 = vmatprep.subr.bf16.mxu0 %v7309_v9  ;;  %v7367_v7 = vld [vmem:[#allocation14 + $0x620] ss:$28 sps:$4 sm:$0xff]   ;;  %v1070_v8 = vrot.slane %v8280_v5, %v8241_v30  ;;  %v7375_v9 = vld [vmem:[#allocation14 + $0x5ec] ss:$28 sps:$4 sm:$0xff]   ;;  %v7360_v13 = vld [vmem:[#allocation14 + $0x234] ss:$28 sps:$4 sm:$0xff]  }
 0x2ed   :  { %v2425_v19 = vpop.f32.mrf.mxu1 }
 0x2ee   :  { %v2465_v23 = vadd.f32 %v2464_v16, %v2424_v17  ;;  %v2466_v20 = vpop.f32.mrf.mxu0  ;;  %5603 = vmatpush1.bf16.msra.mxu1 %v7292_v12  ;;  %v7352_v12 = vld [vmem:[#allocation14 + $0x268] ss:$28 sps:$4 sm:$0xff]   ;;  %v7378_v17 = vld [vmem:[#allocation14 + $0x5b4] ss:$28 sps:$4 sm:$0xff]  }
 0x2ef   :  { %v2426_v21 = vpop.f32.mrf.mxu1  ;;  %5604 = vmatprep.subr.bf16.mxu1 %v7297_v14  ;;  %5644 = vmatpush1.bf16.msra.mxu0 %v7307_v15  ;;  %v7373_v14 = vld [vmem:[#allocation14 + $0x5e8] ss:$28 sps:$4 sm:$0xff]   ;;  %v2422_v15 = vadd.f32 %v8285_v10, %v1070_v8  ;;  %v7358_v16 = vld [vmem:[#allocation14 + $0x230] ss:$28 sps:$4 sm:$0xff]   ;;  %v7381_v20 = vld [vmem:[#allocation14 + $0x57c] ss:$28 sps:$4 sm:$0xff]  }
 0x2f0   :  { %vm2716_vm6 = vcmp.gt.f32.partialorder %v2465_v23, 0.0  ;;  %v2724_v26 = vmul.f32 0.2, %v2465_v23  ;;  %v2467_v27 = vpop.f32.mrf.mxu0  ;;  %5645 = vmatprep.subr.bf16.mxu0 %v7315_v18  ;;  %v7366_v18 = vld [vmem:[#allocation14 + $0x1fc] ss:$28 sps:$4 sm:$0xff]  }
 0x2f1   :  { %v7376_v19 = vld [vmem:[#allocation14 + $0x5b0] ss:$28 sps:$4 sm:$0xff]   ;;  %v7372_v21 = vld [vmem:[#allocation14 + $0x1c4] ss:$28 sps:$4 sm:$0xff]  }
 0x2f2   :  { %v2732_v32 = vsel %vm2716_vm6, %v2465_v23, %v2724_v26  ;;  %5605 = vmatpush1.bf16.msra.mxu1 %v7295_v24  ;;  %v2463_v23 = vadd.f32 %v8288_v11, %v2422_v15  ;;  %v7364_v24 = vld [vmem:[#allocation14 + $0x1f8] ss:$28 sps:$4 sm:$0xff]   ;;  %v7384_v10 = vld [vmem:[#allocation14 + $0x544] ss:$28 sps:$4 sm:$0xff]   ;;  %v7435_v11 = vld [vmem:[#allocation14 + $0xc0c] ss:$28 sps:$4 sm:$0xff]  }
 0x2f3   :  { %v8290_v34 = vpack.c.bf16 %v2732_v32, %v2732_v32  ;;  %5606 = vmatprep.subr.bf16.mxu1 %v7300_v22  ;;  %5646 = vmatpush1.bf16.msra.mxu0 %v7313_v25  ;;  %v7379_v22 = vld [vmem:[#allocation14 + $0x578] ss:$28 sps:$4 sm:$0xff]   ;;  %v7370_v26 = vld [vmem:[#allocation14 + $0x1c0] ss:$28 sps:$4 sm:$0xff]   ;;  %v7400_v8 = vld [vmem:[#allocation14 + $0x770] ss:$28 sps:$4 sm:$0xff]  }
 0x2f4   :  { %5647 = vmatprep.subr.bf16.mxu0 %v7321_v29  ;;  %v2723_v25 = vmul.f32 0.2, %v2463_v23  ;;  %vm2715_vm7 = vcmp.gt.f32.partialorder %v2463_v23, 0.0  ;;  %v7382_v27 = vld [vmem:[#allocation14 + $0x540] ss:$28 sps:$4 sm:$0xff]  }
 0x2f5   :  { %5632 = vmatprep.mubr.bf16.mxu1 %v8290_v34  ;;  %v7387_v29 = vld [vmem:[#allocation14 + $0x88c] ss:$28 sps:$4 sm:$0xff]   ;;  %v7408_v15 = vld [vmem:[#allocation14 + $0x704] ss:$28 sps:$4 sm:$0xff]  }
 0x2f6   :  { %5607 = vmatpush1.bf16.msra.mxu1 %v7298_v33  ;;  %v2731_v32 = vsel %vm2715_vm7, %v2463_v23, %v2723_v25  ;;  %v1078_v33 = vrot.slane %v8280_v5, %v8249_v52  ;;  %v7457_v23 = vld [vmem:[#allocation14 + $0xb28] ss:$28 sps:$4 sm:$0xff]   ;;  %v7471_v25 = vld [vmem:[#allocation14 + $0xabc] ss:$28 sps:$4 sm:$0xff]  }
 0x2f7   :  { %5608 = vmatprep.subr.bf16.mxu1 %v7306_v35  ;;  %5648 = vmatpush1.bf16.msra.mxu0 %v7319_v36  ;;  %v7385_v35 = vld [vmem:[#allocation14 + $0x888] ss:$28 sps:$4 sm:$0xff]   ;;  %v8299_v36 = vpack.c.bf16 %v2731_v32, %v2731_v32  ;;  %v7415_v32 = vld [vmem:[#allocation14 + $0x9d8] ss:$28 sps:$4 sm:$0xff]  }
 0x2f8   :  { %5649 = vmatprep.subr.bf16.mxu0 %v7327_v37  ;;  %v7390_v37 = vld [vmem:[#allocation14 + $0x854] ss:$28 sps:$4 sm:$0xff]  }
 0x2fa   :  { %5609 = vmatpush1.bf16.msra.mxu1 %v7304_v38  ;;  %v1082_v38 = vrot.slane %v8280_v5, %v8252_v54 }
 0x2fb   :  { %5610 = vmatprep.subr.bf16.mxu1 %v7312_v39  ;;  %5650 = vmatpush1.bf16.msra.mxu0 %v7325_v40 }
 0x2fc   :  { %5651 = vmatprep.subr.bf16.mxu0 %v7333_v41 }
 0x2fe   :  { %5611 = vmatpush1.bf16.msra.mxu1 %v7310_v42  ;;  %v7388_v42 = vld [vmem:[#allocation14 + $0x850] ss:$28 sps:$4 sm:$0xff]  }
 0x2ff   :  { %5612 = vmatprep.subr.bf16.mxu1 %v7318_v43  ;;  %5652 = vmatpush1.bf16.msra.mxu0 %v7331_v44  ;;  %v7393_v44 = vld [vmem:[#allocation14 + $0x81c] ss:$28 sps:$4 sm:$0xff]  }
 0x300   :  { %5653 = vmatprep.subr.bf16.mxu0 %v7339_v45 }
 0x302   :  { %5613 = vmatpush1.bf16.msra.mxu1 %v7316_v46 }
 0x303   :  { %5614 = vmatprep.subr.bf16.mxu1 %v7324_v47  ;;  %5654 = vmatpush1.bf16.msra.mxu0 %v7337_v48 }
 0x304   :  { %5655 = vmatprep.subr.bf16.mxu0 %v7345_v49 }
 0x306   :  { %5615 = vmatpush1.bf16.msra.mxu1 %v7322_v50 }
 0x307   :  { %5616 = vmatprep.subr.bf16.mxu1 %v7330_v51  ;;  %5656 = vmatpush1.bf16.msra.mxu0 %v7343_v53  ;;  %v7391_v53 = vld [vmem:[#allocation14 + $0x818] ss:$28 sps:$4 sm:$0xff]  }
 0x308   :  { %5657 = vmatprep.subr.bf16.mxu0 %v7351_v55 }
 0x30a   :  { %5617 = vmatpush2.bf16.msra.mxu1 %v7328_v56  ;;  %v7396_v56 = vld [vmem:[#allocation14 + $0x7e4] ss:$28 sps:$4 sm:$0xff]  }
 0x30b   :  { %5618 = vmatprep.subr.bf16.mxu1 %v7336_v57  ;;  %5658 = vmatpush2.bf16.msra.mxu0 %v7349_v58 }
 0x30c   :  { %5659 = vmatprep.subr.bf16.mxu0 %v7357_v59 }
 0x30e   :  { %5619 = vmatpush2.bf16.msra.mxu1 %v7334_v60 }
 0x30f   :  { %5620 = vmatprep.subr.bf16.mxu1 %v7342_v61  ;;  %5660 = vmatpush2.bf16.msra.mxu0 %v7355_v62  ;;  %v7394_v61 = vld [vmem:[#allocation14 + $0x7e0] ss:$28 sps:$4 sm:$0xff]  }
 0x310   :  { %5661 = vmatprep.subr.bf16.mxu0 %v7363_v63  ;;  %v7399_v63 = vld [vmem:[#allocation14 + $0x7ac] ss:$28 sps:$4 sm:$0xff]  }
 0x312   :  { %5621 = vmatpush2.bf16.msra.mxu1 %v7340_v0  ;;  %v7433_v0 = vld [vmem:[#allocation14 + $0xc08] ss:$28 sps:$4 sm:$0xff]  }
 0x313   :  { %5622 = vmatprep.subr.bf16.mxu1 %v7348_v1  ;;  %5662 = vmatpush2.bf16.msra.mxu0 %v7361_v2  ;;  %v7441_v2 = vld [vmem:[#allocation14 + $0xbd4] ss:$28 sps:$4 sm:$0xff]  }
 0x314   :  { %5663 = vmatprep.subr.bf16.mxu0 %v7369_v3  ;;  %v7397_v3 = vld [vmem:[#allocation14 + $0x7a8] ss:$28 sps:$4 sm:$0xff]  }
 0x316   :  { %5623 = vmatpush2.bf16.msra.mxu1 %v7346_v4  ;;  %v7402_v4 = vld [vmem:[#allocation14 + $0x774] ss:$28 sps:$4 sm:$0xff]  }
 0x317   :  { %5624 = vmatprep.subr.bf16.mxu1 %v7354_v6  ;;  %5664 = vmatpush2.bf16.msra.mxu0 %v7367_v7  ;;  %v7439_v6 = vld [vmem:[#allocation14 + $0xbd0] ss:$28 sps:$4 sm:$0xff]   ;;  %v7447_v7 = vld [vmem:[#allocation14 + $0xb9c] ss:$28 sps:$4 sm:$0xff]  }
 0x318   :  { %5665 = vmatprep.subr.bf16.mxu0 %v7375_v9  ;;  %v7405_v9 = vld [vmem:[#allocation14 + $0x73c] ss:$28 sps:$4 sm:$0xff]  }
 0x31a   :  { %5625 = vmatpush2.bf16.msra.mxu1 %v7352_v12  ;;  %v7445_v12 = vld [vmem:[#allocation14 + $0xb98] ss:$28 sps:$4 sm:$0xff]  }
 0x31b   :  { %5626 = vmatprep.subr.bf16.mxu1 %v7360_v13  ;;  %5666 = vmatpush2.bf16.msra.mxu0 %v7373_v14  ;;  %v7453_v13 = vld [vmem:[#allocation14 + $0xb64] ss:$28 sps:$4 sm:$0xff]   ;;  %v7403_v14 = vld [vmem:[#allocation14 + $0x738] ss:$28 sps:$4 sm:$0xff]  }
 0x31c   :  { %5667 = vmatprep.subr.bf16.mxu0 %v7378_v17  ;;  %v7451_v17 = vld [vmem:[#allocation14 + $0xb60] ss:$28 sps:$4 sm:$0xff]  }
 0x31e   :  { %5627 = vmatpush2.bf16.msra.mxu1 %v7358_v16  ;;  %v7459_v16 = vld [vmem:[#allocation14 + $0xb2c] ss:$28 sps:$4 sm:$0xff]  }
 0x31f   :  { %5628 = vmatprep.subr.bf16.mxu1 %v7366_v18  ;;  %5668 = vmatpush2.bf16.msra.mxu0 %v7376_v19  ;;  %v7406_v18 = vld [vmem:[#allocation14 + $0x700] ss:$28 sps:$4 sm:$0xff]   ;;  %v7411_v19 = vld [vmem:[#allocation14 + $0xa4c] ss:$28 sps:$4 sm:$0xff]  }
 0x320   :  { %5669 = vmatprep.subr.bf16.mxu0 %v7381_v20  ;;  %v7465_v20 = vld [vmem:[#allocation14 + $0xaf4] ss:$28 sps:$4 sm:$0xff]  }
 0x322   :  { %5629 = vmatpush2.bf16.msra.mxu1 %v7364_v24  ;;  %v7409_v24 = vld [vmem:[#allocation14 + $0xa48] ss:$28 sps:$4 sm:$0xff]  }
 0x323   :  { %5630 = vmatprep.subr.bf16.mxu1 %v7372_v21  ;;  %5670 = vmatpush2.bf16.msra.mxu0 %v7379_v22  ;;  %v7414_v21 = vld [vmem:[#allocation14 + $0xa14] ss:$28 sps:$4 sm:$0xff]  }
 0x324   :  { %5671 = vmatprep.subr.bf16.mxu0 %v7384_v10  ;;  %v7463_v22 = vld [vmem:[#allocation14 + $0xaf0] ss:$28 sps:$4 sm:$0xff]  }
 0x325   :  { %v7412_v10 = vld [vmem:[#allocation14 + $0xa10] ss:$28 sps:$4 sm:$0xff]  }
 0x326   :  { %5631 = vmatpush2.bf16.msra.mxu1 %v7370_v26  ;;  %v7417_v26 = vld [vmem:[#allocation14 + $0x9dc] ss:$28 sps:$4 sm:$0xff]  }
 0x327   :  { %5672 = vmatpush2.bf16.msra.mxu0 %v7382_v27  ;;  %5682 = vmatprep.subr.bf16.mxu1 %v7387_v29  ;;  %v7469_v27 = vld [vmem:[#allocation14 + $0xab8] ss:$28 sps:$4 sm:$0xff]   ;;  %v7477_v29 = vld [vmem:[#allocation14 + $0xa84] ss:$28 sps:$4 sm:$0xff]  }
 0x328   :  { %5723 = vmatprep.subr.bf16.mxu0 %v7435_v11  ;;  %v7420_v11 = vld [vmem:[#allocation14 + $0x9a4] ss:$28 sps:$4 sm:$0xff]  }
 0x329   :  { %v2503_v39 = vpop.f32.mrf.mxu1  ;;  %5633 = vmatmul.mubr.bf16.vlgmr.msra.gmra.mxu1 %v8299_v36 }
 0x32a   :  { %v2504_v40 = vadd.f32 %v2503_v39, %v1078_v33  ;;  %v2544_v41 = vpop.f32.mrf.mxu0  ;;  %5683 = vmatpush1.bf16.msra.mxu1 %v7385_v35  ;;  %v7475_v33 = vld [vmem:[#allocation14 + $0xa80] ss:$28 sps:$4 sm:$0xff]   ;;  %v7483_v35 = vld [vmem:[#allocation14 + $0xdcc] ss:$28 sps:$4 sm:$0xff]  }
 0x32b   :  { %v2505_v43 = vpop.f32.mrf.mxu1  ;;  %5684 = vmatprep.subr.bf16.mxu1 %v7390_v37  ;;  %v7418_v37 = vld [vmem:[#allocation14 + $0x9a0] ss:$28 sps:$4 sm:$0xff]   ;;  %v7481_v39 = vld [vmem:[#allocation14 + $0xdc8] ss:$28 sps:$4 sm:$0xff]  }
 0x32c   :  { %v2545_v45 = vadd.f32 %v2544_v41, %v2504_v40  ;;  %v2506_v46 = vadd.f32 %v2505_v43, %v1082_v38  ;;  %v2546_v47 = vpop.f32.mrf.mxu0  ;;  %v7423_v38 = vld [vmem:[#allocation14 + $0x96c] ss:$28 sps:$4 sm:$0xff]   ;;  %v7489_v40 = vld [vmem:[#allocation14 + $0xd94] ss:$28 sps:$4 sm:$0xff]  }
 0x32d   :  { %v2507_v48 = vpop.f32.mrf.mxu1  ;;  %v7421_v41 = vld [vmem:[#allocation14 + $0x968] ss:$28 sps:$4 sm:$0xff]   ;;  %v7487_v43 = vld [vmem:[#allocation14 + $0xd90] ss:$28 sps:$4 sm:$0xff]  }
 0x32e   :  { %vm2717_vm8 = vcmp.gt.f32.partialorder %v2545_v45, 0.0  ;;  %v2725_v49 = vmul.f32 0.2, %v2545_v45  ;;  %v2547_v50 = vadd.f32 %v2546_v47, %v2506_v46  ;;  %v2548_v51 = vpop.f32.mrf.mxu0  ;;  %5685 = vmatpush1.bf16.msra.mxu1 %v7388_v42  ;;  %v7426_v42 = vld [vmem:[#allocation14 + $0x934] ss:$28 sps:$4 sm:$0xff]  }
 0x32f   :  { %v2508_v55 = vpop.f32.mrf.mxu1  ;;  %5686 = vmatprep.subr.bf16.mxu1 %v7393_v44  ;;  %v7495_v44 = vld [vmem:[#allocation14 + $0xd5c] ss:$28 sps:$4 sm:$0xff]   ;;  %v7501_v48 = vld [vmem:[#allocation14 + $0xd24] ss:$28 sps:$4 sm:$0xff]  }
 0x330   :  { %vm2718_vm9 = vcmp.gt.f32.partialorder %v2547_v50, 0.0  ;;  %v2726_v57 = vmul.f32 0.2, %v2547_v50  ;;  %v2549_v58 = vpop.f32.mrf.mxu0  ;;  %v2733_v59 = vsel %vm2717_vm8, %v2545_v45, %v2725_v49  ;;  %v7424_v45 = vld [vmem:[#allocation14 + $0x930] ss:$28 sps:$4 sm:$0xff]   ;;  %v1085_v55 = vsub.s32 4, %v8238_v28 }
 0x331   :  { %v8306_v1 = vpack.c.bf16 %v2733_v59, %v2733_v59  ;;  %v7429_v46 = vld [vmem:[#allocation14 + $0x8fc] ss:$28 sps:$4 sm:$0xff]   ;;  %v7505_v58 = vld [vmem:[#allocation14 + $0xce8] ss:$28 sps:$4 sm:$0xff]   ;;  %v1089_v59 = vsub.s32 5, %v8238_v28 }
 0x332   :  { %v2734_v60 = vsel %vm2718_vm9, %v2547_v50, %v2726_v57  ;;  %5687 = vmatpush1.bf16.msra.mxu1 %v7391_v53  ;;  %v7493_v47 = vld [vmem:[#allocation14 + $0xd58] ss:$28 sps:$4 sm:$0xff]   ;;  %v7432_v50 = vld [vmem:[#allocation14 + $0x8c4] ss:$28 sps:$4 sm:$0xff]   ;;  %v7507_v53 = vld [vmem:[#allocation14 + $0xcec] ss:$28 sps:$4 sm:$0xff]  }
 0x333   :  { %v8304_v62 = vpack.c.bf16 %v2734_v60, %v2734_v60  ;;  %5688 = vmatprep.subr.bf16.mxu1 %v7396_v56  ;;  %v7427_v49 = vld [vmem:[#allocation14 + $0x8f8] ss:$28 sps:$4 sm:$0xff]   ;;  %v7499_v51 = vld [vmem:[#allocation14 + $0xd20] ss:$28 sps:$4 sm:$0xff]  }
 0x334   :  { %v7430_v56 = vld [vmem:[#allocation14 + $0x8c0] ss:$28 sps:$4 sm:$0xff]   ;;  %v7438_v57 = vld [vmem:[#allocation14 + $0x194] ss:$28 sps:$4 sm:$0xff]  }
 0x335   :  { %5673 = vmatprep.mubr.bf16.mxu0 %v8304_v62  ;;  %v7513_v60 = vld [vmem:[#allocation14 + $0xcb4] ss:$28 sps:$4 sm:$0xff]  }
 0x336   :  { %5674 = vmatmul.mubr.bf16.vlgmr.msra.gmra.mxu0 %v8306_v1  ;;  %5689 = vmatpush1.bf16.msra.mxu1 %v7394_v61  ;;  %v1086_v61 = vrot.slane %v8280_v5, %v1085_v55 }
 0x337   :  { %5690 = vmatprep.subr.bf16.mxu1 %v7399_v63  ;;  %5724 = vmatpush1.bf16.msra.mxu0 %v7433_v0  ;;  %v7511_v63 = vld [vmem:[#allocation14 + $0xcb0] ss:$28 sps:$4 sm:$0xff]   ;;  %v1090_v0 = vrot.slane %v8280_v5, %v1089_v59 }
 0x338   :  { %5725 = vmatprep.subr.bf16.mxu0 %v7441_v2  ;;  %v7519_v2 = vld [vmem:[#allocation14 + $0xc7c] ss:$28 sps:$4 sm:$0xff]  }
 0x33a   :  { %5691 = vmatpush1.bf16.msra.mxu1 %v7397_v3 }
 0x33b   :  { %5692 = vmatprep.subr.bf16.mxu1 %v7402_v4  ;;  %5726 = vmatpush1.bf16.msra.mxu0 %v7439_v6 }
 0x33c   :  { %5727 = vmatprep.subr.bf16.mxu0 %v7447_v7 }
 0x33e   :  { %5693 = vmatpush1.bf16.msra.mxu1 %v7400_v8  ;;  %v7517_v8 = vld [vmem:[#allocation14 + $0xc78] ss:$28 sps:$4 sm:$0xff]  }
 0x33f   :  { %5694 = vmatprep.subr.bf16.mxu1 %v7405_v9  ;;  %5728 = vmatpush1.bf16.msra.mxu0 %v7445_v12 }
 0x340   :  { %5729 = vmatprep.subr.bf16.mxu0 %v7453_v13 }
 0x342   :  { %5695 = vmatpush1.bf16.msra.mxu1 %v7403_v14  ;;  %v7525_v14 = vld [vmem:[#allocation14 + $0xc44] ss:$28 sps:$4 sm:$0xff]  }
 0x343   :  { %5696 = vmatprep.subr.bf16.mxu1 %v7408_v15  ;;  %5730 = vmatpush1.bf16.msra.mxu0 %v7451_v17 }
 0x344   :  { %5731 = vmatprep.subr.bf16.mxu0 %v7459_v16 }
 0x346   :  { %5697 = vmatpush1.bf16.msra.mxu1 %v7406_v18 }
 0x347   :  { %5698 = vmatprep.subr.bf16.mxu1 %v7411_v19  ;;  %5732 = vmatpush1.bf16.msra.mxu0 %v7457_v23  ;;  %v7523_v23 = vld [vmem:[#allocation14 + $0xc40] ss:$28 sps:$4 sm:$0xff]  }
 0x348   :  { %5733 = vmatprep.subr.bf16.mxu0 %v7465_v20 }
 0x34a   :  { %5699 = vmatpush2.bf16.msra.mxu1 %v7409_v24 }
 0x34b   :  { %5700 = vmatprep.subr.bf16.mxu1 %v7414_v21  ;;  %5734 = vmatpush1.bf16.msra.mxu0 %v7463_v22  ;;  %v7531_v21 = vld [vmem:[#allocation14 + $0x514] ss:$28 sps:$4 sm:$0xff]  }
 0x34c   :  { %5735 = vmatprep.subr.bf16.mxu0 %v7471_v25 }
 0x34e   :  { %5701 = vmatpush2.bf16.msra.mxu1 %v7412_v10 }
 0x34f   :  { %5702 = vmatprep.subr.bf16.mxu1 %v7417_v26  ;;  %5736 = vmatpush1.bf16.msra.mxu0 %v7469_v27  ;;  %v7436_v26 = vld [vmem:[#allocation14 + $0x190] ss:$28 sps:$4 sm:$0xff]  }
 0x350   :  { %5737 = vmatprep.subr.bf16.mxu0 %v7477_v29  ;;  %v7444_v29 = vld [vmem:[#allocation14 + $0x15c] ss:$28 sps:$4 sm:$0xff]  }
 0x352   :  { %5703 = vmatpush2.bf16.msra.mxu1 %v7415_v32  ;;  %v7442_v32 = vld [vmem:[#allocation14 + $0x158] ss:$28 sps:$4 sm:$0xff]  }
 0x353   :  { %5704 = vmatprep.subr.bf16.mxu1 %v7420_v11  ;;  %5738 = vmatpush1.bf16.msra.mxu0 %v7475_v33  ;;  %v7450_v11 = vld [vmem:[#allocation14 + $0x124] ss:$28 sps:$4 sm:$0xff]  }
 0x354   :  { %5739 = vmatprep.subr.bf16.mxu0 %v7483_v35  ;;  %v7448_v33 = vld [vmem:[#allocation14 + $0x120] ss:$28 sps:$4 sm:$0xff]   ;;  %v7456_v35 = vld [vmem:[#allocation14 + $0xec] ss:$28 sps:$4 sm:$0xff]  }
 0x356   :  { %5705 = vmatpush2.bf16.msra.mxu1 %v7418_v37  ;;  %v7454_v37 = vld [vmem:[#allocation14 + $0xe8] ss:$28 sps:$4 sm:$0xff]  }
 0x357   :  { %5706 = vmatprep.subr.bf16.mxu1 %v7423_v38  ;;  %5740 = vmatpush2.bf16.msra.mxu0 %v7481_v39  ;;  %v7462_v38 = vld [vmem:[#allocation14 + $0xb4] ss:$28 sps:$4 sm:$0xff]  }
 0x358   :  { %5741 = vmatprep.subr.bf16.mxu0 %v7489_v40  ;;  %v7460_v39 = vld [vmem:[#allocation14 + $0xb0] ss:$28 sps:$4 sm:$0xff]   ;;  %v7468_v40 = vld [vmem:[#allocation14 + $0x7c] ss:$28 sps:$4 sm:$0xff]  }
 0x35a   :  { %5707 = vmatpush2.bf16.msra.mxu1 %v7421_v41  ;;  %v7466_v41 = vld [vmem:[#allocation14 + $0x78] ss:$28 sps:$4 sm:$0xff]  }
 0x35b   :  { %5708 = vmatprep.subr.bf16.mxu1 %v7426_v42  ;;  %5742 = vmatpush2.bf16.msra.mxu0 %v7487_v43  ;;  %v7474_v42 = vld [vmem:[#allocation14 + $0x44] ss:$28 sps:$4 sm:$0xff]  }
 0x35c   :  { %5743 = vmatprep.subr.bf16.mxu0 %v7495_v44  ;;  %v7472_v43 = vld [vmem:[#allocation14 + $0x40] ss:$28 sps:$4 sm:$0xff]   ;;  %v7480_v44 = vld [vmem:[#allocation14 + $0xc] ss:$28 sps:$4 sm:$0xff]  }
 0x35e   :  { %5709 = vmatpush2.bf16.msra.mxu1 %v7424_v45  ;;  %v7478_v45 = vld [vmem:[#allocation14 + $0x8] ss:$28 sps:$4 sm:$0xff]  }
 0x35f   :  { %5710 = vmatprep.subr.bf16.mxu1 %v7429_v46  ;;  %5744 = vmatpush2.bf16.msra.mxu0 %v7493_v47  ;;  %v7486_v46 = vld [vmem:[#allocation14 + $0x354] ss:$28 sps:$4 sm:$0xff]  }
 0x360   :  { %5745 = vmatprep.subr.bf16.mxu0 %v7501_v48  ;;  %v7484_v47 = vld [vmem:[#allocation14 + $0x350] ss:$28 sps:$4 sm:$0xff]   ;;  %v7492_v48 = vld [vmem:[#allocation14 + $0x31c] ss:$28 sps:$4 sm:$0xff]  }
 0x362   :  { %5711 = vmatpush2.bf16.msra.mxu1 %v7427_v49  ;;  %v7490_v49 = vld [vmem:[#allocation14 + $0x318] ss:$28 sps:$4 sm:$0xff]  }
 0x363   :  { %5712 = vmatprep.subr.bf16.mxu1 %v7432_v50  ;;  %5746 = vmatpush2.bf16.msra.mxu0 %v7499_v51  ;;  %v7498_v50 = vld [vmem:[#allocation14 + $0x2e4] ss:$28 sps:$4 sm:$0xff]  }
 0x364   :  { %5747 = vmatprep.subr.bf16.mxu0 %v7507_v53  ;;  %v7496_v51 = vld [vmem:[#allocation14 + $0x2e0] ss:$28 sps:$4 sm:$0xff]   ;;  %v7504_v53 = vld [vmem:[#allocation14 + $0x2ac] ss:$28 sps:$4 sm:$0xff]  }
 0x366   :  { %5713 = vmatpush2.bf16.msra.mxu1 %v7430_v56  ;;  %v7502_v56 = vld [vmem:[#allocation14 + $0x2a8] ss:$28 sps:$4 sm:$0xff]  }
 0x367   :  { %5764 = vmatprep.subr.bf16.mxu1 %v7438_v57  ;;  %5748 = vmatpush2.bf16.msra.mxu0 %v7505_v58  ;;  %v7510_v57 = vld [vmem:[#allocation14 + $0x274] ss:$28 sps:$4 sm:$0xff]   ;;  %v1093_v58 = vsub.s32 6, %v8238_v28 }
 0x368   :  { %5749 = vmatprep.subr.bf16.mxu0 %v7513_v60  ;;  %v7508_v60 = vld [vmem:[#allocation14 + $0x270] ss:$28 sps:$4 sm:$0xff]  }
 0x369   :  { %v2585_v3 = vpop.f32.mrf.mxu1 }
 0x36a   :  { %v2586_v4 = vadd.f32 %v2585_v3, %v1086_v61  ;;  %v2626_v6 = vpop.f32.mrf.mxu0  ;;  %v7516_v61 = vld [vmem:[#allocation14 + $0x23c] ss:$28 sps:$4 sm:$0xff]  }
 0x36b   :  { %v2587_v7 = vpop.f32.mrf.mxu1  ;;  %5750 = vmatpush2.bf16.msra.mxu0 %v7511_v63  ;;  %v1097_v63 = vsub.s32 7, %v8238_v28 }
 0x36c   :  { %v2627_v9 = vadd.f32 %v2626_v6, %v2586_v4  ;;  %v2588_v12 = vadd.f32 %v2587_v7, %v1090_v0  ;;  %v2628_v13 = vpop.f32.mrf.mxu0  ;;  %5751 = vmatprep.subr.bf16.mxu0 %v7519_v2  ;;  %v1094_v0 = vrot.slane %v8280_v5, %v1093_v58  ;;  %v7514_v2 = vld [vmem:[#allocation14 + $0x238] ss:$28 sps:$4 sm:$0xff]   ;;  %v7522_v4 = vld [vmem:[#allocation14 + $0x204] ss:$28 sps:$4 sm:$0xff]  }
 0x36d   :  { %v2589_v15 = vpop.f32.mrf.mxu1  ;;  %v1098_v3 = vrot.slane %v8280_v5, %v1097_v63  ;;  %v7526_v5 = vld [vmem:[#allocation14 + $0x1c8] ss:$28 sps:$4 sm:$0xff]  }
 0x36e   :  { %vm2719_vm10 = vcmp.gt.f32.partialorder %v2627_v9, 0.0  ;;  %v2727_v17 = vmul.f32 0.2, %v2627_v9  ;;  %v2629_v16 = vadd.f32 %v2628_v13, %v2588_v12  ;;  %v2630_v18 = vpop.f32.mrf.mxu0  ;;  %v7520_v12 = vld [vmem:[#allocation14 + $0x200] ss:$28 sps:$4 sm:$0xff]  }
 0x36f   :  { %v2590_v19 = vpop.f32.mrf.mxu1  ;;  %5752 = vmatpush2.bf16.msra.mxu0 %v7517_v8  ;;  %v7570_v63 = vld [vmem:[#allocation14 + $0x744] ss:$28 sps:$4 sm:$0xff]  }
 0x370   :  { %vm2720_vm11 = vcmp.gt.f32.partialorder %v2629_v16, 0.0  ;;  %v2728_v20 = vmul.f32 0.2, %v2629_v16  ;;  %v2631_v24 = vpop.f32.mrf.mxu0  ;;  %5753 = vmatprep.subr.bf16.mxu0 %v7525_v14  ;;  %v2735_v22 = vsel %vm2719_vm10, %v2627_v9, %v2727_v17  ;;  %v7528_v17 = vld [vmem:[#allocation14 + $0x1cc] ss:$28 sps:$4 sm:$0xff]  }
 0x371   :  { %v8320_v27 = vpack.c.bf16 %v2735_v22, %v2735_v22  ;;  %v7534_v22 = vld [vmem:[#allocation14 + $0x894] ss:$28 sps:$4 sm:$0xff]  }
 0x372   :  { %v2736_v25 = vsel %vm2720_vm11, %v2629_v16, %v2728_v20 }
 0x373   :  { %v8318_v10 = vpack.c.bf16 %v2736_v25, %v2736_v25  ;;  %5754 = vmatpush2.bf16.msra.mxu0 %v7523_v23 }
 0x374   :  { %5805 = vmatprep.subr.bf16.mxu0 %v7531_v21 }
 0x375   :  { %5714 = vmatprep.mubr.bf16.mxu1 %v8318_v10 }
 0x376   :  { %5715 = vmatmul.mubr.bf16.vlgmr.msra.gmra.mxu1 %v8320_v27 }
 0x377   :  { %5765 = vmatpush1.bf16.msra.mxu1 %v7436_v26  ;;  %5796 = vmatprep.mubr.bf16.mxu1 %v8290_v34 }
 0x378   :  { %5766 = vmatprep.subr.bf16.mxu1 %v7444_v29 }
 0x37b   :  { %5767 = vmatpush1.bf16.msra.mxu1 %v7442_v32  ;;  %v7529_v32 = vld [vmem:[#allocation14 + $0x510] ss:$28 sps:$4 sm:$0xff]  }
 0x37c   :  { %5768 = vmatprep.subr.bf16.mxu1 %v7450_v11  ;;  %v7532_v11 = vld [vmem:[#allocation14 + $0x890] ss:$28 sps:$4 sm:$0xff]  }
 0x37f   :  { %5769 = vmatpush1.bf16.msra.mxu1 %v7448_v33 }
 0x380   :  { %5770 = vmatprep.subr.bf16.mxu1 %v7456_v35  ;;  %v7537_v35 = vld [vmem:[#allocation14 + $0x4dc] ss:$28 sps:$4 sm:$0xff]  }
 0x383   :  { %5771 = vmatpush1.bf16.msra.mxu1 %v7454_v37  ;;  %v7540_v37 = vld [vmem:[#allocation14 + $0x85c] ss:$28 sps:$4 sm:$0xff]  }
 0x384   :  { %5772 = vmatprep.subr.bf16.mxu1 %v7462_v38  ;;  %v7535_v38 = vld [vmem:[#allocation14 + $0x4d8] ss:$28 sps:$4 sm:$0xff]  }
 0x387   :  { %5773 = vmatpush1.bf16.msra.mxu1 %v7460_v39  ;;  %v7538_v39 = vld [vmem:[#allocation14 + $0x858] ss:$28 sps:$4 sm:$0xff]  }
 0x388   :  { %5774 = vmatprep.subr.bf16.mxu1 %v7468_v40  ;;  %v7543_v40 = vld [vmem:[#allocation14 + $0x4a4] ss:$28 sps:$4 sm:$0xff]  }
 0x38b   :  { %5775 = vmatpush1.bf16.msra.mxu1 %v7466_v41  ;;  %v7546_v41 = vld [vmem:[#allocation14 + $0x824] ss:$28 sps:$4 sm:$0xff]  }
 0x38c   :  { %5776 = vmatprep.subr.bf16.mxu1 %v7474_v42  ;;  %v7541_v42 = vld [vmem:[#allocation14 + $0x4a0] ss:$28 sps:$4 sm:$0xff]  }
 0x38f   :  { %5777 = vmatpush1.bf16.msra.mxu1 %v7472_v43  ;;  %v7544_v43 = vld [vmem:[#allocation14 + $0x820] ss:$28 sps:$4 sm:$0xff]  }
 0x390   :  { %5778 = vmatprep.subr.bf16.mxu1 %v7480_v44  ;;  %v7549_v44 = vld [vmem:[#allocation14 + $0x46c] ss:$28 sps:$4 sm:$0xff]  }
 0x393   :  { %5779 = vmatpush1.bf16.msra.mxu1 %v7478_v45  ;;  %v7552_v45 = vld [vmem:[#allocation14 + $0x7ec] ss:$28 sps:$4 sm:$0xff]  }
 0x394   :  { %5780 = vmatprep.subr.bf16.mxu1 %v7486_v46  ;;  %v7547_v46 = vld [vmem:[#allocation14 + $0x468] ss:$28 sps:$4 sm:$0xff]  }
 0x397   :  { %5781 = vmatpush2.bf16.msra.mxu1 %v7484_v47  ;;  %v7550_v47 = vld [vmem:[#allocation14 + $0x7e8] ss:$28 sps:$4 sm:$0xff]  }
 0x398   :  { %5782 = vmatprep.subr.bf16.mxu1 %v7492_v48  ;;  %v7555_v48 = vld [vmem:[#allocation14 + $0x434] ss:$28 sps:$4 sm:$0xff]  }
 0x39b   :  { %5783 = vmatpush2.bf16.msra.mxu1 %v7490_v49  ;;  %v7558_v49 = vld [vmem:[#allocation14 + $0x7b4] ss:$28 sps:$4 sm:$0xff]  }
 0x39c   :  { %5784 = vmatprep.subr.bf16.mxu1 %v7498_v50  ;;  %v7553_v50 = vld [vmem:[#allocation14 + $0x430] ss:$28 sps:$4 sm:$0xff]  }
 0x39f   :  { %5785 = vmatpush2.bf16.msra.mxu1 %v7496_v51  ;;  %v7556_v51 = vld [vmem:[#allocation14 + $0x7b0] ss:$28 sps:$4 sm:$0xff]  }
 0x3a0   :  { %5786 = vmatprep.subr.bf16.mxu1 %v7504_v53  ;;  %v7561_v53 = vld [vmem:[#allocation14 + $0x3fc] ss:$28 sps:$4 sm:$0xff]  }
 0x3a3   :  { %5787 = vmatpush2.bf16.msra.mxu1 %v7502_v56  ;;  %v7564_v56 = vld [vmem:[#allocation14 + $0x77c] ss:$28 sps:$4 sm:$0xff]  }
 0x3a4   :  { %5788 = vmatprep.subr.bf16.mxu1 %v7510_v57  ;;  %v7559_v57 = vld [vmem:[#allocation14 + $0x3f8] ss:$28 sps:$4 sm:$0xff]  }
 0x3a7   :  { %5789 = vmatpush2.bf16.msra.mxu1 %v7508_v60  ;;  %v7562_v60 = vld [vmem:[#allocation14 + $0x778] ss:$28 sps:$4 sm:$0xff]  }
 0x3a8   :  { %5790 = vmatprep.subr.bf16.mxu1 %v7516_v61  ;;  %v7567_v61 = vld [vmem:[#allocation14 + $0x3c4] ss:$28 sps:$4 sm:$0xff]  }
 0x3a9   :  { %v2667_v6 = vpop.f32.mrf.mxu1 }
 0x3aa   :  { %v2668_v7 = vadd.f32 %v2667_v6, %v1094_v0  ;;  %v2708_v8 = vpop.f32.mrf.mxu0  ;;  %v7565_v0 = vld [vmem:[#allocation14 + $0x3c0] ss:$28 sps:$4 sm:$0xff]   ;;  %v7571_v6 = vld [vmem:[#allocation14 + $0x388] ss:$28 sps:$4 sm:$0xff]  }
 0x3ab   :  { %5791 = vmatpush2.bf16.msra.mxu1 %v7514_v2  ;;  %v2669_v9 = vpop.f32.mrf.mxu1  ;;  %v7568_v2 = vld [vmem:[#allocation14 + $0x740] ss:$28 sps:$4 sm:$0xff]  }
 0x3ac   :  { %v2709_v13 = vadd.f32 %v2708_v8, %v2668_v7  ;;  %v2670_v14 = vadd.f32 %v2669_v9, %v1098_v3  ;;  %v2710_v15 = vpop.f32.mrf.mxu0  ;;  %5792 = vmatprep.subr.bf16.mxu1 %v7522_v4  ;;  %v7573_v3 = vld [vmem:[#allocation14 + $0x38c] ss:$28 sps:$4 sm:$0xff]   ;;  %v7579_v8 = vld [vmem:[#allocation14 + $0x6d4] ss:$28 sps:$4 sm:$0xff]  }
 0x3ad   :  { %v2671_v16 = vpop.f32.mrf.mxu1  ;;  %v7576_v4 = vld [vmem:[#allocation14 + $0x70c] ss:$28 sps:$4 sm:$0xff]   ;;  %v7582_v9 = vld [vmem:[#allocation14 + $0xa54] ss:$28 sps:$4 sm:$0xff]  }
 0x3ae   :  { %vm2721_vm12 = vcmp.gt.f32.partialorder %v2709_v13, 0.0  ;;  %v2729_v18 = vmul.f32 0.2, %v2709_v13  ;;  %v2711_v19 = vadd.f32 %v2710_v15, %v2670_v14  ;;  %v2712_v23 = vpop.f32.mrf.mxu0  ;;  %v7574_v7 = vld [vmem:[#allocation14 + $0x708] ss:$28 sps:$4 sm:$0xff]  }
 0x3af   :  { %5793 = vmatpush2.bf16.msra.mxu1 %v7520_v12  ;;  %v2672_v20 = vpop.f32.mrf.mxu1  ;;  %v7577_v12 = vld [vmem:[#allocation14 + $0x6d0] ss:$28 sps:$4 sm:$0xff]   ;;  %v7585_v14 = vld [vmem:[#allocation14 + $0x69c] ss:$28 sps:$4 sm:$0xff]  }
 0x3b0   :  { %vm2722_vm13 = vcmp.gt.f32.partialorder %v2711_v19, 0.0  ;;  %v2730_v24 = vmul.f32 0.2, %v2711_v19  ;;  %v2713_v21 = vpop.f32.mrf.mxu0  ;;  %5794 = vmatprep.subr.bf16.mxu1 %v7528_v17  ;;  %v2737_v25 = vsel %vm2721_vm12, %v2709_v13, %v2729_v18  ;;  %v7580_v13 = vld [vmem:[#allocation14 + $0xa50] ss:$28 sps:$4 sm:$0xff]  }
 0x3b1   :  { %v8333_v33 = vpack.c.bf16 %v2737_v25, %v2737_v25  ;;  %v7588_v15 = vld [vmem:[#allocation14 + $0xa1c] ss:$28 sps:$4 sm:$0xff]   ;;  %v7591_v18 = vld [vmem:[#allocation14 + $0x664] ss:$28 sps:$4 sm:$0xff]   ;;  %v7603_v25 = vld [vmem:[#allocation14 + $0x5f4] ss:$28 sps:$4 sm:$0xff]  }
 0x3b2   :  { %v2738_v26 = vsel %vm2722_vm13, %v2711_v19, %v2730_v24  ;;  %v7583_v17 = vld [vmem:[#allocation14 + $0x698] ss:$28 sps:$4 sm:$0xff]   ;;  %v7594_v19 = vld [vmem:[#allocation14 + $0x9e4] ss:$28 sps:$4 sm:$0xff]   ;;  %v7600_v24 = vld [vmem:[#allocation14 + $0x9ac] ss:$28 sps:$4 sm:$0xff]  }
 0x3b3   :  { %v8331_v29 = vpack.c.bf16 %v2738_v26, %v2738_v26  ;;  %5795 = vmatpush2.bf16.msra.mxu1 %v7526_v5  ;;  %v7586_v16 = vld [vmem:[#allocation14 + $0xa18] ss:$28 sps:$4 sm:$0xff]   ;;  %v7589_v23 = vld [vmem:[#allocation14 + $0x660] ss:$28 sps:$4 sm:$0xff]   ;;  %v7597_v5 = vld [vmem:[#allocation14 + $0x62c] ss:$28 sps:$4 sm:$0xff]  }
 0x3b4   :  { %5846 = vmatprep.subr.bf16.mxu1 %v7534_v22  ;;  %v7592_v20 = vld [vmem:[#allocation14 + $0x9e0] ss:$28 sps:$4 sm:$0xff]   ;;  %v7595_v21 = vld [vmem:[#allocation14 + $0x628] ss:$28 sps:$4 sm:$0xff]   ;;  %v7606_v26 = vld [vmem:[#allocation14 + $0x974] ss:$28 sps:$4 sm:$0xff]  }
 0x3b5   :  { %5755 = vmatprep.mubr.bf16.mxu0 %v8331_v29  ;;  %v7598_v22 = vld [vmem:[#allocation14 + $0x9a8] ss:$28 sps:$4 sm:$0xff]  }
 0x3b6   :  { %5797 = vmatmul.mubr.bf16.vlgmr.msra.gmra.mxu1 %v8299_v36  ;;  %5756 = vmatmul.mubr.bf16.vlgmr.msra.gmra.mxu0 %v8333_v33 }
 0x3b7   :  { %5806 = vmatpush1.bf16.msra.mxu0 %v7529_v32  ;;  %5847 = vmatpush1.bf16.msra.mxu1 %v7532_v11  ;;  %v7601_v32 = vld [vmem:[#allocation14 + $0x5f0] ss:$28 sps:$4 sm:$0xff]  }
 0x3b8   :  { %5878 = vmatprep.mubr.bf16.mxu1 %v8318_v10  ;;  %5837 = vmatprep.mubr.bf16.mxu0 %v8304_v62  ;;  %v7604_v11 = vld [vmem:[#allocation14 + $0x970] ss:$28 sps:$4 sm:$0xff]  }
 0x3b9   :  { %5807 = vmatprep.subr.bf16.mxu0 %v7537_v35  ;;  %5848 = vmatprep.subr.bf16.mxu1 %v7540_v37  ;;  %v7609_v35 = vld [vmem:[#allocation14 + $0x5bc] ss:$28 sps:$4 sm:$0xff]  }
 0x3ba   :  { %v7612_v37 = vld [vmem:[#allocation14 + $0x93c] ss:$28 sps:$4 sm:$0xff]  }
 0x3bb   :  { %5808 = vmatpush1.bf16.msra.mxu0 %v7535_v38  ;;  %5849 = vmatpush1.bf16.msra.mxu1 %v7538_v39  ;;  %v7607_v38 = vld [vmem:[#allocation14 + $0x5b8] ss:$28 sps:$4 sm:$0xff]  }
 0x3bc   :  { %5809 = vmatprep.subr.bf16.mxu0 %v7543_v40  ;;  %5850 = vmatprep.subr.bf16.mxu1 %v7546_v41  ;;  %v7610_v39 = vld [vmem:[#allocation14 + $0x938] ss:$28 sps:$4 sm:$0xff]   ;;  %v7615_v40 = vld [vmem:[#allocation14 + $0x584] ss:$28 sps:$4 sm:$0xff]  }
 0x3bd   :  { %v7618_v41 = vld [vmem:[#allocation14 + $0x904] ss:$28 sps:$4 sm:$0xff]  }
 0x3bf   :  { %5810 = vmatpush1.bf16.msra.mxu0 %v7541_v42  ;;  %5851 = vmatpush1.bf16.msra.mxu1 %v7544_v43 }
 0x3c0   :  { %5811 = vmatprep.subr.bf16.mxu0 %v7549_v44  ;;  %5852 = vmatprep.subr.bf16.mxu1 %v7552_v45  ;;  %v7613_v44 = vld [vmem:[#allocation14 + $0x580] ss:$28 sps:$4 sm:$0xff]  }
 0x3c1   :  { %v7616_v45 = vld [vmem:[#allocation14 + $0x900] ss:$28 sps:$4 sm:$0xff]  }
 0x3c3   :  { %5812 = vmatpush1.bf16.msra.mxu0 %v7547_v46  ;;  %5853 = vmatpush1.bf16.msra.mxu1 %v7550_v47  ;;  %v7621_v46 = vld [vmem:[#allocation14 + $0x54c] ss:$28 sps:$4 sm:$0xff]  }
 0x3c4   :  { %5813 = vmatprep.subr.bf16.mxu0 %v7555_v48  ;;  %5854 = vmatprep.subr.bf16.mxu1 %v7558_v49  ;;  %v7624_v47 = vld [vmem:[#allocation14 + $0x8cc] ss:$28 sps:$4 sm:$0xff]   ;;  %v8340_v49 = vld [vmem:[#allocation16] sm:$0xff] }
 0x3c7   :  { %5814 = vmatpush1.bf16.msra.mxu0 %v7553_v50  ;;  %5855 = vmatpush1.bf16.msra.mxu1 %v7556_v51  ;;  %v7619_v51 = vld [vmem:[#allocation14 + $0x548] ss:$28 sps:$4 sm:$0xff]  }
 0x3c8   :  { %5815 = vmatprep.subr.bf16.mxu0 %v7561_v53  ;;  %5856 = vmatprep.subr.bf16.mxu1 %v7564_v56  ;;  %v7622_v53 = vld [vmem:[#allocation14 + $0x8c8] ss:$28 sps:$4 sm:$0xff]   ;;  %v7627_v56 = vld [vmem:[#allocation14 + $0xc14] ss:$28 sps:$4 sm:$0xff]  }
 0x3cb   :  { %5816 = vmatpush1.bf16.msra.mxu0 %v7559_v57  ;;  %5857 = vmatpush1.bf16.msra.mxu1 %v7562_v60  ;;  %v7630_v57 = vld [vmem:[#allocation14 + $0x19c] ss:$28 sps:$4 sm:$0xff]   ;;  %v3264_v60 = vrot.slane %v8340_v49, %v8241_v30 }
 0x3cc   :  { %5817 = vmatprep.subr.bf16.mxu0 %v7567_v61  ;;  %5858 = vmatprep.subr.bf16.mxu1 %v7570_v63  ;;  %v3268_v61 = vrot.slane %v8340_v49, %v8244_v31  ;;  %v7625_v63 = vld [vmem:[#allocation14 + $0xc10] ss:$28 sps:$4 sm:$0xff]   ;;  %v7631_v30 = vld [vmem:[#allocation14 + $0xbd8] ss:$28 sps:$4 sm:$0xff]  }
 0x3cf   :  { %5818 = vmatpush1.bf16.msra.mxu0 %v7565_v0  ;;  %5859 = vmatpush1.bf16.msra.mxu1 %v7568_v2  ;;  %v7628_v0 = vld [vmem:[#allocation14 + $0x198] ss:$28 sps:$4 sm:$0xff]  }
 0x3d0   :  { %5819 = vmatprep.subr.bf16.mxu0 %v7573_v3  ;;  %5860 = vmatprep.subr.bf16.mxu1 %v7576_v4  ;;  %v7633_v3 = vld [vmem:[#allocation14 + $0xbdc] ss:$28 sps:$4 sm:$0xff]   ;;  %v7636_v4 = vld [vmem:[#allocation14 + $0x164] ss:$28 sps:$4 sm:$0xff]  }
 0x3d3   :  { %5820 = vmatpush1.bf16.msra.mxu0 %v7571_v6  ;;  %5861 = vmatpush1.bf16.msra.mxu1 %v7574_v7 }
 0x3d4   :  { %5821 = vmatprep.subr.bf16.mxu0 %v7579_v8  ;;  %5862 = vmatprep.subr.bf16.mxu1 %v7582_v9  ;;  %v7634_v9 = vld [vmem:[#allocation14 + $0x160] ss:$28 sps:$4 sm:$0xff]  }
 0x3d7   :  { %5822 = vmatpush2.bf16.msra.mxu0 %v7577_v12  ;;  %5863 = vmatpush2.bf16.msra.mxu1 %v7580_v13  ;;  %v7639_v12 = vld [vmem:[#allocation14 + $0xba4] ss:$28 sps:$4 sm:$0xff]  }
 0x3d8   :  { %5823 = vmatprep.subr.bf16.mxu0 %v7585_v14  ;;  %5864 = vmatprep.subr.bf16.mxu1 %v7588_v15  ;;  %v7642_v14 = vld [vmem:[#allocation14 + $0x12c] ss:$28 sps:$4 sm:$0xff]  }
 0x3db   :  { %5824 = vmatpush2.bf16.msra.mxu0 %v7583_v17  ;;  %5865 = vmatpush2.bf16.msra.mxu1 %v7586_v16  ;;  %v7637_v17 = vld [vmem:[#allocation14 + $0xba0] ss:$28 sps:$4 sm:$0xff]  }
 0x3dc   :  { %5825 = vmatprep.subr.bf16.mxu0 %v7591_v18  ;;  %5866 = vmatprep.subr.bf16.mxu1 %v7594_v19  ;;  %v7640_v18 = vld [vmem:[#allocation14 + $0x128] ss:$28 sps:$4 sm:$0xff]  }
 0x3dd   :  { %v7645_v19 = vld [vmem:[#allocation14 + $0xb6c] ss:$28 sps:$4 sm:$0xff]  }
 0x3df   :  { %5826 = vmatpush2.bf16.msra.mxu0 %v7589_v23  ;;  %5867 = vmatpush2.bf16.msra.mxu1 %v7592_v20  ;;  %v7648_v23 = vld [vmem:[#allocation14 + $0xf4] ss:$28 sps:$4 sm:$0xff]   ;;  %v7643_v20 = vld [vmem:[#allocation14 + $0xb68] ss:$28 sps:$4 sm:$0xff]  }
 0x3e0   :  { %5827 = vmatprep.subr.bf16.mxu0 %v7597_v5  ;;  %5868 = vmatprep.subr.bf16.mxu1 %v7600_v24  ;;  %v7646_v5 = vld [vmem:[#allocation14 + $0xf0] ss:$28 sps:$4 sm:$0xff]  }
 0x3e1   :  { %v7651_v24 = vld [vmem:[#allocation14 + $0xb34] ss:$28 sps:$4 sm:$0xff]  }
 0x3e3   :  { %5828 = vmatpush2.bf16.msra.mxu0 %v7595_v21  ;;  %5869 = vmatpush2.bf16.msra.mxu1 %v7598_v22  ;;  %v7654_v21 = vld [vmem:[#allocation14 + $0xbc] ss:$28 sps:$4 sm:$0xff]   ;;  %v7649_v22 = vld [vmem:[#allocation14 + $0xb30] ss:$28 sps:$4 sm:$0xff]  }
 0x3e4   :  { %5829 = vmatprep.subr.bf16.mxu0 %v7603_v25  ;;  %5870 = vmatprep.subr.bf16.mxu1 %v7606_v26  ;;  %v7652_v25 = vld [vmem:[#allocation14 + $0xb8] ss:$28 sps:$4 sm:$0xff]  }
 0x3e5   :  { %v7657_v26 = vld [vmem:[#allocation14 + $0xafc] ss:$28 sps:$4 sm:$0xff]  }
 0x3e7   :  { %5830 = vmatpush2.bf16.msra.mxu0 %v7601_v32  ;;  %5871 = vmatpush2.bf16.msra.mxu1 %v7604_v11  ;;  %v7660_v32 = vld [vmem:[#allocation14 + $0x84] ss:$28 sps:$4 sm:$0xff]   ;;  %v7655_v11 = vld [vmem:[#allocation14 + $0xaf8] ss:$28 sps:$4 sm:$0xff]  }
 0x3e8   :  { %5831 = vmatprep.subr.bf16.mxu0 %v7609_v35  ;;  %5872 = vmatprep.subr.bf16.mxu1 %v7612_v37  ;;  %v7658_v35 = vld [vmem:[#allocation14 + $0x80] ss:$28 sps:$4 sm:$0xff]  }
 0x3e9   :  { %v5634_v42 = vpop.f32.mrf.mxu1  ;;  %v7663_v37 = vld [vmem:[#allocation14 + $0xac4] ss:$28 sps:$4 sm:$0xff]  }
 0x3ea   :  { %v5635_v2 = vadd.f32 %v5634_v42, %v3264_v60  ;;  %v7672_v42 = vld [vmem:[#allocation14 + $0x14] ss:$28 sps:$4 sm:$0xff]   ;;  %v7690_v60 = vld [vmem:[#allocation14 + $0x2ec] ss:$28 sps:$4 sm:$0xff]  }
 0x3eb   :  { %5832 = vmatpush2.bf16.msra.mxu0 %v7607_v38  ;;  %5873 = vmatpush2.bf16.msra.mxu1 %v7610_v39  ;;  %v5636_v43 = vpop.f32.mrf.mxu1  ;;  %v7666_v38 = vld [vmem:[#allocation14 + $0x4c] ss:$28 sps:$4 sm:$0xff]   ;;  %v7661_v39 = vld [vmem:[#allocation14 + $0xac0] ss:$28 sps:$4 sm:$0xff]  }
 0x3ec   :  { %5833 = vmatprep.subr.bf16.mxu0 %v7615_v40  ;;  %5874 = vmatprep.subr.bf16.mxu1 %v7618_v41  ;;  %v5637_v7 = vadd.f32 %v5636_v43, %v3268_v61  ;;  %v7664_v40 = vld [vmem:[#allocation14 + $0x48] ss:$28 sps:$4 sm:$0xff]   ;;  %v7685_v61 = vld [vmem:[#allocation14 + $0xd60] ss:$28 sps:$4 sm:$0xff]  }
 0x3ed   :  { %v5638_v48 = vpop.f32.mrf.mxu1  ;;  %v7669_v41 = vld [vmem:[#allocation14 + $0xa8c] ss:$28 sps:$4 sm:$0xff]  }
 0x3ee   :  { %v7667_v43 = vld [vmem:[#allocation14 + $0xa88] ss:$28 sps:$4 sm:$0xff]   ;;  %v7676_v48 = vld [vmem:[#allocation14 + $0x358] ss:$28 sps:$4 sm:$0xff]  }
 0x3ef   :  { %5834 = vmatpush2.bf16.msra.mxu0 %v7613_v44  ;;  %5875 = vmatpush2.bf16.msra.mxu1 %v7616_v45  ;;  %v5639_v50 = vpop.f32.mrf.mxu1  ;;  %v7670_v44 = vld [vmem:[#allocation14 + $0x10] ss:$28 sps:$4 sm:$0xff]  }
 0x3f0   :  { %5835 = vmatprep.subr.bf16.mxu0 %v7621_v46  ;;  %5876 = vmatprep.subr.bf16.mxu1 %v7624_v47  ;;  %v7675_v45 = vld [vmem:[#allocation14 + $0xdd4] ss:$28 sps:$4 sm:$0xff]   ;;  %v7678_v46 = vld [vmem:[#allocation14 + $0x35c] ss:$28 sps:$4 sm:$0xff]  }
 0x3f1   :  { %v7673_v47 = vld [vmem:[#allocation14 + $0xdd0] ss:$28 sps:$4 sm:$0xff]   ;;  %v7681_v50 = vld [vmem:[#allocation14 + $0xd9c] ss:$28 sps:$4 sm:$0xff]  }
 0x3f3   :  { %5836 = vmatpush2.bf16.msra.mxu0 %v7619_v51  ;;  %5877 = vmatpush2.bf16.msra.mxu1 %v7622_v53  ;;  %v7684_v51 = vld [vmem:[#allocation14 + $0x324] ss:$28 sps:$4 sm:$0xff]   ;;  %v7679_v53 = vld [vmem:[#allocation14 + $0xd98] ss:$28 sps:$4 sm:$0xff]  }
 0x3f4   :  { %5887 = vmatprep.subr.bf16.mxu0 %v7627_v56  ;;  %5928 = vmatprep.subr.bf16.mxu1 %v7630_v57  ;;  %v7682_v56 = vld [vmem:[#allocation14 + $0x320] ss:$28 sps:$4 sm:$0xff]  }
 0x3f5   :  { %v7687_v57 = vld [vmem:[#allocation14 + $0xd64] ss:$28 sps:$4 sm:$0xff]  }
 0x3f6   :  { %5838 = vmatmul.mubr.bf16.vlgmr.msra.gmra.mxu0 %v8306_v1  ;;  %5879 = vmatmul.mubr.bf16.vlgmr.msra.gmra.mxu1 %v8320_v27  ;;  %v5675_v6 = vpop.f32.mrf.mxu0 }
 0x3f7   :  { %v8348_v8 = vadd.f32 %v5675_v6, %v5635_v2  ;;  %5888 = vmatpush1.bf16.msra.mxu0 %v7625_v63  ;;  %5919 = vmatprep.mubr.bf16.mxu0 %v8331_v29  ;;  %v7688_v63 = vld [vmem:[#allocation14 + $0x2e8] ss:$28 sps:$4 sm:$0xff]   ;;  %v7696_v2 = vld [vmem:[#allocation14 + $0x2b4] ss:$28 sps:$4 sm:$0xff]  }
 0x3f8   :  { %5929 = vmatpush1.bf16.msra.mxu1 %v7628_v0  ;;  %5960 = vmatprep.mubr.bf16.mxu1 %v8290_v34  ;;  %v5677_v31 = vpop.f32.mrf.mxu0  ;;  %v7693_v0 = vld [vmem:[#allocation14 + $0xd2c] ss:$28 sps:$4 sm:$0xff]   ;;  %v7699_v6 = vld [vmem:[#allocation14 + $0xcf4] ss:$28 sps:$4 sm:$0xff]  }
 0x3f9   :  { %v8352_v13 = vadd.f32 %v5677_v31, %v5637_v7  ;;  %5889 = vmatprep.subr.bf16.mxu0 %v7633_v3  ;;  %5930 = vmatprep.subr.bf16.mxu1 %v7636_v4  ;;  %v7691_v3 = vld [vmem:[#allocation14 + $0xd28] ss:$28 sps:$4 sm:$0xff]   ;;  %v7694_v4 = vld [vmem:[#allocation14 + $0x2b0] ss:$28 sps:$4 sm:$0xff]   ;;  %v7702_v7 = vld [vmem:[#allocation14 + $0x27c] ss:$28 sps:$4 sm:$0xff]  }
 0x3fa   :  { %v5679_v15 = vpop.f32.mrf.mxu0  ;;  %v7700_v31 = vld [vmem:[#allocation14 + $0x278] ss:$28 sps:$4 sm:$0xff]  }
 0x3fb   :  { %5890 = vmatpush1.bf16.msra.mxu0 %v7631_v30  ;;  %v7697_v30 = vld [vmem:[#allocation14 + $0xcf0] ss:$28 sps:$4 sm:$0xff]   ;;  %v7706_v15 = vld [vmem:[#allocation14 + $0x240] ss:$28 sps:$4 sm:$0xff]  }
 0x3fc   :  { %5931 = vmatpush1.bf16.msra.mxu1 %v7634_v9  ;;  %v5680_v16 = vpop.f32.mrf.mxu0  ;;  %5891 = vmatprep.subr.bf16.mxu0 %v7639_v12  ;;  %v7705_v9 = vld [vmem:[#allocation14 + $0xcbc] ss:$28 sps:$4 sm:$0xff]   ;;  %v7708_v12 = vld [vmem:[#allocation14 + $0x244] ss:$28 sps:$4 sm:$0xff]  }
 0x3fd   :  { %5932 = vmatprep.subr.bf16.mxu1 %v7642_v14  ;;  %v7703_v14 = vld [vmem:[#allocation14 + $0xcb8] ss:$28 sps:$4 sm:$0xff]   ;;  %v7714_v16 = vld [vmem:[#allocation14 + $0x20c] ss:$28 sps:$4 sm:$0xff]  }
 0x3ff   :  { %5892 = vmatpush1.bf16.msra.mxu0 %v7637_v17  ;;  %v7711_v17 = vld [vmem:[#allocation14 + $0xc84] ss:$28 sps:$4 sm:$0xff]  }
 0x400   :  { %5933 = vmatpush1.bf16.msra.mxu1 %v7640_v18  ;;  %5893 = vmatprep.subr.bf16.mxu0 %v7645_v19  ;;  %v7709_v18 = vld [vmem:[#allocation14 + $0xc80] ss:$28 sps:$4 sm:$0xff]   ;;  %v7712_v19 = vld [vmem:[#allocation14 + $0x208] ss:$28 sps:$4 sm:$0xff]  }
 0x401   :  { %5934 = vmatprep.subr.bf16.mxu1 %v7648_v23  ;;  %v7717_v23 = vld [vmem:[#allocation14 + $0xc4c] ss:$28 sps:$4 sm:$0xff]  }
 0x403   :  { %5894 = vmatpush1.bf16.msra.mxu0 %v7643_v20  ;;  %v7720_v20 = vld [vmem:[#allocation14 + $0x1d4] ss:$28 sps:$4 sm:$0xff]  }
 0x404   :  { %5935 = vmatpush1.bf16.msra.mxu1 %v7646_v5  ;;  %5895 = vmatprep.subr.bf16.mxu0 %v7651_v24  ;;  %v7715_v5 = vld [vmem:[#allocation14 + $0xc48] ss:$28 sps:$4 sm:$0xff]   ;;  %v7718_v24 = vld [vmem:[#allocation14 + $0x1d0] ss:$28 sps:$4 sm:$0xff]  }
 0x405   :  { %5936 = vmatprep.subr.bf16.mxu1 %v7654_v21  ;;  %v7723_v21 = vld [vmem:[#allocation14 + $0x51c] ss:$28 sps:$4 sm:$0xff]  }
 0x407   :  { %5896 = vmatpush1.bf16.msra.mxu0 %v7649_v22  ;;  %v7726_v22 = vld [vmem:[#allocation14 + $0x89c] ss:$28 sps:$4 sm:$0xff]  }
 0x408   :  { %5937 = vmatpush1.bf16.msra.mxu1 %v7652_v25  ;;  %5897 = vmatprep.subr.bf16.mxu0 %v7657_v26  ;;  %v7721_v25 = vld [vmem:[#allocation14 + $0x518] ss:$28 sps:$4 sm:$0xff]  }
 0x409   :  { %5938 = vmatprep.subr.bf16.mxu1 %v7660_v32  ;;  %v7724_v26 = vld [vmem:[#allocation14 + $0x898] ss:$28 sps:$4 sm:$0xff]   ;;  %v7729_v32 = vld [vmem:[#allocation14 + $0x4e4] ss:$28 sps:$4 sm:$0xff]  }
 0x40b   :  { %5898 = vmatpush1.bf16.msra.mxu0 %v7655_v11 }
 0x40c   :  { %5939 = vmatpush1.bf16.msra.mxu1 %v7658_v35  ;;  %5899 = vmatprep.subr.bf16.mxu0 %v7663_v37  ;;  %v7732_v35 = vld [vmem:[#allocation14 + $0x864] ss:$28 sps:$4 sm:$0xff]  }
 0x40d   :  { %5940 = vmatprep.subr.bf16.mxu1 %v7666_v38  ;;  %v7727_v37 = vld [vmem:[#allocation14 + $0x4e0] ss:$28 sps:$4 sm:$0xff]  }
 0x40f   :  { %5900 = vmatpush1.bf16.msra.mxu0 %v7661_v39  ;;  %v7730_v39 = vld [vmem:[#allocation14 + $0x860] ss:$28 sps:$4 sm:$0xff]  }
 0x410   :  { %5941 = vmatpush1.bf16.msra.mxu1 %v7664_v40  ;;  %5901 = vmatprep.subr.bf16.mxu0 %v7669_v41  ;;  %v7735_v40 = vld [vmem:[#allocation14 + $0x4ac] ss:$28 sps:$4 sm:$0xff]  }
 0x411   :  { %5942 = vmatprep.subr.bf16.mxu1 %v7672_v42  ;;  %v7738_v41 = vld [vmem:[#allocation14 + $0x82c] ss:$28 sps:$4 sm:$0xff]  }
 0x413   :  { %5902 = vmatpush1.bf16.msra.mxu0 %v7667_v43  ;;  %v7733_v43 = vld [vmem:[#allocation14 + $0x4a8] ss:$28 sps:$4 sm:$0xff]  }
 0x414   :  { %5943 = vmatpush1.bf16.msra.mxu1 %v7670_v44  ;;  %5903 = vmatprep.subr.bf16.mxu0 %v7675_v45  ;;  %v7736_v45 = vld [vmem:[#allocation14 + $0x828] ss:$28 sps:$4 sm:$0xff]  }
 0x415   :  { %5944 = vmatprep.subr.bf16.mxu1 %v7678_v46  ;;  %v7741_v46 = vld [vmem:[#allocation14 + $0x474] ss:$28 sps:$4 sm:$0xff]  }
 0x417   :  { %5904 = vmatpush2.bf16.msra.mxu0 %v7673_v47  ;;  %v7744_v47 = vld [vmem:[#allocation14 + $0x7f4] ss:$28 sps:$4 sm:$0xff]  }
 0x418   :  { %5945 = vmatpush2.bf16.msra.mxu1 %v7676_v48  ;;  %5905 = vmatprep.subr.bf16.mxu0 %v7681_v50  ;;  %v7739_v48 = vld [vmem:[#allocation14 + $0x470] ss:$28 sps:$4 sm:$0xff]  }
 0x419   :  { %5946 = vmatprep.subr.bf16.mxu1 %v7684_v51  ;;  %v7742_v50 = vld [vmem:[#allocation14 + $0x7f0] ss:$28 sps:$4 sm:$0xff]   ;;  %v7747_v51 = vld [vmem:[#allocation14 + $0x43c] ss:$28 sps:$4 sm:$0xff]  }
 0x41b   :  { %5906 = vmatpush2.bf16.msra.mxu0 %v7679_v53  ;;  %v7750_v53 = vld [vmem:[#allocation14 + $0x7bc] ss:$28 sps:$4 sm:$0xff]  }
 0x41c   :  { %5947 = vmatpush2.bf16.msra.mxu1 %v7682_v56  ;;  %5907 = vmatprep.subr.bf16.mxu0 %v7687_v57  ;;  %v7745_v56 = vld [vmem:[#allocation14 + $0x438] ss:$28 sps:$4 sm:$0xff]  }
 0x41d   :  { %5948 = vmatprep.subr.bf16.mxu1 %v7690_v60  ;;  %v7748_v57 = vld [vmem:[#allocation14 + $0x7b8] ss:$28 sps:$4 sm:$0xff]   ;;  %v7753_v60 = vld [vmem:[#allocation14 + $0x404] ss:$28 sps:$4 sm:$0xff]  }
 0x41f   :  { %5908 = vmatpush2.bf16.msra.mxu0 %v7685_v61  ;;  %v7756_v61 = vld [vmem:[#allocation14 + $0x784] ss:$28 sps:$4 sm:$0xff]  }
 0x420   :  { %5949 = vmatpush2.bf16.msra.mxu1 %v7688_v63  ;;  %5909 = vmatprep.subr.bf16.mxu0 %v7693_v0  ;;  %v7751_v63 = vld [vmem:[#allocation14 + $0x400] ss:$28 sps:$4 sm:$0xff]  }
 0x421   :  { %5950 = vmatprep.subr.bf16.mxu1 %v7696_v2  ;;  %v7754_v0 = vld [vmem:[#allocation14 + $0x780] ss:$28 sps:$4 sm:$0xff]   ;;  %v7759_v2 = vld [vmem:[#allocation14 + $0x3cc] ss:$28 sps:$4 sm:$0xff]  }
 0x423   :  { %5910 = vmatpush2.bf16.msra.mxu0 %v7691_v3  ;;  %v7762_v3 = vld [vmem:[#allocation14 + $0x74c] ss:$28 sps:$4 sm:$0xff]  }
 0x424   :  { %5951 = vmatpush2.bf16.msra.mxu1 %v7694_v4  ;;  %5911 = vmatprep.subr.bf16.mxu0 %v7699_v6  ;;  %v7757_v4 = vld [vmem:[#allocation14 + $0x3c8] ss:$28 sps:$4 sm:$0xff]  }
 0x425   :  { %5952 = vmatprep.subr.bf16.mxu1 %v7702_v7  ;;  %v7760_v6 = vld [vmem:[#allocation14 + $0x748] ss:$28 sps:$4 sm:$0xff]   ;;  %v7765_v7 = vld [vmem:[#allocation14 + $0x394] ss:$28 sps:$4 sm:$0xff]  }
 0x427   :  { %5912 = vmatpush2.bf16.msra.mxu0 %v7697_v30  ;;  %v7768_v30 = vld [vmem:[#allocation14 + $0x714] ss:$28 sps:$4 sm:$0xff]  }
 0x428   :  { %5953 = vmatpush2.bf16.msra.mxu1 %v7700_v31  ;;  %5913 = vmatprep.subr.bf16.mxu0 %v7705_v9  ;;  %v7763_v31 = vld [vmem:[#allocation14 + $0x390] ss:$28 sps:$4 sm:$0xff]  }
 0x429   :  { %5954 = vmatprep.subr.bf16.mxu1 %v7708_v12  ;;  %v7766_v9 = vld [vmem:[#allocation14 + $0x710] ss:$28 sps:$4 sm:$0xff]   ;;  %v7771_v12 = vld [vmem:[#allocation14 + $0x6dc] ss:$28 sps:$4 sm:$0xff]  }
 0x42b   :  { %5914 = vmatpush2.bf16.msra.mxu0 %v7703_v14  ;;  %v7774_v14 = vld [vmem:[#allocation14 + $0xa5c] ss:$28 sps:$4 sm:$0xff]  }
 0x42c   :  { %5955 = vmatpush2.bf16.msra.mxu1 %v7706_v15  ;;  %5915 = vmatprep.subr.bf16.mxu0 %v7711_v17  ;;  %v7769_v15 = vld [vmem:[#allocation14 + $0x6d8] ss:$28 sps:$4 sm:$0xff]  }
 0x42d   :  { %5956 = vmatprep.subr.bf16.mxu1 %v7714_v16  ;;  %v7772_v17 = vld [vmem:[#allocation14 + $0xa58] ss:$28 sps:$4 sm:$0xff]   ;;  %v7777_v16 = vld [vmem:[#allocation14 + $0x6a4] ss:$28 sps:$4 sm:$0xff]  }
 0x42f   :  { %5916 = vmatpush2.bf16.msra.mxu0 %v7709_v18  ;;  %v7780_v18 = vld [vmem:[#allocation14 + $0xa24] ss:$28 sps:$4 sm:$0xff]  }
 0x430   :  { %5957 = vmatpush2.bf16.msra.mxu1 %v7712_v19  ;;  %5917 = vmatprep.subr.bf16.mxu0 %v7717_v23  ;;  %v7775_v19 = vld [vmem:[#allocation14 + $0x6a0] ss:$28 sps:$4 sm:$0xff]  }
 0x431   :  { %5958 = vmatprep.subr.bf16.mxu1 %v7720_v20  ;;  %v7778_v23 = vld [vmem:[#allocation14 + $0xa20] ss:$28 sps:$4 sm:$0xff]   ;;  %v7783_v20 = vld [vmem:[#allocation14 + $0x66c] ss:$28 sps:$4 sm:$0xff]  }
 0x433   :  { %5918 = vmatpush2.bf16.msra.mxu0 %v7715_v5  ;;  %v7786_v5 = vld [vmem:[#allocation14 + $0x9ec] ss:$28 sps:$4 sm:$0xff]  }
 0x434   :  { %5959 = vmatpush2.bf16.msra.mxu1 %v7718_v24  ;;  %5969 = vmatprep.subr.bf16.mxu0 %v7723_v21  ;;  %v7781_v24 = vld [vmem:[#allocation14 + $0x668] ss:$28 sps:$4 sm:$0xff]  }
 0x435   :  { %6010 = vmatprep.subr.bf16.mxu1 %v7726_v22  ;;  %v7784_v21 = vld [vmem:[#allocation14 + $0x9e8] ss:$28 sps:$4 sm:$0xff]   ;;  %v7789_v22 = vld [vmem:[#allocation14 + $0x634] ss:$28 sps:$4 sm:$0xff]  }
 0x436   :  { %5920 = vmatmul.mubr.bf16.vlgmr.msra.gmra.mxu0 %v8333_v33  ;;  %v8355_v11 = vpop.f32.mrf.mxu1 }
 0x437   :  { %5961 = vmatmul.mubr.bf16.vlgmr.msra.gmra.mxu1 %v8299_v36  ;;  %5970 = vmatpush1.bf16.msra.mxu0 %v7721_v25  ;;  %v7792_v25 = vld [vmem:[#allocation14 + $0x9b4] ss:$28 sps:$4 sm:$0xff]  }
 0x438   :  { %6001 = vmatprep.mubr.bf16.mxu0 %v8304_v62  ;;  %6011 = vmatpush1.bf16.msra.mxu1 %v7724_v26  ;;  %v8359_v38 = vpop.f32.mrf.mxu1  ;;  %v7787_v26 = vld [vmem:[#allocation14 + $0x630] ss:$28 sps:$4 sm:$0xff]  }
 0x439   :  { %6042 = vmatprep.mubr.bf16.mxu1 %v8318_v10  ;;  %5971 = vmatprep.subr.bf16.mxu0 %v7729_v32  ;;  %v7790_v32 = vld [vmem:[#allocation14 + $0x9b0] ss:$28 sps:$4 sm:$0xff]  }
 0x43a   :  { %6012 = vmatprep.subr.bf16.mxu1 %v7732_v35  ;;  %v5720_v42 = vpop.f32.mrf.mxu1  ;;  %v7795_v35 = vld [vmem:[#allocation14 + $0x5fc] ss:$28 sps:$4 sm:$0xff]  }
 0x43b   :  { %5972 = vmatpush1.bf16.msra.mxu0 %v7727_v37  ;;  %v7798_v37 = vld [vmem:[#allocation14 + $0x97c] ss:$28 sps:$4 sm:$0xff]   ;;  %v7804_v42 = vld [vmem:[#allocation14 + $0x944] ss:$28 sps:$4 sm:$0xff]  }
 0x43c   :  { %6013 = vmatpush1.bf16.msra.mxu1 %v7730_v39  ;;  %v5721_v44 = vpop.f32.mrf.mxu1  ;;  %5973 = vmatprep.subr.bf16.mxu0 %v7735_v40  ;;  %v7793_v39 = vld [vmem:[#allocation14 + $0x5f8] ss:$28 sps:$4 sm:$0xff]  }
 0x43d   :  { %6014 = vmatprep.subr.bf16.mxu1 %v7738_v41  ;;  %v7796_v40 = vld [vmem:[#allocation14 + $0x978] ss:$28 sps:$4 sm:$0xff]   ;;  %v7801_v41 = vld [vmem:[#allocation14 + $0x5c4] ss:$28 sps:$4 sm:$0xff]  }
 0x43e   :  { %v7802_v44 = vld [vmem:[#allocation14 + $0x940] ss:$28 sps:$4 sm:$0xff]  }
 0x43f   :  { %5974 = vmatpush1.bf16.msra.mxu0 %v7733_v43  ;;  %v7799_v43 = vld [vmem:[#allocation14 + $0x5c0] ss:$28 sps:$4 sm:$0xff]  }
 0x440   :  { %6015 = vmatpush1.bf16.msra.mxu1 %v7736_v45  ;;  %5975 = vmatprep.subr.bf16.mxu0 %v7741_v46  ;;  %v7807_v45 = vld [vmem:[#allocation14 + $0x58c] ss:$28 sps:$4 sm:$0xff]  }
 0x441   :  { %6016 = vmatprep.subr.bf16.mxu1 %v7744_v47  ;;  %v7810_v46 = vld [vmem:[#allocation14 + $0x90c] ss:$28 sps:$4 sm:$0xff]  }
 0x442   :  { %v7805_v47 = vld [vmem:[#allocation14 + $0x588] ss:$28 sps:$4 sm:$0xff]  }
 0x443   :  { %5976 = vmatpush1.bf16.msra.mxu0 %v7739_v48  ;;  %v7808_v48 = vld [vmem:[#allocation14 + $0x908] ss:$28 sps:$4 sm:$0xff]  }
 0x444   :  { %6017 = vmatpush1.bf16.msra.mxu1 %v7742_v50  ;;  %5977 = vmatprep.subr.bf16.mxu0 %v7747_v51  ;;  %v7813_v50 = vld [vmem:[#allocation14 + $0x554] ss:$28 sps:$4 sm:$0xff]  }
 0x445   :  { %6018 = vmatprep.subr.bf16.mxu1 %v7750_v53  ;;  %v7816_v51 = vld [vmem:[#allocation14 + $0x8d4] ss:$28 sps:$4 sm:$0xff]  }
 0x446   :  { %v7811_v53 = vld [vmem:[#allocation14 + $0x550] ss:$28 sps:$4 sm:$0xff]  }
 0x447   :  { %5978 = vmatpush1.bf16.msra.mxu0 %v7745_v56  ;;  %v7814_v56 = vld [vmem:[#allocation14 + $0x8d0] ss:$28 sps:$4 sm:$0xff]  }
 0x448   :  { %6019 = vmatpush1.bf16.msra.mxu1 %v7748_v57  ;;  %5979 = vmatprep.subr.bf16.mxu0 %v7753_v60  ;;  %v7819_v57 = vld [vmem:[#allocation14 + $0xc1c] ss:$28 sps:$4 sm:$0xff]  }
 0x449   :  { %6020 = vmatprep.subr.bf16.mxu1 %v7756_v61  ;;  %v7820_v60 = vld [vmem:[#allocation14 + $0x360] ss:$28 sps:$4 sm:$0xff]   ;;  %v7817_v61 = vld [vmem:[#allocation14 + $0xc18] ss:$28 sps:$4 sm:$0xff]  }
 0x44b   :  { %5980 = vmatpush1.bf16.msra.mxu0 %v7751_v63  ;;  %v7821_v63 = vld [vmem:[#allocation14 + $0x1a0] ss:$28 sps:$4 sm:$0xff]  }
 0x44c   :  { %6021 = vmatpush1.bf16.msra.mxu1 %v7754_v0  ;;  %5981 = vmatprep.subr.bf16.mxu0 %v7759_v2  ;;  %v5717_v0 = vadd.f32 %v8355_v11, %v8348_v8  ;;  %v7824_v2 = vld [vmem:[#allocation14 + $0xbe4] ss:$28 sps:$4 sm:$0xff]  }
 0x44d   :  { %6022 = vmatprep.subr.bf16.mxu1 %v7762_v3 }
 0x44f   :  { %5982 = vmatpush1.bf16.msra.mxu0 %v7757_v4 }
 0x450   :  { %6023 = vmatpush1.bf16.msra.mxu1 %v7760_v6  ;;  %5983 = vmatprep.subr.bf16.mxu0 %v7765_v7  ;;  %v7825_v6 = vld [vmem:[#allocation14 + $0x328] ss:$28 sps:$4 sm:$0xff]   ;;  %v5719_v7 = vadd.f32 %v8359_v38, %v8352_v13 }
 0x451   :  { %6024 = vmatprep.subr.bf16.mxu1 %v7768_v30 }
 0x453   :  { %5984 = vmatpush1.bf16.msra.mxu0 %v7763_v31  ;;  %v7822_v31 = vld [vmem:[#allocation14 + $0xbe0] ss:$28 sps:$4 sm:$0xff]  }
 0x454   :  { %6025 = vmatpush1.bf16.msra.mxu1 %v7766_v9  ;;  %5985 = vmatprep.subr.bf16.mxu0 %v7771_v12  ;;  %v7826_v9 = vld [vmem:[#allocation14 + $0x168] ss:$28 sps:$4 sm:$0xff]  }
 0x455   :  { %6026 = vmatprep.subr.bf16.mxu1 %v7774_v14  ;;  %v7829_v12 = vld [vmem:[#allocation14 + $0xbac] ss:$28 sps:$4 sm:$0xff]  }
 0x457   :  { %5986 = vmatpush2.bf16.msra.mxu0 %v7769_v15  ;;  %v7830_v15 = vld [vmem:[#allocation14 + $0x2f0] ss:$28 sps:$4 sm:$0xff]  }
 0x458   :  { %6027 = vmatpush2.bf16.msra.mxu1 %v7772_v17  ;;  %5987 = vmatprep.subr.bf16.mxu0 %v7777_v16  ;;  %v7827_v17 = vld [vmem:[#allocation14 + $0xba8] ss:$28 sps:$4 sm:$0xff]  }
 0x459   :  { %6028 = vmatprep.subr.bf16.mxu1 %v7780_v18 }
 0x45b   :  { %5988 = vmatpush2.bf16.msra.mxu0 %v7775_v19  ;;  %v7831_v19 = vld [vmem:[#allocation14 + $0x130] ss:$28 sps:$4 sm:$0xff]  }
 0x45c   :  { %6029 = vmatpush2.bf16.msra.mxu1 %v7778_v23  ;;  %5989 = vmatprep.subr.bf16.mxu0 %v7783_v20  ;;  %v7834_v23 = vld [vmem:[#allocation14 + $0xb74] ss:$28 sps:$4 sm:$0xff]  }
 0x45d   :  { %6030 = vmatprep.subr.bf16.mxu1 %v7786_v5  ;;  %v7835_v20 = vld [vmem:[#allocation14 + $0x2b8] ss:$28 sps:$4 sm:$0xff]   ;;  %v7832_v5 = vld [vmem:[#allocation14 + $0xb70] ss:$28 sps:$4 sm:$0xff]  }
 0x45f   :  { %5990 = vmatpush2.bf16.msra.mxu0 %v7781_v24  ;;  %v7839_v24 = vld [vmem:[#allocation14 + $0xb3c] ss:$28 sps:$4 sm:$0xff]  }
 0x460   :  { %6031 = vmatpush2.bf16.msra.mxu1 %v7784_v21  ;;  %5991 = vmatprep.subr.bf16.mxu0 %v7789_v22  ;;  %v7840_v21 = vld [vmem:[#allocation14 + $0x280] ss:$28 sps:$4 sm:$0xff]   ;;  %v7837_v22 = vld [vmem:[#allocation14 + $0xb38] ss:$28 sps:$4 sm:$0xff]  }
 0x461   :  { %6032 = vmatprep.subr.bf16.mxu1 %v7792_v25  ;;  %v7841_v25 = vld [vmem:[#allocation14 + $0xc0] ss:$28 sps:$4 sm:$0xff]  }
 0x463   :  { %5992 = vmatpush2.bf16.msra.mxu0 %v7787_v26  ;;  %v7844_v26 = vld [vmem:[#allocation14 + $0xb04] ss:$28 sps:$4 sm:$0xff]  }
 0x464   :  { %6033 = vmatpush2.bf16.msra.mxu1 %v7790_v32  ;;  %5993 = vmatprep.subr.bf16.mxu0 %v7795_v35  ;;  %v7845_v32 = vld [vmem:[#allocation14 + $0x248] ss:$28 sps:$4 sm:$0xff]   ;;  %v7842_v35 = vld [vmem:[#allocation14 + $0xb00] ss:$28 sps:$4 sm:$0xff]  }
 0x465   :  { %6034 = vmatprep.subr.bf16.mxu1 %v7798_v37  ;;  %v7846_v37 = vld [vmem:[#allocation14 + $0x88] ss:$28 sps:$4 sm:$0xff]  }
 0x467   :  { %5994 = vmatpush2.bf16.msra.mxu0 %v7793_v39  ;;  %v7849_v39 = vld [vmem:[#allocation14 + $0xacc] ss:$28 sps:$4 sm:$0xff]  }
 0x468   :  { %6035 = vmatpush2.bf16.msra.mxu1 %v7796_v40  ;;  %5995 = vmatprep.subr.bf16.mxu0 %v7801_v41  ;;  %v7850_v40 = vld [vmem:[#allocation14 + $0x210] ss:$28 sps:$4 sm:$0xff]   ;;  %v7847_v41 = vld [vmem:[#allocation14 + $0xac8] ss:$28 sps:$4 sm:$0xff]  }
 0x469   :  { %6036 = vmatprep.subr.bf16.mxu1 %v7804_v42  ;;  %v7851_v42 = vld [vmem:[#allocation14 + $0x50] ss:$28 sps:$4 sm:$0xff]  }
 0x46b   :  { %5996 = vmatpush2.bf16.msra.mxu0 %v7799_v43  ;;  %v7854_v43 = vld [vmem:[#allocation14 + $0xa94] ss:$28 sps:$4 sm:$0xff]  }
 0x46c   :  { %6037 = vmatpush2.bf16.msra.mxu1 %v7802_v44  ;;  %5997 = vmatprep.subr.bf16.mxu0 %v7807_v45  ;;  %v7855_v44 = vld [vmem:[#allocation14 + $0x1d8] ss:$28 sps:$4 sm:$0xff]   ;;  %v7852_v45 = vld [vmem:[#allocation14 + $0xa90] ss:$28 sps:$4 sm:$0xff]  }
 0x46d   :  { %6038 = vmatprep.subr.bf16.mxu1 %v7810_v46  ;;  %v7856_v46 = vld [vmem:[#allocation14 + $0x18] ss:$28 sps:$4 sm:$0xff]  }
 0x46f   :  { %5998 = vmatpush2.bf16.msra.mxu0 %v7805_v47  ;;  %v7859_v47 = vld [vmem:[#allocation14 + $0xddc] ss:$28 sps:$4 sm:$0xff]  }
 0x470   :  { %6039 = vmatpush2.bf16.msra.mxu1 %v7808_v48  ;;  %5999 = vmatprep.subr.bf16.mxu0 %v7813_v50  ;;  %v7860_v48 = vld [vmem:[#allocation14 + $0xa60] ss:$28 sps:$4 sm:$0xff]   ;;  %v7857_v50 = vld [vmem:[#allocation14 + $0xdd8] ss:$28 sps:$4 sm:$0xff]  }
 0x471   :  { %6040 = vmatprep.subr.bf16.mxu1 %v7816_v51  ;;  %v7861_v51 = vld [vmem:[#allocation14 + $0x8a0] ss:$28 sps:$4 sm:$0xff]  }
 0x473   :  { %6000 = vmatpush2.bf16.msra.mxu0 %v7811_v53  ;;  %v7864_v53 = vld [vmem:[#allocation14 + $0xda4] ss:$28 sps:$4 sm:$0xff]  }
 0x474   :  { %6041 = vmatpush2.bf16.msra.mxu1 %v7814_v56  ;;  %6051 = vmatprep.subr.bf16.mxu0 %v7819_v57  ;;  %v7865_v56 = vld [vmem:[#allocation14 + $0xa28] ss:$28 sps:$4 sm:$0xff]   ;;  %v7862_v57 = vld [vmem:[#allocation14 + $0xda0] ss:$28 sps:$4 sm:$0xff]  }
 0x475   :  { %7062 = vmatprep.subr.bf16.mxu1 %v7820_v60  ;;  %v7866_v60 = vld [vmem:[#allocation14 + $0x868] ss:$28 sps:$4 sm:$0xff]  }
 0x476   :  { %v8364_v3 = vpop.f32.mrf.mxu1  ;;  %6002 = vmatmul.mubr.bf16.vlgmr.msra.gmra.mxu0 %v8306_v1  ;;  %v5757_v4 = vpop.f32.mrf.mxu0 }
 0x477   :  { %6043 = vmatmul.mubr.bf16.vlgmr.msra.gmra.mxu1 %v8320_v27  ;;  %v5758_v30 = vadd.f32 %v5757_v4, %v5717_v0  ;;  %6052 = vmatpush1.bf16.msra.mxu0 %v7817_v61  ;;  %v7869_v61 = vld [vmem:[#allocation14 + $0xd6c] ss:$28 sps:$4 sm:$0xff]   ;;  %v7874_v4 = vld [vmem:[#allocation14 + $0xd34] ss:$28 sps:$4 sm:$0xff]  }
 0x478   :  { %6083 = vmatprep.mubr.bf16.mxu0 %v8331_v29  ;;  %7063 = vmatpush3.bf16.msra.mxu1 %v7821_v63  ;;  %v8371_v8 = vpop.f32.mrf.mxu1  ;;  %v5759_v11 = vpop.f32.mrf.mxu0  ;;  %v7870_v63 = vld [vmem:[#allocation14 + $0x9f0] ss:$28 sps:$4 sm:$0xff]   ;;  %v7867_v0 = vld [vmem:[#allocation14 + $0xd68] ss:$28 sps:$4 sm:$0xff]  }
 0x479   :  { %6252 = vst [vmem:[#allocation17] sm:$0xff] %v5758_v30  ;;  %6124 = vmatprep.mubr.bf16.mxu1 %v8290_v34  ;;  %v5760_v14 = vadd.f32 %v5759_v11, %v5719_v7  ;;  %6053 = vmatprep.subr.bf16.mxu0 %v7824_v2  ;;  %v7836_v34 = vld [vmem:[#allocation14 + $0xf8] ss:$28 sps:$4 sm:$0xff]   ;;  %v7871_v2 = vld [vmem:[#allocation14 + $0x830] ss:$28 sps:$4 sm:$0xff]  }
 0x47a   :  { %v5802_v13 = vpop.f32.mrf.mxu1  ;;  %7064 = vmatprep.subr.bf16.mxu1 %v7825_v6  ;;  %v5761_v38 = vpop.f32.mrf.mxu0  ;;  %v7875_v6 = vld [vmem:[#allocation14 + $0x9b8] ss:$28 sps:$4 sm:$0xff]   ;;  %v7881_v11 = vld [vmem:[#allocation14 + $0x7c0] ss:$28 sps:$4 sm:$0xff]  }
 0x47b   :  { %6253 = vst [vmem:[#allocation17 + $0x8] sm:$0xff] %v5760_v14  ;;  %6054 = vmatpush1.bf16.msra.mxu0 %v7822_v31  ;;  %v7876_v7 = vld [vmem:[#allocation14 + $0x7f8] ss:$28 sps:$4 sm:$0xff]   ;;  %v7882_v14 = vld [vmem:[#allocation14 + $0xcc0] ss:$28 sps:$4 sm:$0xff]  }
 0x47c   :  { %7065 = vmatpush3.bf16.msra.mxu1 %v7826_v9  ;;  %v5803_v16 = vpop.f32.mrf.mxu1  ;;  %v5762_v18 = vpop.f32.mrf.mxu0  ;;  %6055 = vmatprep.subr.bf16.mxu0 %v7829_v12  ;;  %v7879_v30 = vld [vmem:[#allocation14 + $0xcfc] ss:$28 sps:$4 sm:$0xff]   ;;  %v7884_v9 = vld [vmem:[#allocation14 + $0xcc4] ss:$28 sps:$4 sm:$0xff]   ;;  %v7889_v13 = vld [vmem:[#allocation14 + $0xc8c] ss:$28 sps:$4 sm:$0xff]  }
 0x47d   :  { %7066 = vmatprep.subr.bf16.mxu1 %v7830_v15  ;;  %v7877_v31 = vld [vmem:[#allocation14 + $0xcf8] ss:$28 sps:$4 sm:$0xff]   ;;  %v7885_v12 = vld [vmem:[#allocation14 + $0x948] ss:$28 sps:$4 sm:$0xff]   ;;  %v7890_v38 = vld [vmem:[#allocation14 + $0x910] ss:$28 sps:$4 sm:$0xff]  }
 0x47e   :  { %v7886_v15 = vld [vmem:[#allocation14 + $0x788] ss:$28 sps:$4 sm:$0xff]   ;;  %v7891_v16 = vld [vmem:[#allocation14 + $0x750] ss:$28 sps:$4 sm:$0xff]  }
 0x47f   :  { %6056 = vmatpush1.bf16.msra.mxu0 %v7827_v17  ;;  %v7887_v17 = vld [vmem:[#allocation14 + $0xc88] ss:$28 sps:$4 sm:$0xff]   ;;  %v7894_v18 = vld [vmem:[#allocation14 + $0xc54] ss:$28 sps:$4 sm:$0xff]  }
 0x480   :  { %7067 = vmatpush3.bf16.msra.mxu1 %v7831_v19  ;;  %6057 = vmatprep.subr.bf16.mxu0 %v7834_v23  ;;  %v7895_v19 = vld [vmem:[#allocation14 + $0x8d8] ss:$28 sps:$4 sm:$0xff]   ;;  %v7892_v23 = vld [vmem:[#allocation14 + $0xc50] ss:$28 sps:$4 sm:$0xff]  }
 0x481   :  { %7068 = vmatprep.subr.bf16.mxu1 %v7835_v20  ;;  %v7896_v20 = vld [vmem:[#allocation14 + $0x718] ss:$28 sps:$4 sm:$0xff]  }
 0x483   :  { %6058 = vmatpush1.bf16.msra.mxu0 %v7832_v5  ;;  %v7897_v5 = vld [vmem:[#allocation14 + $0x6e0] ss:$28 sps:$4 sm:$0xff]  }
 0x484   :  { %7069 = vmatpush3.bf16.msra.mxu1 %v7836_v34  ;;  %6059 = vmatprep.subr.bf16.mxu0 %v7839_v24  ;;  %v7898_v34 = vld [vmem:[#allocation14 + $0x520] ss:$28 sps:$4 sm:$0xff]   ;;  %v7899_v24 = vld [vmem:[#allocation14 + $0x6a8] ss:$28 sps:$4 sm:$0xff]  }
 0x485   :  { %7070 = vmatprep.subr.bf16.mxu1 %v7840_v21 }
 0x487   :  { %6060 = vmatpush1.bf16.msra.mxu0 %v7837_v22 }
 0x488   :  { %7071 = vmatpush3.bf16.msra.mxu1 %v7841_v25  ;;  %6061 = vmatprep.subr.bf16.mxu0 %v7844_v26  ;;  %v7900_v25 = vld [vmem:[#allocation14 + $0x4e8] ss:$28 sps:$4 sm:$0xff]  }
 0x489   :  { %7072 = vmatprep.subr.bf16.mxu1 %v7845_v32 }
 0x48b   :  { %6062 = vmatpush1.bf16.msra.mxu0 %v7842_v35  ;;  %v7901_v35 = vld [vmem:[#allocation14 + $0x670] ss:$28 sps:$4 sm:$0xff]  }
 0x48c   :  { %7073 = vmatpush3.bf16.msra.mxu1 %v7846_v37  ;;  %6063 = vmatprep.subr.bf16.mxu0 %v7849_v39 }
 0x48d   :  { %7074 = vmatprep.subr.bf16.mxu1 %v7850_v40  ;;  %v7902_v40 = vld [vmem:[#allocation14 + $0x4b0] ss:$28 sps:$4 sm:$0xff]  }
 0x48f   :  { %6064 = vmatpush1.bf16.msra.mxu0 %v7847_v41 }
 0x490   :  { %7075 = vmatpush3.bf16.msra.mxu1 %v7851_v42  ;;  %6065 = vmatprep.subr.bf16.mxu0 %v7854_v43  ;;  %v7903_v43 = vld [vmem:[#allocation14 + $0x638] ss:$28 sps:$4 sm:$0xff]  }
 0x491   :  { %7076 = vmatprep.subr.bf16.mxu1 %v7855_v44  ;;  %v7905_v44 = vld [vmem:[#allocation14 + $0x600] ss:$28 sps:$4 sm:$0xff]  }
 0x493   :  { %6066 = vmatpush1.bf16.msra.mxu0 %v7852_v45  ;;  %v7907_v45 = vld [vmem:[#allocation14 + $0x5c8] ss:$28 sps:$4 sm:$0xff]  }
 0x494   :  { %7077 = vmatpush3.bf16.msra.mxu1 %v7856_v46  ;;  %6067 = vmatprep.subr.bf16.mxu0 %v7859_v47  ;;  %v7908_v46 = vld [vmem:[#allocation14 + $0x408] ss:$28 sps:$4 sm:$0xff]   ;;  %v7909_v47 = vld [vmem:[#allocation14 + $0x590] ss:$28 sps:$4 sm:$0xff]  }
 0x495   :  { %7106 = vmatprep.subr.bf16.mxu1 %v7860_v48  ;;  %v7910_v48 = vld [vmem:[#allocation14 + $0x3d0] ss:$28 sps:$4 sm:$0xff]  }
 0x497   :  { %6125 = vmatmul.mubr.bf16.vlgmr.msra.gmra.mxu1 %v8299_v36  ;;  %6068 = vmatpush2.bf16.msra.mxu0 %v7857_v50  ;;  %v7872_v36 = vld [vmem:[#allocation14 + $0xd30] ss:$28 sps:$4 sm:$0xff]   ;;  %v7911_v50 = vld [vmem:[#allocation14 + $0x558] ss:$28 sps:$4 sm:$0xff]  }
 0x498   :  { %7107 = vmatpush3.bf16.msra.mxu1 %v7861_v51  ;;  %6204 = vmatprep.mubr.bf16.mxu1 %v8318_v10  ;;  %v7880_v10 = vld [vmem:[#allocation14 + $0x980] ss:$28 sps:$4 sm:$0xff]   ;;  %v7912_v51 = vld [vmem:[#allocation14 + $0x398] ss:$28 sps:$4 sm:$0xff]  }
 0x499   :  { %6069 = vmatprep.subr.bf16.mxu0 %v7864_v53  ;;  %7108 = vmatprep.subr.bf16.mxu1 %v7865_v56  ;;  %v7913_v53 = vld [vmem:[#allocation14 + $0xde0] ss:$28 sps:$4 sm:$0xff]  }
 0x49a   :  { %v7914_v56 = vld [vmem:[#allocation14 + $0xc20] ss:$28 sps:$4 sm:$0xff]  }
 0x49b   :  { %6070 = vmatpush2.bf16.msra.mxu0 %v7862_v57  ;;  %v7915_v57 = vld [vmem:[#allocation14 + $0xda8] ss:$28 sps:$4 sm:$0xff]  }
 0x49c   :  { %7109 = vmatpush3.bf16.msra.mxu1 %v7866_v60  ;;  %6071 = vmatprep.subr.bf16.mxu0 %v7869_v61  ;;  %v7916_v60 = vld [vmem:[#allocation14 + $0xbe8] ss:$28 sps:$4 sm:$0xff]   ;;  %v7917_v61 = vld [vmem:[#allocation14 + $0xd70] ss:$28 sps:$4 sm:$0xff]  }
 0x49d   :  { %7110 = vmatprep.subr.bf16.mxu1 %v7870_v63  ;;  %v7918_v63 = vld [vmem:[#allocation14 + $0xbb0] ss:$28 sps:$4 sm:$0xff]  }
 0x49f   :  { %6072 = vmatpush2.bf16.msra.mxu0 %v7867_v0  ;;  %v7919_v0 = vld [vmem:[#allocation14 + $0xd38] ss:$28 sps:$4 sm:$0xff]  }
 0x4a0   :  { %7111 = vmatpush3.bf16.msra.mxu1 %v7871_v2  ;;  %6073 = vmatprep.subr.bf16.mxu0 %v7874_v4  ;;  %v7920_v2 = vld [vmem:[#allocation14 + $0xb78] ss:$28 sps:$4 sm:$0xff]   ;;  %v7921_v4 = vld [vmem:[#allocation14 + $0xd00] ss:$28 sps:$4 sm:$0xff]  }
 0x4a1   :  { %7112 = vmatprep.subr.bf16.mxu1 %v7875_v6  ;;  %v7922_v6 = vld [vmem:[#allocation14 + $0xb40] ss:$28 sps:$4 sm:$0xff]  }
 0x4a3   :  { %6074 = vmatpush2.bf16.msra.mxu0 %v7872_v36  ;;  %v7923_v36 = vld [vmem:[#allocation14 + $0xcc8] ss:$28 sps:$4 sm:$0xff]  }
 0x4a4   :  { %7113 = vmatpush3.bf16.msra.mxu1 %v7876_v7  ;;  %6075 = vmatprep.subr.bf16.mxu0 %v7879_v30  ;;  %v7925_v7 = vld [vmem:[#allocation14 + $0xc90] ss:$28 sps:$4 sm:$0xff]  }
 0x4a5   :  { %7114 = vmatprep.subr.bf16.mxu1 %v7880_v10  ;;  %v7926_v30 = vld [vmem:[#allocation14 + $0xad0] ss:$28 sps:$4 sm:$0xff]   ;;  %v7927_v10 = vld [vmem:[#allocation14 + $0xc58] ss:$28 sps:$4 sm:$0xff]  }
 0x4a7   :  { %6076 = vmatpush2.bf16.msra.mxu0 %v7877_v31  ;;  %v3276_v31 = vrot.slane %v8340_v49, %v8252_v54 }
 0x4a8   :  { %7115 = vmatpush3.bf16.msra.mxu1 %v7881_v11  ;;  %6077 = vmatprep.subr.bf16.mxu0 %v7884_v9  ;;  %v7928_v9 = vld [vmem:[#allocation14 + $0xa98] ss:$28 sps:$4 sm:$0xff]  }
 0x4a9   :  { %7116 = vmatprep.subr.bf16.mxu1 %v7885_v12  ;;  %v5801_v12 = vadd.f32 %v8371_v8, %v3276_v31 }
 0x4ab   :  { %6078 = vmatpush2.bf16.msra.mxu0 %v7882_v14 }
 0x4ac   :  { %7117 = vmatpush3.bf16.msra.mxu1 %v7886_v15  ;;  %6079 = vmatprep.subr.bf16.mxu0 %v7889_v13 }
 0x4ad   :  { %7118 = vmatprep.subr.bf16.mxu1 %v7890_v38 }
 0x4af   :  { %6080 = vmatpush2.bf16.msra.mxu0 %v7887_v17 }
 0x4b0   :  { %7119 = vmatpush3.bf16.msra.mxu1 %v7891_v16  ;;  %6081 = vmatprep.subr.bf16.mxu0 %v7894_v18 }
 0x4b1   :  { %7120 = vmatprep.subr.bf16.mxu1 %v7895_v19 }
 0x4b3   :  { %6082 = vmatpush2.bf16.msra.mxu0 %v7892_v23 }
 0x4b4   :  { %7121 = vmatpush3.bf16.msra.mxu1 %v7896_v20  ;;  %7084 = vmatprep.subr.bf16.mxu0 %v7897_v5 }
 0x4b6   :  { %v8376_v21 = vpop.f32.mrf.mxu0  ;;  %v8378_v22 = vpop.f32.mrf.mxu1  ;;  %6084 = vmatmul.mubr.bf16.vlgmr.msra.gmra.mxu0 %v8333_v33 }
 0x4b7   :  { %6205 = vmatmul.mubr.bf16.vlgmr.msra.gmra.mxu1 %v8320_v27  ;;  %7085 = vmatpush3.bf16.msra.mxu0 %v7898_v34  ;;  %v7904_v27 = vld [vmem:[#allocation14 + $0x478] ss:$28 sps:$4 sm:$0xff]  }
 0x4b8   :  { %6164 = vmatprep.mubr.bf16.mxu0 %v8304_v62  ;;  %v8383_v26 = vpop.f32.mrf.mxu0  ;;  %v8385_v32 = vpop.f32.mrf.mxu1  ;;  %7086 = vmatprep.subr.bf16.mxu0 %v7899_v24  ;;  %v7906_v62 = vld [vmem:[#allocation14 + $0x440] ss:$28 sps:$4 sm:$0xff]  }
 0x4b9   :  { %v5842_v15 = vadd.f32 %v8383_v26, %v5801_v12 }
 0x4ba   :  { %v5843_v37 = vpop.f32.mrf.mxu0  ;;  %v5884_v39 = vpop.f32.mrf.mxu1 }
 0x4bb   :  { %7087 = vmatpush3.bf16.msra.mxu0 %v7900_v25  ;;  %v5883_v38 = vadd.f32 %v8385_v32, %v5842_v15 }
 0x4bc   :  { %v5844_v41 = vpop.f32.mrf.mxu0  ;;  %v5885_v42 = vpop.f32.mrf.mxu1  ;;  %7088 = vmatprep.subr.bf16.mxu0 %v7901_v35 }
 0x4bf   :  { %7089 = vmatpush3.bf16.msra.mxu0 %v7902_v40  ;;  %v7929_v40 = vld [vmem:[#allocation16] sm:$0xff] }
 0x4c0   :  { %7090 = vmatprep.subr.bf16.mxu0 %v7903_v43  ;;  %v3280_v41 = vrot.slane %v7929_v40, %v1085_v55  ;;  %v3284_v42 = vrot.slane %v7929_v40, %v1089_v59 }
 0x4c3   :  { %7091 = vmatpush3.bf16.msra.mxu0 %v7904_v27 }
 0x4c4   :  { %7092 = vmatprep.subr.bf16.mxu0 %v7905_v44 }
 0x4c7   :  { %7093 = vmatpush3.bf16.msra.mxu0 %v7906_v62 }
 0x4c8   :  { %7094 = vmatprep.subr.bf16.mxu0 %v7907_v45 }
 0x4cb   :  { %7095 = vmatpush3.bf16.msra.mxu0 %v7908_v46 }
 0x4cc   :  { %7096 = vmatprep.subr.bf16.mxu0 %v7909_v47 }
 0x4cf   :  { %7097 = vmatpush3.bf16.msra.mxu0 %v7910_v48 }
 0x4d0   :  { %7098 = vmatprep.subr.bf16.mxu0 %v7911_v50 }
 0x4d3   :  { %7099 = vmatpush3.bf16.msra.mxu0 %v7912_v51 }
 0x4d4   :  { %7128 = vmatprep.subr.bf16.mxu0 %v7913_v53 }
 0x4d6   :  { %6165 = vmatmul.mubr.bf16.vlgmr.msra.gmra.mxu0 %v8306_v1  ;;  %v7924_v1 = vld [vmem:[#allocation14 + $0xb08] ss:$28 sps:$4 sm:$0xff]  }
 0x4d7   :  { %7129 = vmatpush3.bf16.msra.mxu0 %v7914_v56  ;;  %6244 = vmatprep.mubr.bf16.mxu0 %v8331_v29  ;;  %v3272_v29 = vrot.slane %v8340_v49, %v8249_v52 }
 0x4d8   :  { %7130 = vmatprep.subr.bf16.mxu0 %v7915_v57 }
 0x4d9   :  { %v5799_v11 = vadd.f32 %v8364_v3, %v3272_v29 }
 0x4db   :  { %7131 = vmatpush3.bf16.msra.mxu0 %v7916_v60  ;;  %v5840_v14 = vadd.f32 %v8376_v21, %v5799_v11 }
 0x4dc   :  { %7132 = vmatprep.subr.bf16.mxu0 %v7917_v61 }
 0x4dd   :  { %v5881_v52 = vadd.f32 %v8378_v22, %v5840_v14 }
 0x4df   :  { %7133 = vmatpush3.bf16.msra.mxu0 %v7918_v63 }
 0x4e0   :  { %7134 = vmatprep.subr.bf16.mxu0 %v7919_v0 }
 0x4e3   :  { %7135 = vmatpush3.bf16.msra.mxu0 %v7920_v2 }
 0x4e4   :  { %7136 = vmatprep.subr.bf16.mxu0 %v7921_v4  ;;  %v3288_v4 = vrot.slane %v7929_v40, %v1093_v58 }
 0x4e7   :  { %7137 = vmatpush3.bf16.msra.mxu0 %v7922_v6 }
 0x4e8   :  { %7138 = vmatprep.subr.bf16.mxu0 %v7923_v36 }
 0x4eb   :  { %7139 = vmatpush3.bf16.msra.mxu0 %v7924_v1 }
 0x4ec   :  { %7140 = vmatprep.subr.bf16.mxu0 %v7925_v7 }
 0x4ef   :  { %7141 = vmatpush3.bf16.msra.mxu0 %v7926_v30 }
 0x4f0   :  { %7142 = vmatprep.subr.bf16.mxu0 %v7927_v10 }
 0x4f3   :  { %7143 = vmatpush3.bf16.msra.mxu0 %v7928_v9 }
 0x4f6   :  { %v5921_v13 = vpop.f32.mrf.mxu0  ;;  %6245 = vmatmul.mubr.bf16.vlgmr.msra.gmra.mxu0 %v8333_v33 }
 0x4f7   :  { %v5922_v54 = vadd.f32 %v5921_v13, %v5881_v52  ;;  %v5962_v49 = vpop.f32.mrf.mxu1 }
 0x4f8   :  { %v5923_v3 = vpop.f32.mrf.mxu0  ;;  %v5963_v43 = vadd.f32 %v5962_v49, %v3280_v41 }
 0x4f9   :  { %6254 = vst [vmem:[#allocation17 + $0x10] sm:$0xff] %v5922_v54  ;;  %v5924_v17 = vadd.f32 %v5923_v3, %v5883_v38  ;;  %v5964_v16 = vpop.f32.mrf.mxu1 }
 0x4fa   :  { %v5925_v18 = vpop.f32.mrf.mxu0  ;;  %v5965_v27 = vadd.f32 %v5964_v16, %v3284_v42 }
 0x4fb   :  { %6255 = vst [vmem:[#allocation17 + $0x18] sm:$0xff] %v5924_v17  ;;  %v5966_v8 = vpop.f32.mrf.mxu1 }
 0x4fc   :  { %v5926_v19 = vpop.f32.mrf.mxu0 }
 0x4fd   :  { %v5967_v23 = vpop.f32.mrf.mxu1 }
 0x536   :  { %v6003_v20 = vpop.f32.mrf.mxu0 }
 0x537   :  { %v6044_v5 = vpop.f32.mrf.mxu1  ;;  %v6004_v44 = vadd.f32 %v6003_v20, %v5963_v43 }
 0x538   :  { %v6005_v34 = vpop.f32.mrf.mxu0 }
 0x539   :  { %v6046_v24 = vpop.f32.mrf.mxu1  ;;  %v6006_v62 = vadd.f32 %v6005_v34, %v5965_v27  ;;  %v6045_v45 = vadd.f32 %v6044_v5, %v6004_v44 }
 0x53a   :  { %v6007_v21 = vpop.f32.mrf.mxu0 }
 0x53b   :  { %v6048_v22 = vpop.f32.mrf.mxu1  ;;  %v6047_v47 = vadd.f32 %v6046_v24, %v6006_v62 }
 0x53c   :  { %v6008_v33 = vpop.f32.mrf.mxu0 }
 0x53d   :  { %v6049_v25 = vpop.f32.mrf.mxu1 }
 0x557   :  { %v7078_v26 = vpop.f32.mrf.mxu1 }
 0x559   :  { %v7079_v32 = vpop.f32.mrf.mxu1 }
 0x55a   :  { %v7080_v35 = vadd.f32 %v7079_v32, %v7078_v26 }
 0x55b   :  { %v7081_v37 = vpop.f32.mrf.mxu1 }
 0x55c   :  { %v6127_v36 = vadd.f32 %v7080_v35, %v3288_v4 }
 0x55d   :  { %v7082_v39 = vpop.f32.mrf.mxu1 }
 0x576   :  { %v6085_v46 = vpop.f32.mrf.mxu0 }
 0x577   :  { %v6086_v48 = vadd.f32 %v6085_v46, %v6045_v45  ;;  %v7122_v50 = vpop.f32.mrf.mxu1 }
 0x578   :  { %v6087_v51 = vpop.f32.mrf.mxu0 }
 0x579   :  { %6256 = vst [vmem:[#allocation17 + $0x20] sm:$0xff] %v6086_v48  ;;  %v6088_v53 = vadd.f32 %v6087_v51, %v6047_v47  ;;  %v7123_v56 = vpop.f32.mrf.mxu1 }
 0x57a   :  { %v6089_v57 = vpop.f32.mrf.mxu0  ;;  %v7124_v29 = vadd.f32 %v7123_v56, %v7122_v50 }
 0x57b   :  { %6257 = vst [vmem:[#allocation17 + $0x28] sm:$0xff] %v6088_v53  ;;  %v7125_v60 = vpop.f32.mrf.mxu1 }
 0x57c   :  { %v6090_v55 = vpop.f32.mrf.mxu0 }
 0x57d   :  { %v7126_v61 = vpop.f32.mrf.mxu1 }
 0x596   :  { %v7100_v63 = vpop.f32.mrf.mxu0 }
 0x598   :  { %v7101_v59 = vpop.f32.mrf.mxu0 }
 0x599   :  { %v7102_v6 = vadd.f32 %v7101_v59, %v7100_v63 }
 0x59a   :  { %v7103_v0 = vpop.f32.mrf.mxu0 }
 0x59b   :  { %v6167_v1 = vadd.f32 %v7102_v6, %v6127_v36 }
 0x59c   :  { %v7104_v2 = vpop.f32.mrf.mxu0 }
 0x59d   :  { %v6207_v10 = vadd.f32 %v7124_v29, %v6167_v1 }
 0x5b6   :  { %v7144_v7 = vpop.f32.mrf.mxu0 }
 0x5b8   :  { %v7145_v30 = vpop.f32.mrf.mxu0 }
 0x5b9   :  { %v7146_v31 = vadd.f32 %v7145_v30, %v7144_v7 }
 0x5ba   :  { %v7147_v11 = vpop.f32.mrf.mxu0 }
 0x5bb   :  { %v6247_v9 = vadd.f32 %v7146_v31, %v6207_v10 }
 0x5bc   :  { %v7148_v12 = vpop.f32.mrf.mxu0 }
 0x5bd   :  { %6258 = vst [vmem:[#allocation17 + $0x30] sm:$0xff] %v6247_v9 }
 0x5be   :  { %8121 = shalt.err (!%p8118_p7)
}
 0x5bf   :  { %6268 = dma.vmem_to_hbm [thread:$0]  %s6266_s8, 896, %s8418_s9, [#allocation4]  }
 0x5c0   :  { %8140 = dma.done.wait [#allocation4], 896  }
 0x5c1   :  { %8141 = vsyncadd [#allocation4], 4294966400 }
 0x5c2   :  { %6272 = vsyncpa [#allocation3], 1 }
 0x5c3   :  { %6273 = vsyncpa [#allocation6], 1 }
 0x5c4   :  { %6274 = vsyncpa [#allocation9], 1 }
 0x5c5   :  { %6275 = vsyncpa [#allocation12], 1 }
 0x5c6   :  { %6276 = vsyncpa [#allocation15], 1 }
 0x5c7   :  { %6277 = vsyncpa [#allocation4], 1 }

</bundles_post_ra>
